<compile_context>
chip_gen: v7x
topology: tpu7x:2x2x1
jax: 0.10.0
libtpu: 0.0.40
codegen_flags: <defaults>
</compile_context>

<pallas_src>
import jax
import jax.numpy as jnp
from jax import lax
from jax.experimental import pallas as pl
from jax.experimental.pallas import tpu as pltpu


def _bcam_kernel(
    xq_ref, xk_ref, l_ref, lmadd_ref,
    w_v124_ref, b_v124_ref,
    w_v3_ref, b_v3_ref,
    w_lang_ref, b_lang_ref,
    w_out1_ref, b_out1_ref,
    w_v22_ref, b_v22_ref,
    w_aproj_ref, b_aproj_ref,
    w_out3a_ref, w_out3b_ref, b_out3_ref,
    o_ref,
    a_scr, out_scr, q4_scr, acc_scr, m_scr, l_scr,
):
    k = pl.program_id(2)
    nk = pl.num_programs(2)
    D = o_ref.shape[-1]
    cdt = xq_ref.dtype  # MXU input dtype (bf16 or f32)

    # ---------------- stage 1 (once per (batch, HW-tile)): row-parallel work ----------------
    @pl.when(k == 0)
    def _stage1():
        x_q = xq_ref[0]                                   # (TM, Cv)

        # Fused vis_1 / vis_2 / vis_4 projections in one wide MXU pass.
        qcat = jnp.maximum(
            jnp.dot(x_q, w_v124_ref[...], preferred_element_type=jnp.float32)
            + b_v124_ref[...], 0.0)                       # (TM, 3D) f32
        query = qcat[:, 0 * D:1 * D]
        query2 = qcat[:, 1 * D:2 * D]
        query4 = qcat[:, 2 * D:3 * D]

        # lang_reduce: (Nl, Cl) @ (Cl, D)
        l_red = (jnp.dot(l_ref[0], w_lang_ref[...], preferred_element_type=jnp.float32)
                 + b_lang_ref[...])                        # (Nl, D) f32
        l_red_c = l_red.astype(cdt)

        # First (vision -> language) attention, softmax over Nl.
        # dot_general contracting dim 1 of both operands avoids an explicit transpose.
        sim = lax.dot_general(query.astype(cdt), l_red_c,
                              (((1,), (1,)), ((), ())),
                              preferred_element_type=jnp.float32)   # (TM, Nl)
        sim = sim + lmadd_ref[0]                           # additive mask (precomputed)
        m1 = jnp.max(sim, axis=-1, keepdims=True)
        e1 = jnp.exp(sim - m1)
        p1 = e1 * pl.reciprocal(jnp.sum(e1, axis=-1, keepdims=True), approx=True)
        out1 = jnp.dot(p1.astype(cdt), l_red_c,
                       preferred_element_type=jnp.float32)          # (TM, D)

        # A = tanh(out_1(out) + vis_2_2(query2))
        a_t = jnp.tanh(
            jnp.dot(out1.astype(cdt), w_out1_ref[...], preferred_element_type=jnp.float32)
            + b_out1_ref[...]
            + jnp.dot(query2.astype(cdt), w_v22_ref[...], preferred_element_type=jnp.float32)
            + b_v22_ref[...])

        a_scr[...] = a_t.astype(a_scr.dtype)
        out_scr[...] = out1.astype(out_scr.dtype)
        q4_scr[...] = query4
        acc_scr[...] = jnp.zeros_like(acc_scr)
        m_scr[...] = jnp.full_like(m_scr, -jnp.inf)
        l_scr[...] = jnp.zeros_like(l_scr)

    # -------- every hw tile: flash-style second attention (a_proj -> softmax -> @ vis_3) ----
    # V for this hw tile: ReLU(vis_3(x[hw tile]))
    v = jnp.maximum(
        jnp.dot(xk_ref[0], w_v3_ref[...], preferred_element_type=jnp.float32)
        + b_v3_ref[...], 0.0)                              # (TK, D) f32

    logits = (jnp.dot(a_scr[...], w_aproj_ref[...], preferred_element_type=jnp.float32)
              + b_aproj_ref[...])                          # (TM, TK) f32

    m_prev = m_scr[...]
    m_new = jnp.maximum(m_prev, jnp.max(logits, axis=-1, keepdims=True))
    alpha = jnp.exp(m_prev - m_new)
    p = jnp.exp(logits - m_new)
    l_scr[...] = alpha * l_scr[...] + jnp.sum(p, axis=-1, keepdims=True)
    acc_scr[...] = alpha * acc_scr[...] + jnp.dot(
        p.astype(cdt), v.astype(cdt), preferred_element_type=jnp.float32)
    m_scr[...] = m_new

    # ---------------- finalize (last hw tile): normalize, out3 projection, residual ----------
    @pl.when(k == nk - 1)
    def _finalize():
        out2 = acc_scr[...] * pl.reciprocal(l_scr[...], approx=True)   # (TM, D)
        # out3 = ReLU(cat([out2, out], -1) @ w_out3 + b) as a split matmul (no concat copy).
        out3 = (jnp.dot(out2.astype(cdt), w_out3a_ref[...], preferred_element_type=jnp.float32)
                + jnp.dot(out_scr[...], w_out3b_ref[...], preferred_element_type=jnp.float32)
                + b_out3_ref[...])
        out3 = jnp.maximum(out3, 0.0)
        o_ref[0] = (out3 + q4_scr[...]).astype(o_ref.dtype)


def init_bcam_params(key, dim, v_in_channels, l_in_channels, hw):
    """Deterministic synthetic parameters. Weights stored as (in, out); biases as (1, out)."""
    ks = jax.random.split(key, 20)
    s = 0.05

    def w(k, shape):
        return (s * jax.random.normal(k, shape)).astype(jnp.float32)

    return {
        "w_lang": w(ks[0], (l_in_channels, dim)),  "b_lang": w(ks[1], (1, dim)),
        "w_v1":   w(ks[2], (v_in_channels, dim)),  "b_v1":   w(ks[3], (1, dim)),
        "w_v2":   w(ks[4], (v_in_channels, dim)),  "b_v2":   w(ks[5], (1, dim)),
        "w_v3":   w(ks[6], (v_in_channels, dim)),  "b_v3":   w(ks[7], (1, dim)),
        "w_v4":   w(ks[8], (v_in_channels, dim)),  "b_v4":   w(ks[9], (1, dim)),
        "w_out1": w(ks[10], (dim, dim)),           "b_out1": w(ks[11], (1, dim)),
        "w_v22":  w(ks[12], (dim, dim)),           "b_v22":  w(ks[13], (1, dim)),
        "w_aproj": w(ks[14], (dim, hw)),           "b_aproj": w(ks[15], (1, hw)),
        "w_out3": w(ks[16], (2 * dim, dim)),       "b_out3": w(ks[17], (1, dim)),
    }


def _pick_tile(n, align, cap):
    """Largest divisor of n that is a multiple of `align` and <= cap; else the full dim."""
    for t in range(min(cap, n), align - 1, -1):
        if n % t == 0 and t % align == 0:
            return t
    return n


def bcam_forward(x, l, l_mask, params, *, compute_dtype=jnp.bfloat16, tm=None, tk=None):
    """x: (B, HW, Cv), l: (B, Cl, Nl), l_mask: (B, Nl, 1)  (PyTorch conventions)."""
    B, HW, Cv = x.shape
    Cl, Nl = l.shape[1], l.shape[2]
    D = params["w_v1"].shape[1]
    hw = params["w_aproj"].shape[1]
    assert hw == HW, "BCAM's rel_map @ vis_3(x) requires a_proj width == HW"

    # Tile sizes: HW-tile (output rows) and hw-tile (flash reduction axis).
    if tm is None:
        tm = _pick_tile(HW, 8, 256)
    if tk is None:
        tk = _pick_tile(hw, 128, 512)
    assert HW % tm == 0 and (tm % 8 == 0 or tm == HW)
    assert hw % tk == 0 and (tk % 128 == 0 or tk == hw)

    cdt = compute_dtype
    f32 = jnp.float32

    # ---- glue: layout permutes, additive mask precompute, weight packing / dtype casts ----
    x_c = x.astype(cdt)
    l_perm = jnp.transpose(l, (0, 2, 1)).astype(cdt)                    # (B, Nl, Cl)
    lmask_add = jnp.transpose(10000.0 * l_mask - 10000.0, (0, 2, 1)).astype(f32)  # (B, 1, Nl)

    w_v124 = jnp.concatenate(
        [params["w_v1"], params["w_v2"], params["w_v4"]], axis=1).astype(cdt)     # (Cv, 3D)
    b_v124 = jnp.concatenate(
        [params["b_v1"], params["b_v2"], params["b_v4"]], axis=1).astype(f32)     # (1, 3D)
    w_v3 = params["w_v3"].astype(cdt)
    b_v3 = params["b_v3"].astype(f32)
    w_lang = params["w_lang"].astype(cdt)
    b_lang = params["b_lang"].astype(f32)
    w_out1 = params["w_out1"].astype(cdt)
    b_out1 = params["b_out1"].astype(f32)
    w_v22 = params["w_v22"].astype(cdt)
    b_v22 = params["b_v22"].astype(f32)
    w_aproj = params["w_aproj"].astype(cdt)
    b_aproj = params["b_aproj"].astype(f32)
    w_out3a = params["w_out3"][:D, :].astype(cdt)
    w_out3b = params["w_out3"][D:, :].astype(cdt)
    b_out3 = params["b_out3"].astype(f32)

    const_w = [w_v124, b_v124, w_v3, b_v3, w_lang, b_lang, w_out1, b_out1, w_v22, b_v22]
    tail_w = [w_out3a, w_out3b, b_out3]

    def _const2(b, i, k):
        return (0, 0)

    in_specs = (
        [pl.BlockSpec((1, tm, Cv), lambda b, i, k: (b, i, 0)),    # x rows for this output tile
         pl.BlockSpec((1, tk, Cv), lambda b, i, k: (b, k, 0)),    # x rows for the streamed hw tile
         pl.BlockSpec((1, Nl, Cl), lambda b, i, k: (b, 0, 0)),
         pl.BlockSpec((1, 1, Nl), lambda b, i, k: (b, 0, 0))]
        + [pl.BlockSpec(w.shape, _const2) for w in const_w]
        + [pl.BlockSpec((D, tk), lambda b, i, k: (0, k)),          # w_aproj streamed along hw
           pl.BlockSpec((1, tk), lambda b, i, k: (0, k))]          # b_aproj streamed along hw
        + [pl.BlockSpec(w.shape, _const2) for w in tail_w]
    )

    grid = (B, HW // tm, hw // tk)

    out = pl.pallas_call(
        _bcam_kernel,
        out_shape=jax.ShapeDtypeStruct((B, HW, D), jnp.float32),
        grid_spec=pltpu.PrefetchScalarGridSpec(
            num_scalar_prefetch=0,
            grid=grid,
            in_specs=in_specs,
            out_specs=pl.BlockSpec((1, tm, D), lambda b, i, k: (b, i, 0)),
            scratch_shapes=[
                pltpu.VMEM((tm, D), cdt),          # a_scr  : tanh A (flash Q)
                pltpu.VMEM((tm, D), cdt),          # out_scr: first-attention output
                pltpu.VMEM((tm, D), jnp.float32),  # q4_scr : ReLU(vis_4(x)) residual
                pltpu.VMEM((tm, D), jnp.float32),  # acc_scr: flash accumulator
                pltpu.VMEM((tm, 1), jnp.float32),  # m_scr  : running max
                pltpu.VMEM((tm, 1), jnp.float32),  # l_scr  : running sum
            ],
        ),
        compiler_params=pltpu.CompilerParams(
            dimension_semantics=("parallel", "parallel", "arbitrary"),
            vmem_limit_bytes=48 * 1024 * 1024,
        ),
    )(x_c, x_c, l_perm, lmask_add, *const_w, w_aproj, b_aproj, *tail_w)
    return out


def bcam_reference(x, l, l_mask, params):
    """Pure-JAX f32 reference mirroring the PyTorch forward exactly."""
    lt = jnp.einsum("bcn,cd->bnd", l, params["w_lang"]) + params["b_lang"]   # (B, Nl, D)
    query = jax.nn.relu(x @ params["w_v1"] + params["b_v1"])
    sim = jnp.einsum("bqd,bnd->bqn", query, lt)
    lm = jnp.transpose(l_mask, (0, 2, 1))
    sim = sim + (10000.0 * lm - 10000.0)
    sim = jax.nn.softmax(sim, axis=-1)
    out = jnp.einsum("bqn,bnd->bqd", sim, lt)
    query2 = jax.nn.relu(x @ params["w_v2"] + params["b_v2"])
    A = jnp.tanh(out @ params["w_out1"] + params["b_out1"]
                 + query2 @ params["w_v22"] + params["b_v22"])
    A = A @ params["w_aproj"] + params["b_aproj"]
    rel_map = jax.nn.softmax(A, axis=-1)
    query3 = jax.nn.relu(x @ params["w_v3"] + params["b_v3"])
    out2 = jnp.einsum("bqk,bkd->bqd", rel_map, query3)
    out3 = jnp.concatenate([out2, out], axis=-1)
    out3 = jax.nn.relu(out3 @ params["w_out3"] + params["b_out3"])
    query4 = jax.nn.relu(x @ params["w_v4"] + params["b_v4"])
    return out3 + query4


if __name__ == "__main__":
    # Small demo shapes: 16x16 spatial grid => HW = hw = 256, so both the HW tile axis
    # (tm=128) and the flash hw-reduction axis (tk=128) have 2 steps each.
    B, Hs, Ws = 2, 16, 16
    HW = Hs * Ws
    Cv, Cl, Nl, D = 8, 12, 8, 32
    hw = HW

    key = jax.random.PRNGKey(0)
    k_x, k_l, k_m, k_p = jax.random.split(key, 4)

    x = jax.random.normal(k_x, (B, HW, Cv), dtype=jnp.float32)
    l = jax.random.normal(k_l, (B, Cl, Nl), dtype=jnp.float32)
    l_mask = (jax.random.uniform(k_m, (B, Nl, 1)) > 0.3).astype(jnp.float32)  # (B, Nl, 1)

    params = init_bcam_params(k_p, D, Cv, Cl, hw)
    ref = bcam_reference(x, l, l_mask, params)

    # f32 path: validates the flash-softmax / tiling / split-matmul restructuring.
    out_f32 = jax.block_until_ready(
        bcam_forward(x, l, l_mask, params, compute_dtype=jnp.float32, tm=128, tk=128))
    assert out_f32.shape == (B, HW, D)
    assert jnp.allclose(out_f32, ref, atol=5e-3, rtol=5e-3), "f32 Pallas output mismatch"

    # bf16 MXU path (the performance configuration): looser tolerance vs the f32 reference.
    out_bf16 = jax.block_until_ready(
        bcam_forward(x, l, l_mask, params, compute_dtype=jnp.bfloat16, tm=128, tk=128))
    assert out_bf16.shape == (B, HW, D)
    assert jnp.allclose(out_bf16, ref, atol=3e-2, rtol=3e-2), "bf16 Pallas output mismatch"

    print("KERNEL_OK")
</pallas_src>

<mosaic_0001>
module attributes {stable_mosaic.version = 11 : i64} {
  func.func @_bcam_kernel(%arg0: i32, %arg1: i32, %arg2: i32, %arg3: memref<1x128x8xf32, #tpu.memory_space<vmem>>, %arg4: memref<1x128x8xf32, #tpu.memory_space<vmem>>, %arg5: memref<1x8x12xf32, #tpu.memory_space<vmem>>, %arg6: memref<1x1x8xf32, #tpu.memory_space<vmem>>, %arg7: memref<8x96xf32, #tpu.memory_space<vmem>>, %arg8: memref<1x96xf32, #tpu.memory_space<vmem>>, %arg9: memref<8x32xf32, #tpu.memory_space<vmem>>, %arg10: memref<1x32xf32, #tpu.memory_space<vmem>>, %arg11: memref<12x32xf32, #tpu.memory_space<vmem>>, %arg12: memref<1x32xf32, #tpu.memory_space<vmem>>, %arg13: memref<32x32xf32, #tpu.memory_space<vmem>>, %arg14: memref<1x32xf32, #tpu.memory_space<vmem>>, %arg15: memref<32x32xf32, #tpu.memory_space<vmem>>, %arg16: memref<1x32xf32, #tpu.memory_space<vmem>>, %arg17: memref<32x128xf32, #tpu.memory_space<vmem>>, %arg18: memref<1x128xf32, #tpu.memory_space<vmem>>, %arg19: memref<32x32xf32, #tpu.memory_space<vmem>>, %arg20: memref<32x32xf32, #tpu.memory_space<vmem>>, %arg21: memref<1x32xf32, #tpu.memory_space<vmem>>, %arg22: memref<1x128x32xf32, #tpu.memory_space<vmem>>, %arg23: memref<128x32xf32, #tpu.memory_space<vmem>>, %arg24: memref<128x32xf32, #tpu.memory_space<vmem>>, %arg25: memref<128x32xf32, #tpu.memory_space<vmem>>, %arg26: memref<128x32xf32, #tpu.memory_space<vmem>>, %arg27: memref<128x1xf32, #tpu.memory_space<vmem>>, %arg28: memref<128x1xf32, #tpu.memory_space<vmem>>) attributes {dimension_semantics = [#tpu.dimension_semantics<parallel>, #tpu.dimension_semantics<parallel>, #tpu.dimension_semantics<arbitrary>], iteration_bounds = array<i64: 2, 2, 2>, scalar_prefetch = 0 : i64, scratch_operands = 6 : i64, tpu.core_type = #tpu.core_type<tc>, window_params = [{transform_indices = @transform_0, window_bounds = array<i64: 1, 128, 8>}, {transform_indices = @transform_1, window_bounds = array<i64: 1, 128, 8>}, {transform_indices = @transform_2, window_bounds = array<i64: 1, 8, 12>}, {transform_indices = @transform_3, window_bounds = array<i64: 1, 1, 8>}, {pipeline_mode = #tpu.pipeline_mode<synchronous>, transform_indices = @transform_4, window_bounds = array<i64: 8, 96>}, {pipeline_mode = #tpu.pipeline_mode<synchronous>, transform_indices = @transform_5, window_bounds = array<i64: 1, 96>}, {pipeline_mode = #tpu.pipeline_mode<synchronous>, transform_indices = @transform_6, window_bounds = array<i64: 8, 32>}, {pipeline_mode = #tpu.pipeline_mode<synchronous>, transform_indices = @transform_7, window_bounds = array<i64: 1, 32>}, {pipeline_mode = #tpu.pipeline_mode<synchronous>, transform_indices = @transform_8, window_bounds = array<i64: 12, 32>}, {pipeline_mode = #tpu.pipeline_mode<synchronous>, transform_indices = @transform_9, window_bounds = array<i64: 1, 32>}, {pipeline_mode = #tpu.pipeline_mode<synchronous>, transform_indices = @transform_10, window_bounds = array<i64: 32, 32>}, {pipeline_mode = #tpu.pipeline_mode<synchronous>, transform_indices = @transform_11, window_bounds = array<i64: 1, 32>}, {pipeline_mode = #tpu.pipeline_mode<synchronous>, transform_indices = @transform_12, window_bounds = array<i64: 32, 32>}, {pipeline_mode = #tpu.pipeline_mode<synchronous>, transform_indices = @transform_13, window_bounds = array<i64: 1, 32>}, {transform_indices = @transform_14, window_bounds = array<i64: 32, 128>}, {transform_indices = @transform_15, window_bounds = array<i64: 1, 128>}, {pipeline_mode = #tpu.pipeline_mode<synchronous>, transform_indices = @transform_16, window_bounds = array<i64: 32, 32>}, {pipeline_mode = #tpu.pipeline_mode<synchronous>, transform_indices = @transform_17, window_bounds = array<i64: 32, 32>}, {pipeline_mode = #tpu.pipeline_mode<synchronous>, transform_indices = @transform_18, window_bounds = array<i64: 1, 32>}, {transform_indices = @transform_19, window_bounds = array<i64: 1, 128, 32>}]} {
    %c0_i32 = arith.constant 0 : i32
    %0 = arith.cmpi eq, %arg2, %c0_i32 : i32
    %1 = arith.extui %0 : i1 to i32
    %c0_i32_0 = arith.constant 0 : i32
    %2 = arith.cmpi ne, %1, %c0_i32_0 : i32
    scf.if %2 {
      %c0_31 = arith.constant 0 : index
      %c0_32 = arith.constant 0 : index
      %c0_33 = arith.constant 0 : index
      %43 = vector.load %arg3[%c0_31, %c0_32, %c0_33] : memref<1x128x8xf32, #tpu.memory_space<vmem>>, vector<1x128x8xf32>
      %44 = vector.shape_cast %43 : vector<1x128x8xf32> to vector<128x8xf32>
      %c0_34 = arith.constant 0 : index
      %c0_35 = arith.constant 0 : index
      %45 = vector.load %arg7[%c0_34, %c0_35] : memref<8x96xf32, #tpu.memory_space<vmem>>, vector<8x96xf32>
      %cst_36 = arith.constant dense<0.000000e+00> : vector<128x96xf32>
      %46 = tpu.matmul %44, %45, %cst_36 {dimension_numbers = #tpu.dot_dimension_numbers<[1], [0], [0], [1], [0, 0, 1, 1], [], []>} : vector<128x8xf32>, vector<8x96xf32>, vector<128x96xf32> -> vector<128x96xf32>
      %c0_37 = arith.constant 0 : index
      %c0_38 = arith.constant 0 : index
      %47 = vector.load %arg8[%c0_37, %c0_38] : memref<1x96xf32, #tpu.memory_space<vmem>>, vector<1x96xf32>
      %48 = vector.broadcast %47 : vector<1x96xf32> to vector<128x96xf32>
      %49 = arith.addf %46, %48 : vector<128x96xf32>
      %cst_39 = arith.constant 0.000000e+00 : f32
      %50 = vector.broadcast %cst_39 : f32 to vector<128x96xf32>
      %51 = arith.maximumf %49, %50 : vector<128x96xf32>
      %52 = vector.extract_strided_slice %51 {offsets = [0, 0], sizes = [128, 32], strides = [1, 1]} : vector<128x96xf32> to vector<128x32xf32>
      %53 = vector.extract_strided_slice %51 {offsets = [0, 32], sizes = [128, 32], strides = [1, 1]} : vector<128x96xf32> to vector<128x32xf32>
      %54 = vector.extract_strided_slice %51 {offsets = [0, 64], sizes = [128, 32], strides = [1, 1]} : vector<128x96xf32> to vector<128x32xf32>
      %c0_40 = arith.constant 0 : index
      %c0_41 = arith.constant 0 : index
      %c0_42 = arith.constant 0 : index
      %55 = vector.load %arg5[%c0_40, %c0_41, %c0_42] : memref<1x8x12xf32, #tpu.memory_space<vmem>>, vector<1x8x12xf32>
      %56 = vector.shape_cast %55 : vector<1x8x12xf32> to vector<8x12xf32>
      %c0_43 = arith.constant 0 : index
      %c0_44 = arith.constant 0 : index
      %57 = vector.load %arg11[%c0_43, %c0_44] : memref<12x32xf32, #tpu.memory_space<vmem>>, vector<12x32xf32>
      %cst_45 = arith.constant dense<0.000000e+00> : vector<8x32xf32>
      %58 = tpu.matmul %56, %57, %cst_45 {dimension_numbers = #tpu.dot_dimension_numbers<[1], [0], [0], [1], [0, 0, 1, 1], [], []>} : vector<8x12xf32>, vector<12x32xf32>, vector<8x32xf32> -> vector<8x32xf32>
      %c0_46 = arith.constant 0 : index
      %c0_47 = arith.constant 0 : index
      %59 = vector.load %arg12[%c0_46, %c0_47] : memref<1x32xf32, #tpu.memory_space<vmem>>, vector<1x32xf32>
      %60 = vector.broadcast %59 : vector<1x32xf32> to vector<8x32xf32>
      %61 = arith.addf %58, %60 : vector<8x32xf32>
      %cst_48 = arith.constant dense<0.000000e+00> : vector<128x8xf32>
      %62 = tpu.matmul %52, %61, %cst_48 {dimension_numbers = #tpu.dot_dimension_numbers<[1], [1], [0], [0], [0, 0, 1, 0], [], []>} : vector<128x32xf32>, vector<8x32xf32>, vector<128x8xf32> -> vector<128x8xf32>
      %c0_49 = arith.constant 0 : index
      %c0_50 = arith.constant 0 : index
      %c0_51 = arith.constant 0 : index
      %63 = vector.load %arg6[%c0_49, %c0_50, %c0_51] : memref<1x1x8xf32, #tpu.memory_space<vmem>>, vector<1x1x8xf32>
      %64 = vector.shape_cast %63 : vector<1x1x8xf32> to vector<1x8xf32>
      %65 = vector.broadcast %64 : vector<1x8xf32> to vector<128x8xf32>
      %66 = arith.addf %62, %65 : vector<128x8xf32>
      %cst_52 = arith.constant dense<0xFF800000> : vector<128xf32>
      %67 = vector.multi_reduction <maximumf>, %66, %cst_52 [1] : vector<128x8xf32> to vector<128xf32>
      %68 = vector.shape_cast %67 : vector<128xf32> to vector<128x1xf32>
      %69 = vector.broadcast %68 : vector<128x1xf32> to vector<128x8xf32>
      %70 = arith.subf %66, %69 : vector<128x8xf32>
      %71 = math.exp %70 : vector<128x8xf32>
      %cst_53 = arith.constant dense<0.000000e+00> : vector<128xf32>
      %72 = vector.multi_reduction <add>, %71, %cst_53 [1] : vector<128x8xf32> to vector<128xf32>
      %73 = vector.shape_cast %72 : vector<128xf32> to vector<128x1xf32>
      %74 = tpu.reciprocal %73 {approx = true} : vector<128x1xf32> -> vector<128x1xf32>
      %75 = vector.broadcast %74 : vector<128x1xf32> to vector<128x8xf32>
      %76 = arith.mulf %71, %75 : vector<128x8xf32>
      %cst_54 = arith.constant dense<0.000000e+00> : vector<128x32xf32>
      %77 = tpu.matmul %76, %61, %cst_54 {dimension_numbers = #tpu.dot_dimension_numbers<[1], [0], [0], [1], [0, 0, 1, 1], [], []>} : vector<128x8xf32>, vector<8x32xf32>, vector<128x32xf32> -> vector<128x32xf32>
      %c0_55 = arith.constant 0 : index
      %c0_56 = arith.constant 0 : index
      %78 = vector.load %arg13[%c0_55, %c0_56] : memref<32x32xf32, #tpu.memory_space<vmem>>, vector<32x32xf32>
      %cst_57 = arith.constant dense<0.000000e+00> : vector<128x32xf32>
      %79 = tpu.matmul %77, %78, %cst_57 {dimension_numbers = #tpu.dot_dimension_numbers<[1], [0], [0], [1], [0, 0, 1, 1], [], []>} : vector<128x32xf32>, vector<32x32xf32>, vector<128x32xf32> -> vector<128x32xf32>
      %c0_58 = arith.constant 0 : index
      %c0_59 = arith.constant 0 : index
      %80 = vector.load %arg14[%c0_58, %c0_59] : memref<1x32xf32, #tpu.memory_space<vmem>>, vector<1x32xf32>
      %81 = vector.broadcast %80 : vector<1x32xf32> to vector<128x32xf32>
      %82 = arith.addf %79, %81 : vector<128x32xf32>
      %c0_60 = arith.constant 0 : index
      %c0_61 = arith.constant 0 : index
      %83 = vector.load %arg15[%c0_60, %c0_61] : memref<32x32xf32, #tpu.memory_space<vmem>>, vector<32x32xf32>
      %cst_62 = arith.constant dense<0.000000e+00> : vector<128x32xf32>
      %84 = tpu.matmul %53, %83, %cst_62 {dimension_numbers = #tpu.dot_dimension_numbers<[1], [0], [0], [1], [0, 0, 1, 1], [], []>} : vector<128x32xf32>, vector<32x32xf32>, vector<128x32xf32> -> vector<128x32xf32>
      %85 = arith.addf %82, %84 : vector<128x32xf32>
      %c0_63 = arith.constant 0 : index
      %c0_64 = arith.constant 0 : index
      %86 = vector.load %arg16[%c0_63, %c0_64] : memref<1x32xf32, #tpu.memory_space<vmem>>, vector<1x32xf32>
      %87 = vector.broadcast %86 : vector<1x32xf32> to vector<128x32xf32>
      %88 = arith.addf %85, %87 : vector<128x32xf32>
      %89 = math.tanh %88 : vector<128x32xf32>
      %c0_65 = arith.constant 0 : index
      %c0_66 = arith.constant 0 : index
      %90 = vector.load %arg23[%c0_65, %c0_66] : memref<128x32xf32, #tpu.memory_space<vmem>>, vector<128x32xf32>
      tpu.vector_store %arg23[%c0_65, %c0_66], %89 {strides = array<i32>} : memref<128x32xf32, #tpu.memory_space<vmem>>, vector<128x32xf32>,
      %c0_67 = arith.constant 0 : index
      %c0_68 = arith.constant 0 : index
      %91 = vector.load %arg24[%c0_67, %c0_68] : memref<128x32xf32, #tpu.memory_space<vmem>>, vector<128x32xf32>
      tpu.vector_store %arg24[%c0_67, %c0_68], %77 {strides = array<i32>} : memref<128x32xf32, #tpu.memory_space<vmem>>, vector<128x32xf32>,
      %c0_69 = arith.constant 0 : index
      %c0_70 = arith.constant 0 : index
      %92 = vector.load %arg25[%c0_69, %c0_70] : memref<128x32xf32, #tpu.memory_space<vmem>>, vector<128x32xf32>
      tpu.vector_store %arg25[%c0_69, %c0_70], %54 {strides = array<i32>} : memref<128x32xf32, #tpu.memory_space<vmem>>, vector<128x32xf32>,
      %cst_71 = arith.constant 0.000000e+00 : f32
      %93 = vector.broadcast %cst_71 : f32 to vector<128x32xf32>
      %c0_72 = arith.constant 0 : index
      %c0_73 = arith.constant 0 : index
      %94 = vector.load %arg26[%c0_72, %c0_73] : memref<128x32xf32, #tpu.memory_space<vmem>>, vector<128x32xf32>
      tpu.vector_store %arg26[%c0_72, %c0_73], %93 {strides = array<i32>} : memref<128x32xf32, #tpu.memory_space<vmem>>, vector<128x32xf32>,
      %cst_74 = arith.constant 0xFF800000 : f32
      %95 = vector.broadcast %cst_74 : f32 to vector<128x1xf32>
      %c0_75 = arith.constant 0 : index
      %c0_76 = arith.constant 0 : index
      %96 = vector.load %arg27[%c0_75, %c0_76] : memref<128x1xf32, #tpu.memory_space<vmem>>, vector<128x1xf32>
      tpu.vector_store %arg27[%c0_75, %c0_76], %95 {strides = array<i32>} : memref<128x1xf32, #tpu.memory_space<vmem>>, vector<128x1xf32>,
      %cst_77 = arith.constant 0.000000e+00 : f32
      %97 = vector.broadcast %cst_77 : f32 to vector<128x1xf32>
      %c0_78 = arith.constant 0 : index
      %c0_79 = arith.constant 0 : index
      %98 = vector.load %arg28[%c0_78, %c0_79] : memref<128x1xf32, #tpu.memory_space<vmem>>, vector<128x1xf32>
      tpu.vector_store %arg28[%c0_78, %c0_79], %97 {strides = array<i32>} : memref<128x1xf32, #tpu.memory_space<vmem>>, vector<128x1xf32>,
    } else {
    }
    %c0 = arith.constant 0 : index
    %c0_1 = arith.constant 0 : index
    %c0_2 = arith.constant 0 : index
    %3 = vector.load %arg4[%c0, %c0_1, %c0_2] : memref<1x128x8xf32, #tpu.memory_space<vmem>>, vector<1x128x8xf32>
    %4 = vector.shape_cast %3 : vector<1x128x8xf32> to vector<128x8xf32>
    %c0_3 = arith.constant 0 : index
    %c0_4 = arith.constant 0 : index
    %5 = vector.load %arg9[%c0_3, %c0_4] : memref<8x32xf32, #tpu.memory_space<vmem>>, vector<8x32xf32>
    %cst = arith.constant dense<0.000000e+00> : vector<128x32xf32>
    %6 = tpu.matmul %4, %5, %cst {dimension_numbers = #tpu.dot_dimension_numbers<[1], [0], [0], [1], [0, 0, 1, 1], [], []>} : vector<128x8xf32>, vector<8x32xf32>, vector<128x32xf32> -> vector<128x32xf32>
    %c0_5 = arith.constant 0 : index
    %c0_6 = arith.constant 0 : index
    %7 = vector.load %arg10[%c0_5, %c0_6] : memref<1x32xf32, #tpu.memory_space<vmem>>, vector<1x32xf32>
    %8 = vector.broadcast %7 : vector<1x32xf32> to vector<128x32xf32>
    %9 = arith.addf %6, %8 : vector<128x32xf32>
    %cst_7 = arith.constant 0.000000e+00 : f32
    %10 = vector.broadcast %cst_7 : f32 to vector<128x32xf32>
    %11 = arith.maximumf %9, %10 : vector<128x32xf32>
    %c0_8 = arith.constant 0 : index
    %c0_9 = arith.constant 0 : index
    %12 = vector.load %arg23[%c0_8, %c0_9] : memref<128x32xf32, #tpu.memory_space<vmem>>, vector<128x32xf32>
    %c0_10 = arith.constant 0 : index
    %c0_11 = arith.constant 0 : index
    %13 = vector.load %arg17[%c0_10, %c0_11] : memref<32x128xf32, #tpu.memory_space<vmem>>, vector<32x128xf32>
    %cst_12 = arith.constant dense<0.000000e+00> : vector<128x128xf32>
    %14 = tpu.matmul %12, %13, %cst_12 {dimension_numbers = #tpu.dot_dimension_numbers<[1], [0], [0], [1], [0, 0, 1, 1], [], []>} : vector<128x32xf32>, vector<32x128xf32>, vector<128x128xf32> -> vector<128x128xf32>
    %c0_13 = arith.constant 0 : index
    %c0_14 = arith.constant 0 : index
    %15 = vector.load %arg18[%c0_13, %c0_14] : memref<1x128xf32, #tpu.memory_space<vmem>>, vector<1x128xf32>
    %16 = vector.broadcast %15 : vector<1x128xf32> to vector<128x128xf32>
    %17 = arith.addf %14, %16 : vector<128x128xf32>
    %c0_15 = arith.constant 0 : index
    %c0_16 = arith.constant 0 : index
    %18 = vector.load %arg27[%c0_15, %c0_16] : memref<128x1xf32, #tpu.memory_space<vmem>>, vector<128x1xf32>
    %cst_17 = arith.constant dense<0xFF800000> : vector<128xf32>
    %19 = vector.multi_reduction <maximumf>, %17, %cst_17 [1] : vector<128x128xf32> to vector<128xf32>
    %20 = vector.shape_cast %19 : vector<128xf32> to vector<128x1xf32>
    %21 = arith.maximumf %18, %20 : vector<128x1xf32>
    %22 = arith.subf %18, %21 : vector<128x1xf32>
    %23 = math.exp %22 : vector<128x1xf32>
    %24 = vector.broadcast %21 : vector<128x1xf32> to vector<128x128xf32>
    %25 = arith.subf %17, %24 : vector<128x128xf32>
    %26 = math.exp %25 : vector<128x128xf32>
    %c0_18 = arith.constant 0 : index
    %c0_19 = arith.constant 0 : index
    %27 = vector.load %arg28[%c0_18, %c0_19] : memref<128x1xf32, #tpu.memory_space<vmem>>, vector<128x1xf32>
    %28 = arith.mulf %23, %27 : vector<128x1xf32>
    %cst_20 = arith.constant dense<0.000000e+00> : vector<128xf32>
    %29 = vector.multi_reduction <add>, %26, %cst_20 [1] : vector<128x128xf32> to vector<128xf32>
    %30 = vector.shape_cast %29 : vector<128xf32> to vector<128x1xf32>
    %31 = arith.addf %28, %30 : vector<128x1xf32>
    %c0_21 = arith.constant 0 : index
    %c0_22 = arith.constant 0 : index
    %32 = vector.load %arg28[%c0_21, %c0_22] : memref<128x1xf32, #tpu.memory_space<vmem>>, vector<128x1xf32>
    tpu.vector_store %arg28[%c0_21, %c0_22], %31 {strides = array<i32>} : memref<128x1xf32, #tpu.memory_space<vmem>>, vector<128x1xf32>,
    %c0_23 = arith.constant 0 : index
    %c0_24 = arith.constant 0 : index
    %33 = vector.load %arg26[%c0_23, %c0_24] : memref<128x32xf32, #tpu.memory_space<vmem>>, vector<128x32xf32>
    %34 = vector.broadcast %23 : vector<128x1xf32> to vector<128x32xf32>
    %35 = arith.mulf %34, %33 : vector<128x32xf32>
    %cst_25 = arith.constant dense<0.000000e+00> : vector<128x32xf32>
    %36 = tpu.matmul %26, %11, %cst_25 {dimension_numbers = #tpu.dot_dimension_numbers<[1], [0], [0], [1], [0, 0, 1, 1], [], []>} : vector<128x128xf32>, vector<128x32xf32>, vector<128x32xf32> -> vector<128x32xf32>
    %37 = arith.addf %35, %36 : vector<128x32xf32>
    %c0_26 = arith.constant 0 : index
    %c0_27 = arith.constant 0 : index
    %38 = vector.load %arg26[%c0_26, %c0_27] : memref<128x32xf32, #tpu.memory_space<vmem>>, vector<128x32xf32>
    tpu.vector_store %arg26[%c0_26, %c0_27], %37 {strides = array<i32>} : memref<128x32xf32, #tpu.memory_space<vmem>>, vector<128x32xf32>,
    %c0_28 = arith.constant 0 : index
    %c0_29 = arith.constant 0 : index
    %39 = vector.load %arg27[%c0_28, %c0_29] : memref<128x1xf32, #tpu.memory_space<vmem>>, vector<128x1xf32>
    tpu.vector_store %arg27[%c0_28, %c0_29], %21 {strides = array<i32>} : memref<128x1xf32, #tpu.memory_space<vmem>>, vector<128x1xf32>,
    %c1_i32 = arith.constant 1 : i32
    %40 = arith.cmpi eq, %arg2, %c1_i32 : i32
    %41 = arith.extui %40 : i1 to i32
    %c0_i32_30 = arith.constant 0 : i32
    %42 = arith.cmpi ne, %41, %c0_i32_30 : i32
    scf.if %42 {
      %c0_31 = arith.constant 0 : index
      %c0_32 = arith.constant 0 : index
      %43 = vector.load %arg26[%c0_31, %c0_32] : memref<128x32xf32, #tpu.memory_space<vmem>>, vector<128x32xf32>
      %c0_33 = arith.constant 0 : index
      %c0_34 = arith.constant 0 : index
      %44 = vector.load %arg28[%c0_33, %c0_34] : memref<128x1xf32, #tpu.memory_space<vmem>>, vector<128x1xf32>
      %45 = tpu.reciprocal %44 {approx = true} : vector<128x1xf32> -> vector<128x1xf32>
      %46 = vector.broadcast %45 : vector<128x1xf32> to vector<128x32xf32>
      %47 = arith.mulf %43, %46 : vector<128x32xf32>
      %c0_35 = arith.constant 0 : index
      %c0_36 = arith.constant 0 : index
      %48 = vector.load %arg19[%c0_35, %c0_36] : memref<32x32xf32, #tpu.memory_space<vmem>>, vector<32x32xf32>
      %cst_37 = arith.constant dense<0.000000e+00> : vector<128x32xf32>
      %49 = tpu.matmul %47, %48, %cst_37 {dimension_numbers = #tpu.dot_dimension_numbers<[1], [0], [0], [1], [0, 0, 1, 1], [], []>} : vector<128x32xf32>, vector<32x32xf32>, vector<128x32xf32> -> vector<128x32xf32>
      %c0_38 = arith.constant 0 : index
      %c0_39 = arith.constant 0 : index
      %50 = vector.load %arg24[%c0_38, %c0_39] : memref<128x32xf32, #tpu.memory_space<vmem>>, vector<128x32xf32>
      %c0_40 = arith.constant 0 : index
      %c0_41 = arith.constant 0 : index
      %51 = vector.load %arg20[%c0_40, %c0_41] : memref<32x32xf32, #tpu.memory_space<vmem>>, vector<32x32xf32>
      %cst_42 = arith.constant dense<0.000000e+00> : vector<128x32xf32>
      %52 = tpu.matmul %50, %51, %cst_42 {dimension_numbers = #tpu.dot_dimension_numbers<[1], [0], [0], [1], [0, 0, 1, 1], [], []>} : vector<128x32xf32>, vector<32x32xf32>, vector<128x32xf32> -> vector<128x32xf32>
      %53 = arith.addf %49, %52 : vector<128x32xf32>
      %c0_43 = arith.constant 0 : index
      %c0_44 = arith.constant 0 : index
      %54 = vector.load %arg21[%c0_43, %c0_44] : memref<1x32xf32, #tpu.memory_space<vmem>>, vector<1x32xf32>
      %55 = vector.broadcast %54 : vector<1x32xf32> to vector<128x32xf32>
      %56 = arith.addf %53, %55 : vector<128x32xf32>
      %cst_45 = arith.constant 0.000000e+00 : f32
      %57 = vector.broadcast %cst_45 : f32 to vector<128x32xf32>
      %58 = arith.maximumf %56, %57 : vector<128x32xf32>
      %c0_46 = arith.constant 0 : index
      %c0_47 = arith.constant 0 : index
      %59 = vector.load %arg25[%c0_46, %c0_47] : memref<128x32xf32, #tpu.memory_space<vmem>>, vector<128x32xf32>
      %60 = arith.addf %58, %59 : vector<128x32xf32>
      %c0_48 = arith.constant 0 : index
      %c0_49 = arith.constant 0 : index
      %c0_50 = arith.constant 0 : index
      %61 = vector.load %arg22[%c0_48, %c0_49, %c0_50] : memref<1x128x32xf32, #tpu.memory_space<vmem>>, vector<1x128x32xf32>
      %62 = vector.shape_cast %61 : vector<1x128x32xf32> to vector<128x32xf32>
      %63 = vector.shape_cast %60 : vector<128x32xf32> to vector<1x128x32xf32>
      tpu.vector_store %arg22[%c0_48, %c0_49, %c0_50], %63 {strides = array<i32>} : memref<1x128x32xf32, #tpu.memory_space<vmem>>, vector<1x128x32xf32>,
    } else {
    }
    return
  }
  func.func @transform_0(%arg0: i32, %arg1: i32, %arg2: i32) -> (i32, i32, i32) {
    %c0_i32 = arith.constant 0 : i32
    %c0_i32_0 = arith.constant 0 : i32
    return %arg0, %arg1, %c0_i32 : i32, i32, i32
  }
  func.func @transform_1(%arg0: i32, %arg1: i32, %arg2: i32) -> (i32, i32, i32) {
    %c0_i32 = arith.constant 0 : i32
    %c0_i32_0 = arith.constant 0 : i32
    return %arg0, %arg2, %c0_i32 : i32, i32, i32
  }
  func.func @transform_2(%arg0: i32, %arg1: i32, %arg2: i32) -> (i32, i32, i32) {
    %c0_i32 = arith.constant 0 : i32
    %c0_i32_0 = arith.constant 0 : i32
    %c0_i32_1 = arith.constant 0 : i32
    return %arg0, %c0_i32, %c0_i32_0 : i32, i32, i32
  }
  func.func @transform_3(%arg0: i32, %arg1: i32, %arg2: i32) -> (i32, i32, i32) {
    %c0_i32 = arith.constant 0 : i32
    %c0_i32_0 = arith.constant 0 : i32
    %c0_i32_1 = arith.constant 0 : i32
    return %arg0, %c0_i32, %c0_i32_0 : i32, i32, i32
  }
  func.func @transform_4(%arg0: i32, %arg1: i32, %arg2: i32) -> (i32, i32) {
    %c0_i32 = arith.constant 0 : i32
    %c0_i32_0 = arith.constant 0 : i32
    %c0_i32_1 = arith.constant 0 : i32
    return %c0_i32, %c0_i32_0 : i32, i32
  }
  func.func @transform_5(%arg0: i32, %arg1: i32, %arg2: i32) -> (i32, i32) {
    %c0_i32 = arith.constant 0 : i32
    %c0_i32_0 = arith.constant 0 : i32
    %c0_i32_1 = arith.constant 0 : i32
    return %c0_i32, %c0_i32_0 : i32, i32
  }
  func.func @transform_6(%arg0: i32, %arg1: i32, %arg2: i32) -> (i32, i32) {
    %c0_i32 = arith.constant 0 : i32
    %c0_i32_0 = arith.constant 0 : i32
    %c0_i32_1 = arith.constant 0 : i32
    return %c0_i32, %c0_i32_0 : i32, i32
  }
  func.func @transform_7(%arg0: i32, %arg1: i32, %arg2: i32) -> (i32, i32) {
    %c0_i32 = arith.constant 0 : i32
    %c0_i32_0 = arith.constant 0 : i32
    %c0_i32_1 = arith.constant 0 : i32
    return %c0_i32, %c0_i32_0 : i32, i32
  }
  func.func @transform_8(%arg0: i32, %arg1: i32, %arg2: i32) -> (i32, i32) {
    %c0_i32 = arith.constant 0 : i32
    %c0_i32_0 = arith.constant 0 : i32
    %c0_i32_1 = arith.constant 0 : i32
    return %c0_i32, %c0_i32_0 : i32, i32
  }
  func.func @transform_9(%arg0: i32, %arg1: i32, %arg2: i32) -> (i32, i32) {
    %c0_i32 = arith.constant 0 : i32
    %c0_i32_0 = arith.constant 0 : i32
    %c0_i32_1 = arith.constant 0 : i32
    return %c0_i32, %c0_i32_0 : i32, i32
  }
  func.func @transform_10(%arg0: i32, %arg1: i32, %arg2: i32) -> (i32, i32) {
    %c0_i32 = arith.constant 0 : i32
    %c0_i32_0 = arith.constant 0 : i32
    %c0_i32_1 = arith.constant 0 : i32
    return %c0_i32, %c0_i32_0 : i32, i32
  }
  func.func @transform_11(%arg0: i32, %arg1: i32, %arg2: i32) -> (i32, i32) {
    %c0_i32 = arith.constant 0 : i32
    %c0_i32_0 = arith.constant 0 : i32
    %c0_i32_1 = arith.constant 0 : i32
    return %c0_i32, %c0_i32_0 : i32, i32
  }
  func.func @transform_12(%arg0: i32, %arg1: i32, %arg2: i32) -> (i32, i32) {
    %c0_i32 = arith.constant 0 : i32
    %c0_i32_0 = arith.constant 0 : i32
    %c0_i32_1 = arith.constant 0 : i32
    return %c0_i32, %c0_i32_0 : i32, i32
  }
  func.func @transform_13(%arg0: i32, %arg1: i32, %arg2: i32) -> (i32, i32) {
    %c0_i32 = arith.constant 0 : i32
    %c0_i32_0 = arith.constant 0 : i32
    %c0_i32_1 = arith.constant 0 : i32
    return %c0_i32, %c0_i32_0 : i32, i32
  }
  func.func @transform_14(%arg0: i32, %arg1: i32, %arg2: i32) -> (i32, i32) {
    %c0_i32 = arith.constant 0 : i32
    %c0_i32_0 = arith.constant 0 : i32
    return %c0_i32, %arg2 : i32, i32
  }
  func.func @transform_15(%arg0: i32, %arg1: i32, %arg2: i32) -> (i32, i32) {
    %c0_i32 = arith.constant 0 : i32
    %c0_i32_0 = arith.constant 0 : i32
    return %c0_i32, %arg2 : i32, i32
  }
  func.func @transform_16(%arg0: i32, %arg1: i32, %arg2: i32) -> (i32, i32) {
    %c0_i32 = arith.constant 0 : i32
    %c0_i32_0 = arith.constant 0 : i32
    %c0_i32_1 = arith.constant 0 : i32
    return %c0_i32, %c0_i32_0 : i32, i32
  }
  func.func @transform_17(%arg0: i32, %arg1: i32, %arg2: i32) -> (i32, i32) {
    %c0_i32 = arith.constant 0 : i32
    %c0_i32_0 = arith.constant 0 : i32
    %c0_i32_1 = arith.constant 0 : i32
    return %c0_i32, %c0_i32_0 : i32, i32
  }
  func.func @transform_18(%arg0: i32, %arg1: i32, %arg2: i32) -> (i32, i32) {
    %c0_i32 = arith.constant 0 : i32
    %c0_i32_0 = arith.constant 0 : i32
    %c0_i32_1 = arith.constant 0 : i32
    return %c0_i32, %c0_i32_0 : i32, i32
  }
  func.func @transform_19(%arg0: i32, %arg1: i32, %arg2: i32) -> (i32, i32, i32) {
    %c0_i32 = arith.constant 0 : i32
    %c0_i32_0 = arith.constant 0 : i32
    return %arg0, %arg1, %c0_i32 : i32, i32, i32
  }
}

</mosaic_0001>

<bundles_post_ra>
// kernel: tpu_custom_call.1
= control target key start
LH: loop header
LB: loop body
LE: loop exit
PB: predicated region body
PF: predicated region fallthrough
CT: control target
= control target key end

     0   :  { %s6844_s0 = inlined_call_operand.vmem [shape: f32[2,256,8], index: 0, kind: input, shape index: {}]   ;;  %s6845_s1 = inlined_call_operand.vmem [shape: f32[2,256,8], index: 1, kind: input, shape index: {}]   ;;  %s6846_s2 = inlined_call_operand.vmem [shape: f32[2,8,12], index: 2, kind: input, shape index: {}]   ;;  %s6847_s3 = inlined_call_operand.vmem [shape: f32[2,1,8], index: 3, kind: input, shape index: {}]   ;;  %s6848_s4 = inlined_call_operand.vmem [shape: f32[8,96], index: 4, kind: input, shape index: {}]   ;;  %s6849_s5 = inlined_call_operand.vmem [shape: f32[1,96], index: 5, kind: input, shape index: {}]   ;;  %s6850_s6 = inlined_call_operand.vmem [shape: f32[8,32], index: 6, kind: input, shape index: {}]   ;;  %s6851_s7 = inlined_call_operand.vmem [shape: f32[1,32], index: 7, kind: input, shape index: {}]   ;;  %s6852_s8 = inlined_call_operand.vmem [shape: f32[12,32], index: 8, kind: input, shape index: {}]   ;;  %s6853_s9 = inlined_call_operand.vmem [shape: f32[1,32], index: 9, kind: input, shape index: {}]   ;;  %s6854_s10 = inlined_call_operand.vmem [shape: f32[32,32], index: 10, kind: input, shape index: {}]   ;;  %s6855_s11 = inlined_call_operand.vmem [shape: f32[1,32], index: 11, kind: input, shape index: {}]   ;;  %s6856_s12 = inlined_call_operand.vmem [shape: f32[32,32], index: 12, kind: input, shape index: {}]   ;;  %s6857_s13 = inlined_call_operand.vmem [shape: f32[1,32], index: 13, kind: input, shape index: {}]   ;;  %s6858_s14 = inlined_call_operand.vmem [shape: f32[32,256], index: 14, kind: input, shape index: {}]   ;;  %s6859_s15 = inlined_call_operand.vmem [shape: f32[1,256], index: 15, kind: input, shape index: {}]   ;;  %s6860_s16 = inlined_call_operand.vmem [shape: f32[32,32], index: 16, kind: input, shape index: {}]   ;;  %s6861_s17 = inlined_call_operand.vmem [shape: f32[32,32], index: 17, kind: input, shape index: {}]   ;;  %s6862_s18 = inlined_call_operand.vmem [shape: f32[1,32], index: 18, kind: input, shape index: {}]   ;;  %s6863_s19 = inlined_call_operand.vmem [shape: f32[2,256,32], index: 19, kind: output, shape index: {}]  }
   0x1   :  { %6874 = sst [smem:[#allocation18_spill]] %s6844_s0 }
   0x2   :  { %6875 = sst [smem:[#allocation19_spill]] %s6845_s1 }
   0x3   :  { %6876 = sst [smem:[#allocation20_spill]] %s6846_s2 }
   0x4   :  { %6877 = sst [smem:[#allocation21_spill]] %s6847_s3 }
   0x5   :  { %6878 = sst [smem:[#allocation22_spill]] %s6850_s6 }
   0x6   :  { %6879 = sst [smem:[#allocation23_spill]] %s6851_s7 }
   0x7   :  { %6880 = sst [smem:[#allocation24_spill]] %s6854_s10 }
   0x8   :  { %6881 = sst [smem:[#allocation25_spill]] %s6855_s11 }
   0x9   :  { %6882 = sst [smem:[#allocation26_spill]] %s6856_s12 }
   0xa   :  { %6883 = sst [smem:[#allocation27_spill]] %s6857_s13 }
   0xb   :  { %6884 = sst [smem:[#allocation28_spill]] %s6858_s14 }
   0xc   :  { %6885 = sst [smem:[#allocation29_spill]] %s6860_s16 }
   0xd   :  { %6886 = sst [smem:[#allocation30_spill]] %s6861_s17 }
   0xe   :  { %6887 = sst [smem:[#allocation31_spill]] %s6862_s18 }
   0xf   :  { %s5523_s0 = smov 0   ;;  %s5525_s30 = smov 0  }
  0x10   :  { %s5527_s20 = smov 0   ;;  %s5529_s21 = smov 0  }
  0x11   :  { %s5531_s1 = smov 0   ;;  %s5533_s22 = smov 0  }
  0x12   :  { %s5535_s2 = smov 0   ;;  %s5537_s23 = smov 0  }
  0x13   :  { %s5539_s24 = smov 0  }
  0x14 LB: > { %6888 = sst [smem:[#allocation9_spill]] %s5384_s30  ;;  %s41_s25 = sadd.s32 1, %s5400_s22  ;;  %s5412_s24 = sphi %s5539_s24, %s29_s24   ;;  %s5408_s23 = sphi %s5537_s23, %s6924_s23   ;;  %s5404_s2 = sphi %s5535_s2, %s6923_s2   ;;  %s5400_s22 = sphi %s5533_s22, %s6922_s22   ;;  %s5396_s1 = sphi %s5531_s1, %s6921_s1   ;;  %s5392_s21 = sphi %s5529_s21, %s6920_s21   ;;  %s5388_s20 = sphi %s5527_s20, %s6919_s20   ;;  %s5384_s30 = sphi %s5525_s30, %s6918_s30   ;;  %s5380_s0 = sphi %s5523_s0, %s6917_s0  }
  0x15   : > { %6889 = sst [smem:[#allocation10_spill]] %s5400_s22  ;;  %p42_p0 = scmp.ge.s32.totalorder %s41_s25, 2 }
  0x16   : > { %6890 = sst [smem:[#allocation11_spill]] %s5404_s2  ;;  %s44_s3 = sadd.s32 1, %s5404_s2 }
  0x17   : > { %6891 = sst [smem:[#allocation12_spill]] %s5408_s23  ;;  %s48_s26 = sadd.s32 1, %s5408_s23 }
  0x18   : > { %6892 = sst [smem:[#allocation13_spill]] %s5412_s24  ;;  %p380_p1 = scmp.ne.s32.totalorder %s5384_s30, %s5380_s0 }
  0x19   : > { %s6926_s25 = smov (%p42_p0, %s41_s25), 0  ;;  %s6928_s3 = smov (!%p42_p0, %s44_s3), %s5404_s2 }
  0x1a   : > { %6893 = sst [smem:[#allocation14_spill]] %s6926_s25  ;;  %s370_s27 = ssub.s32 %s5400_s22, %s6926_s25 }
  0x1b   : > { %p381_p2 = scmp.eq.s32.totalorder %s5412_s24, 0  ;;  %p46_p3 = scmp.ge.s32.totalorder %s6928_s3, 2 }
  0x1c   : > { %p371_p4 = scmp.eq.s32.totalorder %s370_s27, 0  ;;  %s373_s28 = sadd.s32 1, %s5384_s30 }
  0x1d   : > { %p382_p5 = por %p381_p2, %p380_p1  ;;  %s6930_s3 = smov (%p46_p3, %s6928_s3), 0 }
  0x1e   : > { %6894 = sst [smem:[#allocation15_spill]] %s6930_s3  ;;  %s6932_s26 = smov (!%p46_p3, %s48_s26), %s5408_s23 }
  0x1f   : > { %s5584_s29 = scalar_select %p371_p4, %s5384_s30, %s373_s28  }
  0x20   : > { %p50_p6 = scmp.ge.s32.totalorder %s6932_s26, 2  ;;  %p4219_p7 = scmp.ge.s32.totalorder %s5412_s24, 8 }
  0x21   : > { %6895 = sst [smem:[#allocation16_spill]] %s5584_s29 }
  0x22   : > { %s6934_s26 = smov (%p50_p6, %s6932_s26), 0  ;;  %562 = sbr.rel (%p4219_p7) target bundleno = 53 (0x35), region = 68 }
  0x23   : > { %6896 = sst [smem:[#allocation17_spill]] %s6934_s26 }
  0x29   : > { %604 = sbr.rel (!%p382_p5) target bundleno = 53 (0x35), region = 88  ;;  %s606_s25 = sand.u32 (%p382_p5), 1, %s5384_s30  }
  0x2a   : > { %s4221_s2 = sshll.u32 (%p382_p5), %s5400_s22, 3  ;;  %s4220_s18 = sshll.u32 (%p382_p5), %s606_s25, 5 }
  0x2b   : > { %s6897_s14 = sld [smem:[#allocation28_spill]] (%p382_p5)  ;;  %s608_s28 = scalar_lea.vmem (%p382_p5), [#allocation8], %s4220_s18 }
  0x31   : > { %s610_s17 = scalar_lea.vmem %s6897_s14, %s4221_s2 }
  0x32   : > { %v644_v0 = vld [vmem:[%s610_s17] sm:$0xff]  ;;  %v646_v1 = vld [vmem:[%s610_s17 + $0x10] sm:$0xff] }
  0x33   : > { %v648_v2 = vld [vmem:[%s610_s17 + $0x20] sm:$0xff]  ;;  %645 = vst [vmem:[%s608_s28] sm:$0xff] %v644_v0  ;;  %647 = vst [vmem:[%s608_s28 + $0x8] sm:$0xff] %v646_v1  ;;  %v650_v3 = vld [vmem:[%s610_s17 + $0x30] sm:$0xff] }
  0x34   : > { %649 = vst [vmem:[%s608_s28 + $0x10] sm:$0xff] %v648_v2  ;;  %651 = vst [vmem:[%s608_s28 + $0x18] sm:$0xff] %v650_v3 }
  0x35 PF: > { %p4222_p8 = scmp.ge.s32.totalorder %s5412_s24, 1  ;;  %p662_p9 = scmp.lt.s32.totalorder %s5412_s24, 9 }
  0x37   : > { %p663_p10 = pnand %p4222_p8, %p662_p9 }
  0x38   : > { %s669_s16 = sand.u32 (!%p663_p10), 1, %s5380_s0   ;;  %s4224_s18 = sshll.u32 (!%p663_p10), %s5392_s21, 4 }
  0x39   : > { %666 = sbr.rel (%p663_p10) target bundleno = 2488 (0x9b8), region = 130  ;;  %s4223_s2 = sshll.u32 (!%p663_p10), %s669_s16, 5 }
  0x3a   : > { %p757_p11 = scmp.lt.s32.totalorder (!%p663_p10), %s5396_s1, 1  ;;  %p759_p12 = scmp.lt.s32.totalorder (!%p663_p10), %s4224_s18, 31 }
  0x3b   : > { %s4227_s25 = sshll.u32 (!%p663_p10), %s5388_s20, 4  ;;  %s6898_s21 = sld [smem:[#allocation18_spill]] (!%p663_p10) }
  0x3c   : > { %p769_p13 = scmp.lt.s32.totalorder (!%p663_p10), %s4227_s25, 31  ;;  %s6899_s22 = sld [smem:[#allocation20_spill]] (!%p663_p10) }
  0x3d   : > { %s6900_s7 = sld [smem:[#allocation21_spill]] (!%p663_p10)  ;;  %p783_p0 = scmp.lt.s32.totalorder (!%p663_p10), %s5388_s20, 1 }
  0x3e   : > { %s6901_s12 = sld [smem:[#allocation19_spill]] (!%p663_p10)  ;;  %s5637_s30 = scalar_lea.vmem (!%p663_p10), [#allocation8], %s4223_s2 }
  0x3f   : > { %p4234_p1 = scmp.ne.s32.totalorder (!%p663_p10), %s5388_s20, 0 }
  0x40   : > { %s6936_s1 = smov (!%p757_p11, %s5396_s1), 1  ;;  %s6938_s18 = smov (!%p759_p12, %s4224_s18), 31 }
  0x41   : > { %s4225_s17 = sshll.u32 %s6936_s1, 5  ;;  %s4230_s14 = sshll.u32 %s6936_s1, 3  ;;  %v816_v4 = vld [vmem:[%s6848_s4] sm:$0xff] (!%p4234_p1)  ;;  %vm824_vm0 = vcmask (!%p4234_p1), 64512   ;;  %vm1048_vm1 = vcmask (!%p4234_p1), 1043456   ;;  %vm5414_vm2 = vmmov (!%p4234_p1), 1  }
  0x42   : > { %s762_s27 = sadd.s32 %s4225_s17, %s6938_s18  ;;  %s5613_s29 = scalar_lea.vmem %s6899_s22, %s4230_s14  ;;  %4596 = vmatprep.subr.mxu0 (!%p4234_p1), %v816_v4  ;;  %v1035_v7 = vld [vmem:[%s6852_s8] sm:$0xff] (!%p4234_p1)  ;;  %v1036_v8 = vld [vmem:[%s6852_s8 + $0x8] sm:$0xf] (!%p4234_p1)  ;;  %vm5653_vm3 = vmpackc.low (!%p4234_p1), %vm1048_vm1, %vm5414_vm2  ;;  %vm1129_vm4 = vcmask (!%p4234_p1), 261120   ;;  %vm2279_vm5 = vcmask (!%p4234_p1), 7168   ;;  %v5415_v12 = vmov (!%p4234_p1), 0.0|0.0  }
  0x43   : > { %s4226_s28 = sshll.u32 %s762_s27, 3  ;;  %s6940_s25 = smov (!%p769_p13, %s4227_s25), 31  ;;  %4597 = vmatpush3.msra.mxu0 (!%p4234_p1), %v816_v4  ;;  %v4924_v10 = vpack.c.bf16 (!%p4234_p1), %v1036_v8, %v1035_v7  ;;  %v5416_v13 = vmov (!%p4234_p1), 0.0   ;;  %v5417_v15 = vmov (!%p4234_p1), -inf   ;;  %vm5418_vm6 = vmmov (!%p4234_p1), 0   ;;  %v1034_v28 = vld [vmem:[%s5613_s29] sm:$0xff] (!%p4234_p1) }
  0x44   : > { %s5608_s3 = scalar_lea.vmem %s6898_s21, %s4226_s28  ;;  %s782_s6 = scalar_lea.vmem %s6900_s7, %s6936_s1  ;;  %4923 = vmatprep.subr.bf16.mxu0 (!%p4234_p1), %v5415_v12  ;;  %2263 = vst.msk [vmem:[#allocation5] sm:$0xff] (!%p4234_p1), %vm1129_vm4, %v5416_v13  ;;  %2264 = vst.msk [vmem:[#allocation5 + $0x8] sm:$0xff] (!%p4234_p1), %vm1129_vm4, %v5416_v13  ;;  %vm1044_vm7 = vcmask (!%p4234_p1), 97280   ;;  %v5772_v29 = vld [vmem:[%s6849_s5] ss:$0 sm:$0xff] (!%p4234_p1) }
  0x45   : > { %s772_s18 = sadd.s32 %s4225_s17, %s6940_s25  ;;  %s5623_s11 = scalar_lea.vmem %s6863_s19, %s4226_s28  ;;  %v800_v5 = vld [vmem:[%s5608_s3] sm:$0xff] (!%p4234_p1)  ;;  %v801_v6 = vld [vmem:[%s5608_s3 + $0x8] sm:$0xff] (!%p4234_p1)  ;;  %v802_v9 = vld [vmem:[%s5608_s3 + $0x10] sm:$0xff] (!%p4234_p1)  ;;  %2265 = vst.msk [vmem:[#allocation5 + $0x10] sm:$0xff] (!%p4234_p1), %vm1129_vm4, %v5416_v13 }
  0x46   : > { %s4229_s26 = sshll.u32 %s772_s18, 3  ;;  %799 = sbr.rel (%p4234_p1) target bundleno = 1358 (0x54e), region = 138  ;;  %4598 = vmatprep.mubr.msk.f32.mxu0 (!%p4234_p1), %vm824_vm0, %v800_v5  ;;  %2266 = vst.msk [vmem:[#allocation5 + $0x18] sm:$0xff] (!%p4234_p1), %vm1129_vm4, %v5416_v13  ;;  %2267 = vst.msk [vmem:[#allocation5 + $0x20] sm:$0xff] (!%p4234_p1), %vm1129_vm4, %v5416_v13  ;;  %v803_v14 = vld [vmem:[%s5608_s3 + $0x18] sm:$0xff] (!%p4234_p1)  ;;  %v804_v16 = vld [vmem:[%s5608_s3 + $0x20] sm:$0xff] (!%p4234_p1) }
  0x47   : > { %s5628_s10 = scalar_lea.vmem %s6901_s12, %s4229_s26  ;;  %4599 = vmatmul.mubr.msk.f32.vlgmr.msra.gmra.mrb[0].mxu0 (!%p4234_p1), %vm824_vm0, %v801_v6  ;;  %2268 = vst.msk [vmem:[#allocation5 + $0x28] sm:$0xff] (!%p4234_p1), %vm1129_vm4, %v5416_v13  ;;  %2269 = vst.msk [vmem:[#allocation5 + $0x30] sm:$0xff] (!%p4234_p1), %vm1129_vm4, %v5416_v13  ;;  %v805_v17 = vld [vmem:[%s5608_s3 + $0x28] sm:$0xff] (!%p4234_p1)  ;;  %v806_v18 = vld [vmem:[%s5608_s3 + $0x30] sm:$0xff] (!%p4234_p1)  ;;  %s5420_s1 = smov (!%p4234_p1), 64  }
  0x48   : > { %s5631_s14 = scalar_select %p783_p0, %s5388_s20, 1 }
  0x49   : > { %2270 = vst.msk [vmem:[#allocation5 + $0x38] sm:$0xff] (!%p4234_p1), %vm1129_vm4, %v5416_v13  ;;  %2271 = vst.msk [vmem:[#allocation5 + $0x40] sm:$0xff] (!%p4234_p1), %vm1129_vm4, %v5416_v13  ;;  %4926 = vmatpush3.bf16.msk.msra.mxu0 (!%p4234_p1), %vm5653_vm3, %v4924_v10  ;;  %4601 = vmatprep.mubr.msk.f32.mxu0 (!%p4234_p1), %vm824_vm0, %v802_v9  ;;  %v807_v19 = vld [vmem:[%s5608_s3 + $0x38] sm:$0xff] (!%p4234_p1)  ;;  %v808_v20 = vld [vmem:[%s5608_s3 + $0x40] sm:$0xff] (!%p4234_p1)  ;;  %s6905_s22 = sld [smem:[#allocation24_spill]] (!%p4234_p1)  ;;  %s6909_s12 = sld [smem:[#allocation27_spill]] (!%p4234_p1) }
  0x4a   : > { %s785_s7 = scalar_lea.vmem %s6859_s15, %s5631_s14  ;;  %2272 = vst.msk [vmem:[#allocation5 + $0x48] sm:$0xff] (!%p4234_p1), %vm1129_vm4, %v5416_v13  ;;  %2273 = vst.msk [vmem:[#allocation5 + $0x50] sm:$0xff] (!%p4234_p1), %vm1129_vm4, %v5416_v13  ;;  %v809_v21 = vld [vmem:[%s5608_s3 + $0x48] sm:$0xff] (!%p4234_p1)  ;;  %v810_v22 = vld [vmem:[%s5608_s3 + $0x50] sm:$0xff] (!%p4234_p1) }
  0x4b   : > { %2274 = vst.msk [vmem:[#allocation5 + $0x58] sm:$0xff] (!%p4234_p1), %vm1129_vm4, %v5416_v13  ;;  %2275 = vst.msk [vmem:[#allocation5 + $0x60] sm:$0xff] (!%p4234_p1), %vm1129_vm4, %v5416_v13  ;;  %4602 = vmatmul.mubr.msk.f32.gmra.mrb[2].mxu0 (!%p4234_p1), %vm824_vm0, %v803_v14  ;;  %v811_v23 = vld [vmem:[%s5608_s3 + $0x58] sm:$0xff] (!%p4234_p1)  ;;  %v812_v24 = vld [vmem:[%s5608_s3 + $0x60] sm:$0xff] (!%p4234_p1) }
  0x4c   : > { %2276 = vst.msk [vmem:[#allocation5 + $0x68] sm:$0xff] (!%p4234_p1), %vm1129_vm4, %v5416_v13  ;;  %2277 = vst.msk [vmem:[#allocation5 + $0x70] sm:$0xff] (!%p4234_p1), %vm1129_vm4, %v5416_v13  ;;  %4604 = vmatprep.mubr.msk.f32.mxu0 (!%p4234_p1), %vm824_vm0, %v804_v16  ;;  %v813_v25 = vld [vmem:[%s5608_s3 + $0x68] sm:$0xff] (!%p4234_p1)  ;;  %v814_v26 = vld [vmem:[%s5608_s3 + $0x70] sm:$0xff] (!%p4234_p1) }
  0x4d   : > { %2278 = vst.msk [vmem:[#allocation5 + $0x78] sm:$0xff] %vm1129_vm4, %v5416_v13  ;;  %v815_v27 = vld [vmem:[%s5608_s3 + $0x78] sm:$0xff]  ;;  %v4252_v50 = vld [vmem:[%s6853_s9] ss:$0 sm:$0xff]  ;;  %s6907_s3 = sld [smem:[#allocation26_spill]] }
  0x4e   : > { %2296 = vst.msk [vmem:[#allocation7] sm:$0xff] %vm2279_vm5, %v5416_v13  ;;  %2297 = vst.msk [vmem:[#allocation7 + $0x8] sm:$0xff] %vm2279_vm5, %v5416_v13 }
  0x4f   : > { %2298 = vst.msk [vmem:[#allocation7 + $0x10] sm:$0xff] %vm2279_vm5, %v5416_v13  ;;  %2299 = vst.msk [vmem:[#allocation7 + $0x18] sm:$0xff] %vm2279_vm5, %v5416_v13  ;;  %4605 = vmatmul.mubr.msk.f32.gmra.mrb[4].mxu0 %vm824_vm0, %v805_v17  ;;  %s6906_s13 = smov %s6905_s22 }
  0x50   : > { %2300 = vst.msk [vmem:[#allocation7 + $0x20] sm:$0xff] %vm2279_vm5, %v5416_v13  ;;  %2301 = vst.msk [vmem:[#allocation7 + $0x28] sm:$0xff] %vm2279_vm5, %v5416_v13  ;;  %4607 = vmatprep.mubr.msk.f32.mxu0 %vm824_vm0, %v806_v18  ;;  %v4255_v18 = vld [vmem:[%s782_s6] ss:$0 sm:$0xff]  ;;  %s5419_s6 = smov 96  }
  0x51   : > { %2302 = vst.msk [vmem:[#allocation7 + $0x30] sm:$0xff] %vm2279_vm5, %v5416_v13  ;;  %2303 = vst.msk [vmem:[#allocation7 + $0x38] sm:$0xff] %vm2279_vm5, %v5416_v13 }
  0x52   : > { %2304 = vst.msk [vmem:[#allocation7 + $0x40] sm:$0xff] %vm2279_vm5, %v5416_v13  ;;  %2305 = vst.msk [vmem:[#allocation7 + $0x48] sm:$0xff] %vm2279_vm5, %v5416_v13 }
  0x53   : > { %2306 = vst.msk [vmem:[#allocation7 + $0x50] sm:$0xff] %vm2279_vm5, %v5416_v13  ;;  %2307 = vst.msk [vmem:[#allocation7 + $0x58] sm:$0xff] %vm2279_vm5, %v5416_v13  ;;  %4608 = vmatmul.mubr.msk.f32.gmra.mrb[6].mxu0 %vm824_vm0, %v807_v19 }
  0x54   : > { %2308 = vst.msk [vmem:[#allocation7 + $0x60] sm:$0xff] %vm2279_vm5, %v5416_v13  ;;  %2309 = vst.msk [vmem:[#allocation7 + $0x68] sm:$0xff] %vm2279_vm5, %v5416_v13  ;;  %4610 = vmatprep.mubr.msk.f32.mxu0 %vm824_vm0, %v808_v20 }
  0x55   : > { %2310 = vst.msk [vmem:[#allocation7 + $0x70] sm:$0xff] %vm2279_vm5, %v5416_v13  ;;  %2311 = vst.msk [vmem:[#allocation7 + $0x78] sm:$0xff] %vm2279_vm5, %v5416_v13 }
  0x56   : > { %2280 = vst.msk [vmem:[#allocation6] sm:$0xff] %vm2279_vm5, %v5417_v15  ;;  %2281 = vst.msk [vmem:[#allocation6 + $0x8] sm:$0xff] %vm2279_vm5, %v5417_v15 }
  0x57   : > { %2282 = vst.msk [vmem:[#allocation6 + $0x10] sm:$0xff] %vm2279_vm5, %v5417_v15  ;;  %2283 = vst.msk [vmem:[#allocation6 + $0x18] sm:$0xff] %vm2279_vm5, %v5417_v15  ;;  %4611 = vmatmul.mubr.msk.f32.gmra.mrb[8].mxu0 %vm824_vm0, %v809_v21 }
  0x58   : > { %2284 = vst.msk [vmem:[#allocation6 + $0x20] sm:$0xff] %vm2279_vm5, %v5417_v15  ;;  %2285 = vst.msk [vmem:[#allocation6 + $0x28] sm:$0xff] %vm2279_vm5, %v5417_v15  ;;  %4613 = vmatprep.mubr.msk.f32.mxu0 %vm824_vm0, %v810_v22 }
  0x59   : > { %2286 = vst.msk [vmem:[#allocation6 + $0x30] sm:$0xff] %vm2279_vm5, %v5417_v15  ;;  %2287 = vst.msk [vmem:[#allocation6 + $0x38] sm:$0xff] %vm2279_vm5, %v5417_v15 }
  0x5a   : > { %2288 = vst.msk [vmem:[#allocation6 + $0x40] sm:$0xff] %vm2279_vm5, %v5417_v15  ;;  %2289 = vst.msk [vmem:[#allocation6 + $0x48] sm:$0xff] %vm2279_vm5, %v5417_v15 }
  0x5b   : > { %2290 = vst.msk [vmem:[#allocation6 + $0x50] sm:$0xff] %vm2279_vm5, %v5417_v15  ;;  %2291 = vst.msk [vmem:[#allocation6 + $0x58] sm:$0xff] %vm2279_vm5, %v5417_v15  ;;  %4614 = vmatmul.mubr.msk.f32.gmra.mrb[10].mxu0 %vm824_vm0, %v811_v23 }
  0x5c   : > { %2292 = vst.msk [vmem:[#allocation6 + $0x60] sm:$0xff] %vm2279_vm5, %v5417_v15  ;;  %2293 = vst.msk [vmem:[#allocation6 + $0x68] sm:$0xff] %vm2279_vm5, %v5417_v15  ;;  %4616 = vmatprep.mubr.msk.f32.mxu0 %vm824_vm0, %v812_v24 }
  0x5d   : > { %2294 = vst.msk [vmem:[#allocation6 + $0x70] sm:$0xff] %vm2279_vm5, %v5417_v15  ;;  %2295 = vst.msk [vmem:[#allocation6 + $0x78] sm:$0xff] %vm2279_vm5, %v5417_v15 }
  0x5f   : > { %4617 = vmatmul.mubr.msk.f32.gmra.mrb[12].mxu0 %vm824_vm0, %v813_v25 }
  0x60   : > { %4619 = vmatprep.mubr.msk.f32.mxu0 %vm824_vm0, %v814_v26 }
  0x63   : > { %4620 = vmatmul.mubr.msk.f32.gmra.mrb[14].mxu0 %vm824_vm0, %v815_v27 }
  0x64   : > { %4626 = vmatprep.mubr.msk.f32.mxu0 %vm5418_vm6, %v5416_v13 }
  0x67   : > { %4627 = vmatmul.mubr.msk.f32.vlgmr.msra.gmra.mrb[16].mxu0 %vm1044_vm7, %v1034_v28 }
 0x11a   : > { %v4600_v30 = vpop.f32.mrb[0].mxu0 }
 0x11b   : > { %v939_v31 = vpop.f32.mrb[1].mxu0  ;;  %v945_v52 = vadd.f32 %v4600_v30, %v5772_v29 }
 0x11c   : > { %v940_v32 = vadd.f32 %v5772_v29, %v939_v31 }
 0x11d   : > { %v5795_v58 = vmax.f32 %v945_v52, 0.0 }
 0x11e   : > { %v5775_v33 = vmax.f32 %v940_v32, 0.0  ;;  %v4603_v34 = vpop.f32.mrb[2].mxu0 }
 0x11f   : > { %v949_v35 = vpop.f32.mrb[3].mxu0  ;;  %v955_v59 = vadd.f32 %v4603_v34, %v5772_v29 }
 0x120   : > { %4631 = vmatprep.mubr.msk.f32.mxu0 %vm1129_vm4, %v5775_v33  ;;  %v950_v56 = vadd.f32 %v5772_v29, %v949_v35 }
 0x121   : > { %v5815_v2 = vmax.f32 %v955_v59, 0.0 }
 0x122   : > { %v4606_v36 = vpop.f32.mrb[4].mxu0  ;;  %v5801_v62 = vmax.f32 %v950_v56, 0.0 }
 0x123   : > { %v959_v37 = vpop.f32.mrb[5].mxu0  ;;  %v965_v3 = vadd.f32 %v4606_v36, %v5772_v29 }
 0x124   : > { %v960_v63 = vadd.f32 %v5772_v29, %v959_v37 }
 0x125   : > { %v5835_v10 = vmax.f32 %v965_v3, 0.0 }
 0x126   : > { %v4609_v38 = vpop.f32.mrb[6].mxu0  ;;  %v5821_v6 = vmax.f32 %v960_v63, 0.0 }
 0x127   : > { %v969_v39 = vpop.f32.mrb[7].mxu0  ;;  %v975_v11 = vadd.f32 %v4609_v38, %v5772_v29 }
 0x128   : > { %v970_v7 = vadd.f32 %v5772_v29, %v969_v39 }
 0x129   : > { %v5853_v16 = vmax.f32 %v975_v11, 0.0 }
 0x12a   : > { %v4612_v40 = vpop.f32.mrb[8].mxu0  ;;  %v5841_v14 = vmax.f32 %v970_v7, 0.0 }
 0x12b   : > { %v979_v41 = vpop.f32.mrb[9].mxu0  ;;  %v985_v53 = vadd.f32 %v4612_v40, %v5772_v29 }
 0x12c   : > { %v980_v42 = vadd.f32 %v5772_v29, %v979_v41 }
 0x12d   : > { %v5798_v60 = vmax.f32 %v985_v53, 0.0 }
 0x12e   : > { %v5780_v43 = vmax.f32 %v980_v42, 0.0  ;;  %v4615_v44 = vpop.f32.mrb[10].mxu0 }
 0x12f   : > { %v989_v45 = vpop.f32.mrb[11].mxu0  ;;  %v995_v61 = vadd.f32 %v4615_v44, %v5772_v29 }
 0x130   : > { %4643 = vmatprep.mubr.msk.f32.mxu1 %vm1129_vm4, %v5780_v43  ;;  %v990_v57 = vadd.f32 %v5772_v29, %v989_v45 }
 0x131   : > { %v5818_v4 = vmax.f32 %v995_v61, 0.0 }
 0x132   : > { %v4618_v46 = vpop.f32.mrb[12].mxu0  ;;  %v5804_v0 = vmax.f32 %v990_v57, 0.0 }
 0x133   : > { %v999_v47 = vpop.f32.mrb[13].mxu0  ;;  %v1005_v5 = vadd.f32 %v4618_v46, %v5772_v29 }
 0x134   : > { %v1000_v1 = vadd.f32 %v5772_v29, %v999_v47 }
 0x135   : > { %v5838_v12 = vmax.f32 %v1005_v5, 0.0 }
 0x136   : > { %v4621_v48 = vpop.f32.mrb[14].mxu0  ;;  %v5824_v8 = vmax.f32 %v1000_v1, 0.0 }
 0x137   : > { %v1009_v49 = vpop.f32.mrb[15].mxu0  ;;  %v1015_v13 = vadd.f32 %v4621_v48, %v5772_v29 }
 0x138   : > { %v1010_v9 = vadd.f32 %v5772_v29, %v1009_v49 }
 0x139   : > { %v5855_v17 = vmax.f32 %v1015_v13, 0.0 }
 0x13a   : > { %v1118_v51 = vpop.f32.mrb[16].mxu0  ;;  %v5843_v15 = vmax.f32 %v1010_v9, 0.0 }
 0x13b   : > { %v1119_v54 = vadd.f32 %v4252_v50, %v1118_v51  ;;  %v4628_v55 = vpop.f32.mrb[17].mxu0 }
 0x13d   : > { %4629 = vmatprep.subr.msk.mxu0 %vm1129_vm4, %v1119_v54  ;;  %4999 = vmatprep.subr.msk.mxu1 %vm1129_vm4, %v1119_v54 }
 0x13e   : > { %4630 = vmatpush3.xpose.msk.msra.mxu0 %vm1129_vm4, %v1119_v54  ;;  %5000 = vmatpush3.xpose.msk.msra.mxu1 %vm1129_vm4, %v1119_v54 }
 0x13f   : > { %4655 = vmatprep.subr.mxu0 %v1119_v54 }
 0x141   : > { %4632 = vmatmul.mubr.msk.f32.vlgmr.msra.gmra.mrb[18].mxu0 %vm1129_vm4, %v5795_v58  ;;  %4644 = vmatmul.mubr.msk.f32.vlgmr.msra.gmra.mrb[0].mxu1 %vm1129_vm4, %v5798_v60 }
 0x142   : > { %4634 = vmatprep.mubr.msk.f32.mxu0 %vm1129_vm4, %v5801_v62  ;;  %4646 = vmatprep.mubr.msk.f32.mxu1 %vm1129_vm4, %v5804_v0 }
 0x143   : > { %4656 = vmatpush3.msra.mxu0 %v1119_v54 }
 0x145   : > { %4635 = vmatmul.mubr.msk.f32.gmra.mrb[20].mxu0 %vm1129_vm4, %v5815_v2  ;;  %4647 = vmatmul.mubr.msk.f32.gmra.mrb[2].mxu1 %vm1129_vm4, %v5818_v4 }
 0x146   : > { %4637 = vmatprep.mubr.msk.f32.mxu0 %vm1129_vm4, %v5821_v6  ;;  %4649 = vmatprep.mubr.msk.f32.mxu1 %vm1129_vm4, %v5824_v8 }
 0x149   : > { %4638 = vmatmul.mubr.msk.f32.gmra.mrb[22].mxu0 %vm1129_vm4, %v5835_v10  ;;  %4650 = vmatmul.mubr.msk.f32.gmra.mrb[4].mxu1 %vm1129_vm4, %v5838_v12 }
 0x14a   : > { %4640 = vmatprep.mubr.msk.f32.mxu0 %vm1129_vm4, %v5841_v14  ;;  %4652 = vmatprep.mubr.msk.f32.mxu1 %vm1129_vm4, %v5843_v15 }
 0x14d   : > { %4641 = vmatmul.mubr.msk.f32.gmra.mrb[24].mxu0 %vm1129_vm4, %v5853_v16  ;;  %4653 = vmatmul.mubr.msk.f32.gmra.mrb[6].mxu1 %vm1129_vm4, %v5855_v17 }
 0x214   : > { %v4633_v19 = vpop.f32.mrb[18].mxu0  ;;  %v4645_v20 = vpop.f32.mrb[0].mxu1 }
 0x215   : > { %v1247_v21 = vpop.f32.mrb[19].mxu0  ;;  %v1287_v22 = vpop.f32.mrb[1].mxu1  ;;  %v5866_v24 = vadd.f32 %v4633_v19, %v4255_v18  ;;  %v5886_v53 = vadd.f32 %v4645_v20, %v4255_v18 }
 0x216   : > { %v1248_v23 = vadd.f32 %v4255_v18, %v1247_v21  ;;  %v5879_v49 = vadd.f32 %v4255_v18, %v1287_v22 }
 0x217   : > { %v1329_v36 = vsel %vm824_vm0, %v5866_v24, -inf  ;;  %v1353_v61 = vsel %vm824_vm0, %v5886_v53, -inf }
 0x218   : > { %v4636_v25 = vpop.f32.mrb[20].mxu0  ;;  %v4648_v26 = vpop.f32.mrb[2].mxu1  ;;  %v1326_v27 = vsel %vm824_vm0, %v1248_v23, -inf  ;;  %v1350_v56 = vsel %vm824_vm0, %v5879_v49, -inf }
 0x219   : > { %v1257_v28 = vpop.f32.mrb[21].mxu0  ;;  %v1297_v29 = vpop.f32.mrb[3].mxu1  ;;  %1327 = vmax.xlane.f32.xlu0 %v1326_v27  ;;  %v5869_v31 = vadd.f32 %v4636_v25, %v4255_v18  ;;  %v5894_v57 = vadd.f32 %v4648_v26, %v4255_v18 }
 0x21a   : > { %v1258_v30 = vadd.f32 %v4255_v18, %v1257_v28  ;;  %v5888_v54 = vadd.f32 %v4255_v18, %v1297_v29 }
 0x21b   : > { %v1335_v44 = vsel %vm824_vm0, %v5869_v31, -inf  ;;  %v1359_v5 = vsel %vm824_vm0, %v5894_v57, -inf }
 0x21c   : > { %v4639_v32 = vpop.f32.mrb[22].mxu0  ;;  %v4651_v34 = vpop.f32.mrb[4].mxu1  ;;  %v1332_v35 = vsel %vm824_vm0, %v1258_v30, -inf  ;;  %v1356_v63 = vsel %vm824_vm0, %v5888_v54, -inf }
 0x21d   : > { %v1267_v37 = vpop.f32.mrb[23].mxu0  ;;  %v1307_v38 = vpop.f32.mrb[5].mxu1  ;;  %1333 = vmax.xlane.f32.xlu1 %v1332_v35  ;;  %1330 = vmax.xlane.f32.xlu0 %v1329_v36  ;;  %v5874_v40 = vadd.f32 %v4639_v32, %v4255_v18  ;;  %v5902_v1 = vadd.f32 %v4651_v34, %v4255_v18 }
 0x21e   : > { %v1268_v39 = vadd.f32 %v4255_v18, %v1267_v37  ;;  %v5896_v59 = vadd.f32 %v4255_v18, %v1307_v38 }
 0x21f   : > { %v1341_v51 = vsel %vm824_vm0, %v5874_v40, -inf  ;;  %v1365_v11 = vsel %vm824_vm0, %v5902_v1, -inf }
 0x220   : > { %v4642_v41 = vpop.f32.mrb[24].mxu0  ;;  %v4654_v42 = vpop.f32.mrb[6].mxu1  ;;  %v1338_v45 = vsel %vm824_vm0, %v1268_v39, -inf  ;;  %v1362_v7 = vsel %vm824_vm0, %v5896_v59, -inf }
 0x221   : > { %v1277_v46 = vpop.f32.mrb[25].mxu0  ;;  %v1317_v47 = vpop.f32.mrb[7].mxu1  ;;  %1336 = vmax.xlane.f32.xlu1 %v1335_v44  ;;  %1339 = vmax.xlane.f32.xlu0 %v1338_v45  ;;  %v5881_v50 = vadd.f32 %v4642_v41, %v4255_v18  ;;  %v5910_v9 = vadd.f32 %v4654_v42, %v4255_v18 }
 0x222   : > { %v1278_v48 = vadd.f32 %v4255_v18, %v1277_v46  ;;  %v5904_v3 = vadd.f32 %v4255_v18, %v1317_v47 }
 0x223   : > { %v1347_v55 = vsel %vm824_vm0, %v5881_v50, -inf  ;;  %v1371_v19 = vsel %vm824_vm0, %v5910_v9, -inf }
 0x224   : > { %v1344_v52 = vsel %vm824_vm0, %v1278_v48, -inf  ;;  %v1368_v13 = vsel %vm824_vm0, %v5904_v3, -inf }
 0x225   : > { %1342 = vmax.xlane.f32.xlu1 %v1341_v51  ;;  %1345 = vmax.xlane.f32.xlu0 %v1344_v52 }
 0x229   : > { %1348 = vmax.xlane.f32.xlu1 %v1347_v55  ;;  %1351 = vmax.xlane.f32.xlu0 %v1350_v56 }
 0x22d   : > { %1354 = vmax.xlane.f32.xlu1 %v1353_v61  ;;  %1357 = vmax.xlane.f32.xlu0 %v1356_v63 }
 0x231   : > { %1360 = vmax.xlane.f32.xlu1 %v1359_v5  ;;  %1363 = vmax.xlane.f32.xlu0 %v1362_v7 }
 0x235   : > { %1366 = vmax.xlane.f32.xlu1 %v1365_v11  ;;  %1369 = vmax.xlane.f32.xlu0 %v1368_v13 }
 0x239   : > { %1372 = vmax.xlane.f32.xlu1 %v1371_v19 }
 0x2a6   : > { %v1328_v20 = vpop.xlane.xlu0 %1327 }
 0x2a7   : > { %v1374_v21 = vsub.f32 %v1248_v23, %v1328_v20 }
 0x2a9   : > { %v1390_v22 = vmul.f32 1.442695, %v1374_v21 }
 0x2aa   : > { %v1334_v25 = vpop.xlane.xlu1 %1333  ;;  %v1331_v26 = vpop.xlane.xlu0 %1330 }
 0x2ab   : > { %5146 = vpow2.f32 %v1390_v22  ;;  %v1376_v18 = vsub.f32 %v1258_v30, %v1334_v25  ;;  %v1375_v27 = vsub.f32 %v5866_v24, %v1331_v26 }
 0x2ad   : > { %v1394_v28 = vmul.f32 1.442695, %v1376_v18  ;;  %v1392_v29 = vmul.f32 1.442695, %v1375_v27 }
 0x2ae   : > { %v1337_v32 = vpop.xlane.xlu1 %1336  ;;  %v1340_v34 = vpop.xlane.xlu0 %1339 }
 0x2af   : > { %5148 = vpow2.f32 %v1394_v28  ;;  %v1377_v35 = vsub.f32 %v5869_v31, %v1337_v32  ;;  %v1378_v36 = vsub.f32 %v1268_v39, %v1340_v34 }
 0x2b0   : > { %5150 = vpow2.f32 %v1392_v29 }
 0x2b1   : > { %v1396_v37 = vmul.f32 1.442695, %v1377_v35  ;;  %v1398_v38 = vmul.f32 1.442695, %v1378_v36 }
 0x2b2   : > { %v1343_v41 = vpop.xlane.xlu1 %1342  ;;  %v1346_v23 = vpop.xlane.xlu0 %1345 }
 0x2b3   : > { %5152 = vpow2.f32 %v1396_v37  ;;  %v1379_v42 = vsub.f32 %v5874_v40, %v1343_v41  ;;  %v1380_v44 = vsub.f32 %v1278_v48, %v1346_v23 }
 0x2b4   : > { %5154 = vpow2.f32 %v1398_v38 }
 0x2b5   : > { %v5921_v30 = vpop.eup %5146  ;;  %v1400_v24 = vmul.f32 1.442695, %v1379_v42  ;;  %v1402_v45 = vmul.f32 1.442695, %v1380_v44 }
 0x2b6   : > { %v1349_v46 = vpop.xlane.xlu1 %1348  ;;  %v1352_v47 = vpop.xlane.xlu0 %1351  ;;  %v1422_v31 = vsel %vm824_vm0, %v5921_v30, 0.0 }
 0x2b7   : > { %5156 = vpow2.f32 %v1400_v24  ;;  %v1381_v39 = vsub.f32 %v5881_v50, %v1349_v46  ;;  %v1382_v51 = vsub.f32 %v5879_v49, %v1352_v47  ;;  %1423 = vadd.xlane.f32.xlu0 %v1422_v31 }
 0x2b8   : > { %5158 = vpow2.f32 %v1402_v45 }
 0x2b9   : > { %v5927_v52 = vpop.eup %5148  ;;  %v1404_v40 = vmul.f32 1.442695, %v1381_v39  ;;  %v1406_v48 = vmul.f32 1.442695, %v1382_v51 }
 0x2ba   : > { %v5929_v55 = vpop.eup %5150  ;;  %v1355_v56 = vpop.xlane.xlu1 %1354  ;;  %v1428_v63 = vsel %vm824_vm0, %v5927_v52, 0.0 }
 0x2bb   : > { %v1358_v61 = vpop.xlane.xlu0 %1357  ;;  %5160 = vpow2.f32 %v1404_v40  ;;  %v1383_v5 = vsub.f32 %v5886_v53, %v1355_v56  ;;  %1429 = vadd.xlane.f32.xlu0 %v1428_v63  ;;  %v1425_v49 = vsel %vm824_vm0, %v5929_v55, 0.0 }
 0x2bc   : > { %v1384_v50 = vsub.f32 %v5888_v54, %v1358_v61  ;;  %5162 = vpow2.f32 %v1406_v48  ;;  %1426 = vadd.xlane.f32.xlu1 %v1425_v49 }
 0x2bd   : > { %v5937_v7 = vpop.eup %5152  ;;  %v1408_v11 = vmul.f32 1.442695, %v1383_v5 }
 0x2be   : > { %v1410_v13 = vmul.f32 1.442695, %v1384_v50  ;;  %v5939_v19 = vpop.eup %5154  ;;  %v1361_v20 = vpop.xlane.xlu1 %1360  ;;  %v1431_v22 = vsel %vm824_vm0, %v5937_v7, 0.0 }
 0x2bf   : > { %v1364_v21 = vpop.xlane.xlu0 %1363  ;;  %5164 = vpow2.f32 %v1408_v11  ;;  %v1385_v53 = vsub.f32 %v5894_v57, %v1361_v20  ;;  %v1434_v25 = vsel %vm824_vm0, %v5939_v19, 0.0 }
 0x2c0   : > { %v1386_v54 = vsub.f32 %v5896_v59, %v1364_v21  ;;  %5166 = vpow2.f32 %v1410_v13  ;;  %1432 = vadd.xlane.f32.xlu1 %v1431_v22  ;;  %1435 = vadd.xlane.f32.xlu0 %v1434_v25 }
 0x2c1   : > { %v5947_v26 = vpop.eup %5156  ;;  %v1412_v18 = vmul.f32 1.442695, %v1385_v53 }
 0x2c2   : > { %v1414_v27 = vmul.f32 1.442695, %v1386_v54  ;;  %v5949_v28 = vpop.eup %5158  ;;  %v1367_v29 = vpop.xlane.xlu1 %1366  ;;  %v1437_v34 = vsel %vm824_vm0, %v5947_v26, 0.0 }
 0x2c3   : > { %v1370_v32 = vpop.xlane.xlu0 %1369  ;;  %5168 = vpow2.f32 %v1412_v18  ;;  %v1387_v57 = vsub.f32 %v5902_v1, %v1367_v29  ;;  %v1440_v35 = vsel %vm824_vm0, %v5949_v28, 0.0 }
 0x2c4   : > { %v1388_v59 = vsub.f32 %v5904_v3, %v1370_v32  ;;  %5170 = vpow2.f32 %v1414_v27  ;;  %1438 = vadd.xlane.f32.xlu1 %v1437_v34  ;;  %1441 = vadd.xlane.f32.xlu0 %v1440_v35 }
 0x2c5   : > { %v5957_v36 = vpop.eup %5160  ;;  %v1416_v37 = vmul.f32 1.442695, %v1387_v57 }
 0x2c6   : > { %v1418_v38 = vmul.f32 1.442695, %v1388_v59  ;;  %v5959_v41 = vpop.eup %5162  ;;  %v1373_v23 = vpop.xlane.xlu1 %1372  ;;  %v1443_v42 = vsel %vm824_vm0, %v5957_v36, 0.0 }
 0x2c7   : > { %5172 = vpow2.f32 %v1416_v37  ;;  %v1389_v1 = vsub.f32 %v5910_v9, %v1373_v23  ;;  %v1446_v3 = vsel %vm824_vm0, %v5959_v41, 0.0 }
 0x2c8   : > { %5174 = vpow2.f32 %v1418_v38  ;;  %1444 = vadd.xlane.f32.xlu1 %v1443_v42  ;;  %1447 = vadd.xlane.f32.xlu0 %v1446_v3 }
 0x2c9   : > { %v5966_v44 = vpop.eup %5164  ;;  %v1420_v24 = vmul.f32 1.442695, %v1389_v1 }
 0x2ca   : > { %v5968_v45 = vpop.eup %5166  ;;  %v1449_v46 = vsel %vm824_vm0, %v5966_v44, 0.0 }
 0x2cb   : > { %5176 = vpow2.f32 %v1420_v24  ;;  %v1452_v47 = vsel %vm824_vm0, %v5968_v45, 0.0 }
 0x2cc   : > { %1450 = vadd.xlane.f32.xlu1 %v1449_v46  ;;  %1453 = vadd.xlane.f32.xlu0 %v1452_v47 }
 0x2cd   : > { %v5974_v9 = vpop.eup %5168 }
 0x2ce   : > { %v5976_v31 = vpop.eup %5170  ;;  %v1455_v39 = vsel %vm824_vm0, %v5974_v9, 0.0 }
 0x2cf   : > { %v1458_v51 = vsel %vm824_vm0, %v5976_v31, 0.0 }
 0x2d0   : > { %1456 = vadd.xlane.f32.xlu1 %v1455_v39  ;;  %1459 = vadd.xlane.f32.xlu0 %v1458_v51 }
 0x2d1   : > { %v5982_v40 = vpop.eup %5172 }
 0x2d2   : > { %v5984_v48 = vpop.eup %5174  ;;  %v1461_v56 = vsel %vm824_vm0, %v5982_v40, 0.0 }
 0x2d3   : > { %v1464_v61 = vsel %vm824_vm0, %v5984_v48, 0.0 }
 0x2d4   : > { %1462 = vadd.xlane.f32.xlu1 %v1461_v56  ;;  %1465 = vadd.xlane.f32.xlu0 %v1464_v61 }
 0x2d5   : > { %v5990_v63 = vpop.eup %5176 }
 0x2d6   : > { %v1467_v5 = vsel %vm824_vm0, %v5990_v63, 0.0 }
 0x2d8   : > { %1468 = vadd.xlane.f32.xlu1 %v1467_v5 }
 0x2e9   : > { %1905 = vrot.lane.b32.xlu1 %v5795_v58, %s5419_s6 }
 0x2ea   : > { %1903 = vrot.lane.b32.xlu0 %v5775_v33, %s5419_s6 }
 0x2ed   : > { %1907 = vrot.lane.b32.xlu1 %v5801_v62, %s5419_s6 }
 0x2ee   : > { %1911 = vrot.lane.b32.xlu0 %v5821_v6, %s5419_s6 }
 0x2f1   : > { %1909 = vrot.lane.b32.xlu1 %v5815_v2, %s5419_s6 }
 0x2f2   : > { %1915 = vrot.lane.b32.xlu0 %v5841_v14, %s5419_s6 }
 0x2f5   : > { %1913 = vrot.lane.b32.xlu1 %v5835_v10, %s5419_s6 }
 0x2f6   : > { %1919 = vrot.lane.b32.xlu0 %v5780_v43, %s5419_s6 }
 0x2f9   : > { %1917 = vrot.lane.b32.xlu1 %v5853_v16, %s5419_s6 }
 0x2fa   : > { %1923 = vrot.lane.b32.xlu0 %v5804_v0, %s5419_s6 }
 0x2fd   : > { %1921 = vrot.lane.b32.xlu1 %v5798_v60, %s5419_s6 }
 0x2fe   : > { %1927 = vrot.lane.b32.xlu0 %v5824_v8, %s5419_s6 }
 0x301   : > { %1925 = vrot.lane.b32.xlu1 %v5818_v4, %s5419_s6 }
 0x302   : > { %1931 = vrot.lane.b32.xlu0 %v5843_v15, %s5419_s6 }
 0x305   : > { %1929 = vrot.lane.b32.xlu1 %v5838_v12, %s5419_s6 }
 0x306   : > { %2199 = vrot.lane.b32.xlu0 %v5775_v33, %s5420_s1  ;;  %v1695_v33 = vld [vmem:[%s6905_s22] sm:$0xff]  ;;  %s6908_s22 = sld [smem:[#allocation25_spill]] }
 0x309   : > { %1933 = vrot.lane.b32.xlu1 %v5855_v17, %s5419_s6 }
 0x30a   : > { %2203 = vrot.lane.b32.xlu0 %v5801_v62, %s5420_s1  ;;  %v1698_v62 = vld [vmem:[%s6906_s13 + $0x18] sm:$0xff] }
 0x30d   : > { %2201 = vrot.lane.b32.xlu1 %v5795_v58, %s5420_s1  ;;  %v1697_v58 = vld [vmem:[%s6906_s13 + $0x10] sm:$0xff] }
 0x30e   : > { %2207 = vrot.lane.b32.xlu0 %v5821_v6, %s5420_s1 }
 0x311   : > { %2205 = vrot.lane.b32.xlu1 %v5815_v2, %s5420_s1 }
 0x312   : > { %2211 = vrot.lane.b32.xlu0 %v5841_v14, %s5420_s1 }
 0x315   : > { %2209 = vrot.lane.b32.xlu1 %v5835_v10, %s5420_s1 }
 0x316   : > { %2215 = vrot.lane.b32.xlu0 %v5780_v43, %s5420_s1  ;;  %v1696_v43 = vld [vmem:[%s6906_s13 + $0x8] sm:$0xff] }
 0x319   : > { %2213 = vrot.lane.b32.xlu1 %v5853_v16, %s5420_s1 }
 0x31a   : > { %2219 = vrot.lane.b32.xlu0 %v5804_v0, %s5420_s1  ;;  %v4931_v0 = vpack.c.bf16 %v1698_v62, %v1697_v58 }
 0x31d   : > { %2217 = vrot.lane.b32.xlu1 %v5798_v60, %s5420_s1  ;;  %v4927_v60 = vpack.c.bf16 %v1696_v43, %v1695_v33 }
 0x31e   : > { %2223 = vrot.lane.b32.xlu0 %v5824_v8, %s5420_s1 }
 0x31f   : > { %4928 = vmatprep.subr.bf16.mxu1 %v4927_v60 }
 0x320   : > { %4930 = vmatpush3.bf16.msra.mxu1 %v4927_v60 }
 0x321   : > { %2221 = vrot.lane.b32.xlu1 %v5818_v4, %s5420_s1  ;;  %4932 = vmatprep.subr.bf16.mxu1 %v4931_v0 }
 0x322   : > { %2227 = vrot.lane.b32.xlu0 %v5843_v15, %s5420_s1 }
 0x324   : > { %4934 = vmatpush3.bf16.msra.mxu1 %v4931_v0 }
 0x325   : > { %2225 = vrot.lane.b32.xlu1 %v5838_v12, %s5420_s1 }
 0x329   : > { %2229 = vrot.lane.b32.xlu1 %v5855_v17, %s5420_s1 }
 0x344   : > { %v1424_v2 = vpop.xlane.xlu0 %1423 }
 0x345   : > { %5178 = vrcp.f32 %v1424_v2 }
 0x348   : > { %v1430_v4 = vpop.xlane.xlu0 %1429 }
 0x349   : > { %v1427_v6 = vpop.xlane.xlu1 %1426  ;;  %5180 = vrcp.f32 %v1430_v4 }
 0x34a   : > { %5182 = vrcp.f32 %v1427_v6 }
 0x34d   : > { %v1433_v8 = vpop.xlane.xlu1 %1432  ;;  %v1436_v10 = vpop.xlane.xlu0 %1435 }
 0x34e   : > { %5184 = vrcp.f32 %v1433_v8 }
 0x34f   : > { %v5179_v12 = vpop.eup %5178  ;;  %5186 = vrcp.f32 %v1436_v10 }
 0x350   : > { %v1486_v14 = vmul.f32 %v5179_v12, %v5921_v30 }
 0x351   : > { %v1439_v15 = vpop.xlane.xlu1 %1438  ;;  %v1442_v16 = vpop.xlane.xlu0 %1441 }
 0x352   : > { %5188 = vrcp.f32 %v1439_v15  ;;  %4657 = vmatprep.mubr.msk.f32.mxu0 %vm824_vm0, %v1486_v14 }
 0x353   : > { %v5181_v17 = vpop.eup %5180  ;;  %5190 = vrcp.f32 %v1442_v16 }
 0x354   : > { %v5183_v50 = vpop.eup %5182  ;;  %v1488_v49 = vmul.f32 %v5181_v17, %v5927_v52 }
 0x355   : > { %v1487_v11 = vmul.f32 %v5183_v50, %v5929_v55  ;;  %v1445_v13 = vpop.xlane.xlu1 %1444  ;;  %v1448_v20 = vpop.xlane.xlu0 %1447 }
 0x356   : > { %5192 = vrcp.f32 %v1445_v13 }
 0x357   : > { %5194 = vrcp.f32 %v1448_v20  ;;  %4658 = vmatmul.mubr.msk.f32.vlgmr.msra.gmra.mrb[26].mxu0 %vm824_vm0, %v1487_v11 }
 0x358   : > { %v5185_v21 = vpop.eup %5184  ;;  %4660 = vmatprep.mubr.msk.f32.mxu0 %vm824_vm0, %v1488_v49 }
 0x359   : > { %v5187_v30 = vpop.eup %5186  ;;  %v1451_v22 = vpop.xlane.xlu1 %1450  ;;  %v1489_v54 = vmul.f32 %v5185_v21, %v5937_v7 }
 0x35a   : > { %v1454_v53 = vpop.xlane.xlu0 %1453  ;;  %5196 = vrcp.f32 %v1451_v22  ;;  %v1490_v25 = vmul.f32 %v5187_v30, %v5939_v19  ;;  %v1899_v30 = vld [vmem:[%s6907_s3] sm:$0xff]  ;;  %v1900_v22 = vld [vmem:[%s6907_s3 + $0x8] sm:$0xff] }
 0x35b   : > { %5198 = vrcp.f32 %v1454_v53  ;;  %4661 = vmatmul.mubr.msk.f32.gmra.mrb[28].mxu0 %vm824_vm0, %v1489_v54  ;;  %v4935_v53 = vpack.c.bf16 %v1900_v22, %v1899_v30  ;;  %v1901_v54 = vld [vmem:[%s6907_s3 + $0x10] sm:$0xff] }
 0x35c   : > { %v5189_v52 = vpop.eup %5188  ;;  %4663 = vmatprep.mubr.msk.f32.mxu0 %vm824_vm0, %v1490_v25  ;;  %v1902_v25 = vld [vmem:[%s6907_s3 + $0x18] sm:$0xff] }
 0x35d   : > { %v5191_v55 = vpop.eup %5190  ;;  %v1457_v18 = vpop.xlane.xlu1 %1456  ;;  %v1491_v29 = vmul.f32 %v5189_v52, %v5947_v26  ;;  %4936 = vmatprep.subr.bf16.mxu1 %v4935_v53 }
 0x35e   : > { %v1460_v27 = vpop.xlane.xlu0 %1459  ;;  %5200 = vrcp.f32 %v1457_v18  ;;  %v1492_v32 = vmul.f32 %v5191_v55, %v5949_v28  ;;  %v4939_v18 = vpack.c.bf16 %v1902_v25, %v1901_v54 }
 0x35f   : > { %5202 = vrcp.f32 %v1460_v27  ;;  %4664 = vmatmul.mubr.msk.f32.gmra.mrb[30].mxu0 %vm824_vm0, %v1491_v29 }
 0x360   : > { %v5193_v7 = vpop.eup %5192  ;;  %4666 = vmatprep.mubr.msk.f32.mxu0 %vm824_vm0, %v1492_v32 }
 0x361   : > { %v5195_v19 = vpop.eup %5194  ;;  %v1463_v34 = vpop.xlane.xlu1 %1462  ;;  %v1493_v59 = vmul.f32 %v5193_v7, %v5957_v36 }
 0x362   : > { %v1466_v57 = vpop.xlane.xlu0 %1465  ;;  %5204 = vrcp.f32 %v1463_v34  ;;  %v1494_v35 = vmul.f32 %v5195_v19, %v5959_v41 }
 0x363   : > { %5206 = vrcp.f32 %v1466_v57  ;;  %4667 = vmatmul.mubr.msk.f32.gmra.mrb[32].mxu0 %vm824_vm0, %v1493_v59 }
 0x364   : > { %v5197_v26 = vpop.eup %5196  ;;  %4669 = vmatprep.mubr.msk.f32.mxu0 %vm824_vm0, %v1494_v35 }
 0x365   : > { %v5199_v28 = vpop.eup %5198  ;;  %v1469_v37 = vpop.xlane.xlu1 %1468  ;;  %v1495_v23 = vmul.f32 %v5197_v26, %v5966_v44 }
 0x366   : > { %v6056_v38 = vpop.permute.xlu0 %1903  ;;  %5208 = vrcp.f32 %v1469_v37  ;;  %v1496_v42 = vmul.f32 %v5199_v28, %v5968_v45 }
 0x367   : > { %4670 = vmatmul.mubr.msk.f32.gmra.mrb[34].mxu0 %vm824_vm0, %v1495_v23 }
 0x368   : > { %v5201_v36 = vpop.eup %5200  ;;  %4672 = vmatprep.mubr.msk.f32.mxu0 %vm824_vm0, %v1496_v42 }
 0x369   : > { %v5203_v41 = vpop.eup %5202  ;;  %v6062_v1 = vpop.permute.xlu1 %1905  ;;  %v1497_v24 = vmul.f32 %v5201_v36, %v5974_v9 }
 0x36a   : > { %v6064_v3 = vpop.permute.xlu0 %1911  ;;  %v1498_v46 = vmul.f32 %v5203_v41, %v5976_v31  ;;  %v6202_v41 = vld [vmem:[%s6909_s12] ss:$0 sm:$0xff] }
 0x36b   : > { %4673 = vmatmul.mubr.msk.f32.gmra.mrb[36].mxu0 %vm824_vm0, %v1497_v24 }
 0x36c   : > { %v5205_v44 = vpop.eup %5204  ;;  %4675 = vmatprep.mubr.msk.f32.mxu0 %vm824_vm0, %v1498_v46 }
 0x36d   : > { %v5207_v45 = vpop.eup %5206  ;;  %v6070_v47 = vpop.permute.xlu1 %1907  ;;  %v1499_v51 = vmul.f32 %v5205_v44, %v5982_v40 }
 0x36e   : > { %v6072_v39 = vpop.permute.xlu0 %1915  ;;  %v1500_v56 = vmul.f32 %v5207_v45, %v5984_v48 }
 0x36f   : > { %4676 = vmatmul.mubr.msk.f32.gmra.mrb[38].mxu0 %vm824_vm0, %v1499_v51 }
 0x370   : > { %v5209_v61 = vpop.eup %5208  ;;  %4678 = vmatprep.mubr.msk.f32.mxu0 %vm824_vm0, %v1500_v56 }
 0x371   : > { %v6078_v9 = vpop.permute.xlu1 %1909  ;;  %v1501_v5 = vmul.f32 %v5209_v61, %v5990_v63 }
 0x372   : > { %v6080_v31 = vpop.permute.xlu0 %1919 }
 0x373   : > { %4679 = vmatmul.mubr.msk.f32.gmra.mrb[40].mxu0 %vm824_vm0, %v1501_v5 }
 0x375   : > { %v6084_v33 = vpop.permute.xlu1 %1913 }
 0x376   : > { %v6086_v43 = vpop.permute.xlu0 %1923 }
 0x379   : > { %v6088_v40 = vpop.permute.xlu1 %1917 }
 0x37a   : > { %v6090_v48 = vpop.permute.xlu0 %1927 }
 0x37d   : > { %v6092_v58 = vpop.permute.xlu1 %1921 }
 0x37e   : > { %v6094_v60 = vpop.permute.xlu0 %1931 }
 0x381   : > { %v6096_v62 = vpop.permute.xlu1 %1925 }
 0x382   : > { %v2200_v0 = vpop.permute.xlu0 %2199 }
 0x383   : > { %2247 = vst.msk [vmem:[#allocation4] sm:$0xff] %vm1129_vm4, %v2200_v0 }
 0x385   : > { %v6099_v63 = vpop.permute.xlu1 %1929 }
 0x386   : > { %v2204_v2 = vpop.permute.xlu0 %2203 }
 0x387   : > { %2249 = vst.msk [vmem:[#allocation4 + $0x10] sm:$0xff] %vm1129_vm4, %v2204_v2 }
 0x389   : > { %v6102_v4 = vpop.permute.xlu1 %1933 }
 0x38a   : > { %v2208_v6 = vpop.permute.xlu0 %2207 }
 0x38b   : > { %2251 = vst.msk [vmem:[#allocation4 + $0x20] sm:$0xff] %vm1129_vm4, %v2208_v6 }
 0x38d   : > { %v2202_v8 = vpop.permute.xlu1 %2201 }
 0x38e   : > { %v2212_v10 = vpop.permute.xlu0 %2211  ;;  %2248 = vst.msk [vmem:[#allocation4 + $0x8] sm:$0xff] %vm1129_vm4, %v2202_v8 }
 0x38f   : > { %2253 = vst.msk [vmem:[#allocation4 + $0x30] sm:$0xff] %vm1129_vm4, %v2212_v10 }
 0x391   : > { %v2206_v12 = vpop.permute.xlu1 %2205 }
 0x392   : > { %v2216_v14 = vpop.permute.xlu0 %2215  ;;  %2250 = vst.msk [vmem:[#allocation4 + $0x18] sm:$0xff] %vm1129_vm4, %v2206_v12 }
 0x393   : > { %2255 = vst.msk [vmem:[#allocation4 + $0x40] sm:$0xff] %vm1129_vm4, %v2216_v14 }
 0x395   : > { %v2210_v15 = vpop.permute.xlu1 %2209 }
 0x396   : > { %v2220_v16 = vpop.permute.xlu0 %2219  ;;  %2252 = vst.msk [vmem:[#allocation4 + $0x28] sm:$0xff] %vm1129_vm4, %v2210_v15 }
 0x397   : > { %2257 = vst.msk [vmem:[#allocation4 + $0x50] sm:$0xff] %vm1129_vm4, %v2220_v16 }
 0x399   : > { %v2214_v17 = vpop.permute.xlu1 %2213 }
 0x39a   : > { %v2224_v50 = vpop.permute.xlu0 %2223  ;;  %2254 = vst.msk [vmem:[#allocation4 + $0x38] sm:$0xff] %vm1129_vm4, %v2214_v17 }
 0x39b   : > { %2259 = vst.msk [vmem:[#allocation4 + $0x60] sm:$0xff] %vm1129_vm4, %v2224_v50 }
 0x39d   : > { %v2218_v49 = vpop.permute.xlu1 %2217 }
 0x39e   : > { %v2228_v11 = vpop.permute.xlu0 %2227  ;;  %2256 = vst.msk [vmem:[#allocation4 + $0x48] sm:$0xff] %vm1129_vm4, %v2218_v49 }
 0x39f   : > { %2261 = vst.msk [vmem:[#allocation4 + $0x70] sm:$0xff] %vm1129_vm4, %v2228_v11 }
 0x3a1   : > { %v2222_v13 = vpop.permute.xlu1 %2221 }
 0x3a2   : > { %2258 = vst.msk [vmem:[#allocation4 + $0x58] sm:$0xff] %vm1129_vm4, %v2222_v13 }
 0x3a5   : > { %v2226_v20 = vpop.permute.xlu1 %2225 }
 0x3a6   : > { %2260 = vst.msk [vmem:[#allocation4 + $0x68] sm:$0xff] %vm1129_vm4, %v2226_v20 }
 0x3a9   : > { %v2230_v21 = vpop.permute.xlu1 %2229 }
 0x3aa   : > { %2262 = vst.msk [vmem:[#allocation4 + $0x78] sm:$0xff] %vm1129_vm4, %v2230_v21 }
 0x42a   : > { %v4659_v52 = vpop.f32.mrb[26].mxu0 }
 0x42b   : > { %2184 = vst.msk [vmem:[#allocation3 + $0x8] sm:$0xff] %vm1129_vm4, %v4659_v52  ;;  %v1616_v55 = vpop.f32.mrb[27].mxu0 }
 0x42c   : > { %2183 = vst.msk [vmem:[#allocation3] sm:$0xff] %vm1129_vm4, %v1616_v55  ;;  %4689 = vmatprep.mubr.msk.f32.mxu1 %vm1129_vm4, %v1616_v55 }
 0x42d   : > { %4690 = vmatmul.mubr.msk.f32.vlgmr.msra.gmra.mrb[8].mxu1 %vm1129_vm4, %v4659_v52 }
 0x42e   : > { %v4662_v27 = vpop.f32.mrb[28].mxu0  ;;  %4938 = vmatpush3.bf16.msra.mxu1 %v4935_v53 }
 0x42f   : > { %2186 = vst.msk [vmem:[#allocation3 + $0x18] sm:$0xff] %vm1129_vm4, %v4662_v27  ;;  %v1626_v29 = vpop.f32.mrb[29].mxu0  ;;  %4940 = vmatprep.subr.bf16.mxu1 %v4939_v18 }
 0x430   : > { %2185 = vst.msk [vmem:[#allocation3 + $0x10] sm:$0xff] %vm1129_vm4, %v1626_v29  ;;  %4692 = vmatprep.mubr.msk.f32.mxu1 %vm1129_vm4, %v1626_v29 }
 0x431   : > { %4693 = vmatmul.mubr.msk.f32.gmra.mrb[10].mxu1 %vm1129_vm4, %v4662_v27 }
 0x432   : > { %v4665_v32 = vpop.f32.mrb[30].mxu0  ;;  %4942 = vmatpush3.bf16.msra.mxu1 %v4939_v18 }
 0x433   : > { %2188 = vst.msk [vmem:[#allocation3 + $0x28] sm:$0xff] %vm1129_vm4, %v4665_v32  ;;  %v1636_v7 = vpop.f32.mrb[31].mxu0 }
 0x434   : > { %2187 = vst.msk [vmem:[#allocation3 + $0x20] sm:$0xff] %vm1129_vm4, %v1636_v7  ;;  %4695 = vmatprep.mubr.msk.f32.mxu1 %vm1129_vm4, %v1636_v7 }
 0x435   : > { %4696 = vmatmul.mubr.msk.f32.gmra.mrb[12].mxu1 %vm1129_vm4, %v4665_v32 }
 0x436   : > { %v4668_v19 = vpop.f32.mrb[32].mxu0 }
 0x437   : > { %2190 = vst.msk [vmem:[#allocation3 + $0x38] sm:$0xff] %vm1129_vm4, %v4668_v19  ;;  %v1646_v34 = vpop.f32.mrb[33].mxu0 }
 0x438   : > { %2189 = vst.msk [vmem:[#allocation3 + $0x30] sm:$0xff] %vm1129_vm4, %v1646_v34  ;;  %4698 = vmatprep.mubr.msk.f32.mxu1 %vm1129_vm4, %v1646_v34 }
 0x439   : > { %4699 = vmatmul.mubr.msk.f32.gmra.mrb[14].mxu1 %vm1129_vm4, %v4668_v19 }
 0x43a   : > { %v4671_v57 = vpop.f32.mrb[34].mxu0 }
 0x43b   : > { %2192 = vst.msk [vmem:[#allocation3 + $0x48] sm:$0xff] %vm1129_vm4, %v4671_v57  ;;  %v1656_v59 = vpop.f32.mrb[35].mxu0 }
 0x43c   : > { %2191 = vst.msk [vmem:[#allocation3 + $0x40] sm:$0xff] %vm1129_vm4, %v1656_v59  ;;  %4701 = vmatprep.mubr.msk.f32.mxu1 %vm1129_vm4, %v1656_v59 }
 0x43d   : > { %4702 = vmatmul.mubr.msk.f32.gmra.mrb[16].mxu1 %vm1129_vm4, %v4671_v57 }
 0x43e   : > { %v4674_v35 = vpop.f32.mrb[36].mxu0 }
 0x43f   : > { %2194 = vst.msk [vmem:[#allocation3 + $0x58] sm:$0xff] %vm1129_vm4, %v4674_v35  ;;  %v1666_v26 = vpop.f32.mrb[37].mxu0 }
 0x440   : > { %2193 = vst.msk [vmem:[#allocation3 + $0x50] sm:$0xff] %vm1129_vm4, %v1666_v26  ;;  %4704 = vmatprep.mubr.msk.f32.mxu1 %vm1129_vm4, %v1666_v26 }
 0x441   : > { %4705 = vmatmul.mubr.msk.f32.gmra.mrb[18].mxu1 %vm1129_vm4, %v4674_v35 }
 0x442   : > { %v4677_v28 = vpop.f32.mrb[38].mxu0 }
 0x443   : > { %2196 = vst.msk [vmem:[#allocation3 + $0x68] sm:$0xff] %vm1129_vm4, %v4677_v28  ;;  %v1676_v37 = vpop.f32.mrb[39].mxu0 }
 0x444   : > { %2195 = vst.msk [vmem:[#allocation3 + $0x60] sm:$0xff] %vm1129_vm4, %v1676_v37  ;;  %4707 = vmatprep.mubr.msk.f32.mxu1 %vm1129_vm4, %v1676_v37 }
 0x445   : > { %4708 = vmatmul.mubr.msk.f32.gmra.mrb[20].mxu1 %vm1129_vm4, %v4677_v28 }
 0x446   : > { %v4680_v23 = vpop.f32.mrb[40].mxu0 }
 0x447   : > { %2198 = vst.msk [vmem:[#allocation3 + $0x78] sm:$0xff] %vm1129_vm4, %v4680_v23  ;;  %v1686_v42 = vpop.f32.mrb[41].mxu0 }
 0x448   : > { %2197 = vst.msk [vmem:[#allocation3 + $0x70] sm:$0xff] %vm1129_vm4, %v1686_v42  ;;  %4710 = vmatprep.mubr.msk.f32.mxu1 %vm1129_vm4, %v1686_v42 }
 0x449   : > { %4711 = vmatmul.mubr.msk.f32.gmra.mrb[22].mxu1 %vm1129_vm4, %v4680_v23 }
 0x44a   : > { %4721 = vmatprep.mubr.msk.f32.mxu1 %vm1129_vm4, %v6056_v38  ;;  %v6197_v38 = vld [vmem:[%s6908_s22] ss:$0 sm:$0xff] }
 0x44d   : > { %4722 = vmatmul.mubr.msk.f32.vlgmr.msra.gmra.mrb[8].mxu1 %vm1129_vm4, %v6062_v1 }
 0x44e   : > { %4724 = vmatprep.mubr.msk.f32.mxu1 %vm1129_vm4, %v6070_v47 }
 0x451   : > { %4725 = vmatmul.mubr.msk.f32.gmra.mrb[10].mxu1 %vm1129_vm4, %v6078_v9 }
 0x452   : > { %4727 = vmatprep.mubr.msk.f32.mxu1 %vm1129_vm4, %v6064_v3 }
 0x455   : > { %4728 = vmatmul.mubr.msk.f32.gmra.mrb[12].mxu1 %vm1129_vm4, %v6084_v33 }
 0x456   : > { %4730 = vmatprep.mubr.msk.f32.mxu1 %vm1129_vm4, %v6072_v39 }
 0x459   : > { %4731 = vmatmul.mubr.msk.f32.gmra.mrb[14].mxu1 %vm1129_vm4, %v6088_v40 }
 0x45a   : > { %4733 = vmatprep.mubr.msk.f32.mxu1 %vm1129_vm4, %v6080_v31 }
 0x45d   : > { %4734 = vmatmul.mubr.msk.f32.gmra.mrb[16].mxu1 %vm1129_vm4, %v6092_v58 }
 0x45e   : > { %4736 = vmatprep.mubr.msk.f32.mxu1 %vm1129_vm4, %v6086_v43 }
 0x461   : > { %4737 = vmatmul.mubr.msk.f32.gmra.mrb[18].mxu1 %vm1129_vm4, %v6096_v62 }
 0x462   : > { %4739 = vmatprep.mubr.msk.f32.mxu1 %vm1129_vm4, %v6090_v48 }
 0x465   : > { %4740 = vmatmul.mubr.msk.f32.gmra.mrb[20].mxu1 %vm1129_vm4, %v6099_v63 }
 0x466   : > { %4742 = vmatprep.mubr.msk.f32.mxu1 %vm1129_vm4, %v6094_v60 }
 0x469   : > { %4743 = vmatmul.mubr.msk.f32.gmra.mrb[22].mxu1 %vm1129_vm4, %v6102_v4 }
 0x520   : > { %v4723_v36 = vpop.f32.mrb[8].mxu1 }
 0x521   : > { %v5001_v1 = vadd.f32 %v4723_v36, %v6197_v38  ;;  %v2033_v3 = vpop.f32.mrb[9].mxu1 }
 0x522   : > { %v5002_v24 = vadd.f32 %v6197_v38, %v2033_v3 }
 0x523   : > { %v2136_v46 = vadd.f32 %v5001_v1, %v6202_v41 }
 0x524   : > { %v2135_v44 = vadd.f32 %v5002_v24, %v6202_v41  ;;  %v4726_v45 = vpop.f32.mrb[10].mxu1 }
 0x525   : > { %5210 = vtanh.f32 %v2136_v46  ;;  %v5003_v47 = vadd.f32 %v4726_v45, %v6197_v38  ;;  %v2043_v39 = vpop.f32.mrb[11].mxu1 }
 0x526   : > { %5212 = vtanh.f32 %v2135_v44  ;;  %v5004_v51 = vadd.f32 %v6197_v38, %v2043_v39 }
 0x527   : > { %v2138_v56 = vadd.f32 %v5003_v47, %v6202_v41 }
 0x528   : > { %v2137_v61 = vadd.f32 %v5004_v51, %v6202_v41  ;;  %v4729_v9 = vpop.f32.mrb[12].mxu1 }
 0x529   : > { %5214 = vtanh.f32 %v2138_v56  ;;  %v5005_v31 = vadd.f32 %v4729_v9, %v6197_v38  ;;  %v2053_v5 = vpop.f32.mrb[13].mxu1 }
 0x52a   : > { %5216 = vtanh.f32 %v2137_v61  ;;  %v5006_v33 = vadd.f32 %v6197_v38, %v2053_v5 }
 0x52b   : > { %v2140_v43 = vadd.f32 %v5005_v31, %v6202_v41 }
 0x52c   : > { %v2139_v40 = vadd.f32 %v5006_v33, %v6202_v41  ;;  %v4732_v48 = vpop.f32.mrb[14].mxu1 }
 0x52d   : > { %5218 = vtanh.f32 %v2140_v43  ;;  %v5007_v58 = vadd.f32 %v4732_v48, %v6197_v38  ;;  %v2063_v60 = vpop.f32.mrb[15].mxu1 }
 0x52e   : > { %5220 = vtanh.f32 %v2139_v40  ;;  %v5008_v62 = vadd.f32 %v6197_v38, %v2063_v60 }
 0x52f   : > { %v5211_v0 = vpop.eup %5210  ;;  %v2142_v63 = vadd.f32 %v5007_v58, %v6202_v41 }
 0x530   : > { %v5213_v2 = vpop.eup %5212  ;;  %2168 = vst.msk [vmem:[#allocation2 + $0x8] sm:$0xff] %vm1129_vm4, %v5211_v0  ;;  %v2141_v4 = vadd.f32 %v5008_v62, %v6202_v41  ;;  %v4735_v6 = vpop.f32.mrb[16].mxu1 }
 0x531   : > { %2167 = vst.msk [vmem:[#allocation2] sm:$0xff] %vm1129_vm4, %v5213_v2  ;;  %5222 = vtanh.f32 %v2142_v63  ;;  %v5009_v8 = vadd.f32 %v4735_v6, %v6197_v38  ;;  %v2073_v10 = vpop.f32.mrb[17].mxu1 }
 0x532   : > { %5224 = vtanh.f32 %v2141_v4  ;;  %v5010_v12 = vadd.f32 %v6197_v38, %v2073_v10 }
 0x533   : > { %v5215_v14 = vpop.eup %5214  ;;  %v2144_v15 = vadd.f32 %v5009_v8, %v6202_v41 }
 0x534   : > { %v5217_v16 = vpop.eup %5216  ;;  %2170 = vst.msk [vmem:[#allocation2 + $0x18] sm:$0xff] %vm1129_vm4, %v5215_v14  ;;  %v2143_v17 = vadd.f32 %v5010_v12, %v6202_v41  ;;  %v4738_v50 = vpop.f32.mrb[18].mxu1 }
 0x535   : > { %2169 = vst.msk [vmem:[#allocation2 + $0x10] sm:$0xff] %vm1129_vm4, %v5217_v16  ;;  %5226 = vtanh.f32 %v2144_v15  ;;  %v5011_v49 = vadd.f32 %v4738_v50, %v6197_v38  ;;  %v2083_v11 = vpop.f32.mrb[19].mxu1 }
 0x536   : > { %5228 = vtanh.f32 %v2143_v17  ;;  %v5012_v13 = vadd.f32 %v6197_v38, %v2083_v11 }
 0x537   : > { %v5219_v20 = vpop.eup %5218  ;;  %v2146_v21 = vadd.f32 %v5011_v49, %v6202_v41 }
 0x538   : > { %v5221_v30 = vpop.eup %5220  ;;  %2172 = vst.msk [vmem:[#allocation2 + $0x28] sm:$0xff] %vm1129_vm4, %v5219_v20  ;;  %v2145_v22 = vadd.f32 %v5012_v13, %v6202_v41  ;;  %v4741_v53 = vpop.f32.mrb[20].mxu1 }
 0x539   : > { %2171 = vst.msk [vmem:[#allocation2 + $0x20] sm:$0xff] %vm1129_vm4, %v5221_v30  ;;  %5230 = vtanh.f32 %v2146_v21  ;;  %v5013_v54 = vadd.f32 %v4741_v53, %v6197_v38  ;;  %v2093_v25 = vpop.f32.mrb[21].mxu1 }
 0x53a   : > { %5232 = vtanh.f32 %v2145_v22  ;;  %v5014_v52 = vadd.f32 %v6197_v38, %v2093_v25 }
 0x53b   : > { %v5223_v55 = vpop.eup %5222  ;;  %v2148_v18 = vadd.f32 %v5013_v54, %v6202_v41 }
 0x53c   : > { %v5225_v27 = vpop.eup %5224  ;;  %2174 = vst.msk [vmem:[#allocation2 + $0x38] sm:$0xff] %vm1129_vm4, %v5223_v55  ;;  %v2147_v29 = vadd.f32 %v5014_v52, %v6202_v41  ;;  %v4744_v32 = vpop.f32.mrb[22].mxu1 }
 0x53d   : > { %2173 = vst.msk [vmem:[#allocation2 + $0x30] sm:$0xff] %vm1129_vm4, %v5225_v27  ;;  %5234 = vtanh.f32 %v2148_v18  ;;  %v5015_v7 = vadd.f32 %v4744_v32, %v6197_v38  ;;  %v2103_v19 = vpop.f32.mrb[23].mxu1 }
 0x53e   : > { %5236 = vtanh.f32 %v2147_v29  ;;  %v5016_v34 = vadd.f32 %v6197_v38, %v2103_v19 }
 0x53f   : > { %v5227_v57 = vpop.eup %5226  ;;  %v2150_v59 = vadd.f32 %v5015_v7, %v6202_v41 }
 0x540   : > { %v5229_v35 = vpop.eup %5228  ;;  %2176 = vst.msk [vmem:[#allocation2 + $0x48] sm:$0xff] %vm1129_vm4, %v5227_v57  ;;  %v2149_v26 = vadd.f32 %v5016_v34, %v6202_v41 }
 0x541   : > { %2175 = vst.msk [vmem:[#allocation2 + $0x40] sm:$0xff] %vm1129_vm4, %v5229_v35  ;;  %5238 = vtanh.f32 %v2150_v59 }
 0x542   : > { %5240 = vtanh.f32 %v2149_v26 }
 0x543   : > { %v5231_v28 = vpop.eup %5230 }
 0x544   : > { %v5233_v37 = vpop.eup %5232  ;;  %2178 = vst.msk [vmem:[#allocation2 + $0x58] sm:$0xff] %vm1129_vm4, %v5231_v28 }
 0x545   : > { %2177 = vst.msk [vmem:[#allocation2 + $0x50] sm:$0xff] %vm1129_vm4, %v5233_v37 }
 0x547   : > { %v5235_v23 = vpop.eup %5234 }
 0x548   : > { %v5237_v42 = vpop.eup %5236  ;;  %2180 = vst.msk [vmem:[#allocation2 + $0x68] sm:$0xff] %vm1129_vm4, %v5235_v23 }
 0x549   : > { %2179 = vst.msk [vmem:[#allocation2 + $0x60] sm:$0xff] %vm1129_vm4, %v5237_v42 }
 0x54b   : > { %v5239_v38 = vpop.eup %5238 }
 0x54c   : > { %v5241_v36 = vpop.eup %5240  ;;  %2182 = vst.msk [vmem:[#allocation2 + $0x78] sm:$0xff] %vm1129_vm4, %v5239_v38 }
 0x54d   : > { %2181 = vst.msk [vmem:[#allocation2 + $0x70] sm:$0xff] %vm1129_vm4, %v5241_v36 }
 0x54e PF: > { %v2562_v41 = vld [vmem:[%s5637_s30] sm:$0xff]  ;;  %v2563_v1 = vld [vmem:[%s5637_s30 + $0x8] sm:$0xff]  ;;  %v2564_v3 = vld [vmem:[%s5637_s30 + $0x10] sm:$0xff]  ;;  %vm2573_vm8 = vcmask 261120   ;;  %s6910_s17 = sld [smem:[#allocation22_spill]]  ;;  %vm2336_vm9 = vcmask 64512  }
 0x54f   : > { %v4943_v24 = vpack.c.bf16 %v2563_v1, %v2562_v41  ;;  %v2565_v46 = vld [vmem:[%s5637_s30 + $0x18] sm:$0xff]  ;;  %v2546_v44 = vld [vmem:[#allocation2] sm:$0xff]  ;;  %v2547_v47 = vld [vmem:[#allocation2 + $0x8] sm:$0xff]  ;;  %v5421_v26 = vmov 0   ;;  %vm3087_vm10 = vcmask 7168   ;;  %p4357_p2 = scmp.ne.s32.totalorder %s5388_s20, 1 }
 0x550   : > { %v4947_v45 = vpack.c.bf16 %v2565_v46, %v2564_v3  ;;  %4779 = vmatprep.mubr.msk.f32.mxu1 %vm2573_vm8, %v2546_v44  ;;  %v2548_v39 = vld [vmem:[#allocation2 + $0x10] sm:$0xff]  ;;  %v2549_v51 = vld [vmem:[#allocation2 + $0x18] sm:$0xff]  ;;  %v2550_v56 = vld [vmem:[#allocation2 + $0x20] sm:$0xff]  ;;  %5243 = vset.pattern.permute.xlu1 %v5421_v26  ;;  %s6912_s18 = sld [smem:[#allocation30_spill]] (!%p4357_p2)  ;;  %s6913_s1 = sld [smem:[#allocation29_spill]] (!%p4357_p2) }
 0x551   : > { %4944 = vmatprep.subr.bf16.mxu1 %v4943_v24  ;;  %v2551_v61 = vld [vmem:[#allocation2 + $0x28] sm:$0xff]  ;;  %v2552_v9 = vld [vmem:[#allocation2 + $0x30] sm:$0xff]  ;;  %v2553_v31 = vld [vmem:[#allocation2 + $0x38] sm:$0xff]  ;;  %5242 = vset.pattern.permute.xlu0 %v5421_v26 }
 0x552   : > { %4946 = vmatpush3.bf16.msra.mxu1 %v4943_v24  ;;  %v2554_v5 = vld [vmem:[#allocation2 + $0x40] sm:$0xff]  ;;  %v2555_v33 = vld [vmem:[#allocation2 + $0x48] sm:$0xff]  ;;  %v2556_v43 = vld [vmem:[#allocation2 + $0x50] sm:$0xff] }
 0x553   : > { %4948 = vmatprep.subr.bf16.mxu1 %v4947_v45  ;;  %v2557_v40 = vld [vmem:[#allocation2 + $0x58] sm:$0xff]  ;;  %v2558_v48 = vld [vmem:[#allocation2 + $0x60] sm:$0xff]  ;;  %v2559_v58 = vld [vmem:[#allocation2 + $0x68] sm:$0xff] }
 0x554   : > { %v2560_v60 = vld [vmem:[#allocation2 + $0x70] sm:$0xff]  ;;  %v2561_v62 = vld [vmem:[#allocation2 + $0x78] sm:$0xff]  ;;  %v2328_v0 = vld [vmem:[%s6910_s17] sm:$0xff] }
 0x555   : > { %4745 = vmatprep.subr.mxu0 %v2328_v0  ;;  %v2312_v63 = vld [vmem:[%s5628_s10] sm:$0xff]  ;;  %v2313_v2 = vld [vmem:[%s5628_s10 + $0x8] sm:$0xff]  ;;  %v2314_v4 = vld [vmem:[%s5628_s10 + $0x10] sm:$0xff] }
 0x556   : > { %4950 = vmatpush3.bf16.msra.mxu1 %v4947_v45  ;;  %4746 = vmatpush3.msra.mxu0 %v2328_v0  ;;  %v2315_v6 = vld [vmem:[%s5628_s10 + $0x18] sm:$0xff]  ;;  %v2316_v8 = vld [vmem:[%s5628_s10 + $0x20] sm:$0xff]  ;;  %v2317_v10 = vld [vmem:[%s5628_s10 + $0x28] sm:$0xff]  ;;  %s6914_s12 = smov (!%p4357_p2), %s6913_s1 }
 0x557   : > { %4747 = vmatprep.mubr.msk.f32.mxu0 %vm2336_vm9, %v2312_v63  ;;  %v2318_v12 = vld [vmem:[%s5628_s10 + $0x30] sm:$0xff]  ;;  %v2319_v14 = vld [vmem:[%s5628_s10 + $0x38] sm:$0xff]  ;;  %v2320_v15 = vld [vmem:[%s5628_s10 + $0x40] sm:$0xff] }
 0x558   : > { %4748 = vmatmul.mubr.msk.f32.vlgmr.msra.gmra.mrb[0].mxu0 %vm2336_vm9, %v2313_v2  ;;  %v2321_v16 = vld [vmem:[%s5628_s10 + $0x48] sm:$0xff]  ;;  %v2322_v17 = vld [vmem:[%s5628_s10 + $0x50] sm:$0xff]  ;;  %v2323_v50 = vld [vmem:[%s5628_s10 + $0x58] sm:$0xff] }
 0x559   : > { %4780 = vmatmul.mubr.msk.f32.vlgmr.msra.gmra.mrb[0].mxu1 %vm2573_vm8, %v2547_v47  ;;  %4750 = vmatprep.mubr.msk.f32.mxu0 %vm2336_vm9, %v2314_v4  ;;  %v2324_v49 = vld [vmem:[%s5628_s10 + $0x60] sm:$0xff]  ;;  %v2325_v11 = vld [vmem:[%s5628_s10 + $0x68] sm:$0xff]  ;;  %v2326_v13 = vld [vmem:[%s5628_s10 + $0x70] sm:$0xff] }
 0x55a   : > { %4782 = vmatprep.mubr.msk.f32.mxu1 %vm2573_vm8, %v2548_v39  ;;  %v2327_v20 = vld [vmem:[%s5628_s10 + $0x78] sm:$0xff]  ;;  %v4340_v21 = vld [vmem:[%s785_s7] ss:$0 sm:$0xff]  ;;  %s6911_s7 = sld [smem:[#allocation23_spill]] }
 0x55c   : > { %4751 = vmatmul.mubr.msk.f32.gmra.mrb[2].mxu0 %vm2336_vm9, %v2315_v6 }
 0x55d   : > { %4783 = vmatmul.mubr.msk.f32.gmra.mrb[2].mxu1 %vm2573_vm8, %v2549_v51  ;;  %4753 = vmatprep.mubr.msk.f32.mxu0 %vm2336_vm9, %v2316_v8 }
 0x55e   : > { %4785 = vmatprep.mubr.msk.f32.mxu1 %vm2573_vm8, %v2550_v56 }
 0x560   : > { %4754 = vmatmul.mubr.msk.f32.gmra.mrb[4].mxu0 %vm2336_vm9, %v2317_v10  ;;  %v6363_v51 = vld [vmem:[%s6911_s7] ss:$0 sm:$0xff]  ;;  %s6915_s7 = sld [smem:[#allocation31_spill]] (!%p4357_p2) }
 0x561   : > { %4786 = vmatmul.mubr.msk.f32.gmra.mrb[4].mxu1 %vm2573_vm8, %v2551_v61  ;;  %4756 = vmatprep.mubr.msk.f32.mxu0 %vm2336_vm9, %v2318_v12 }
 0x562   : > { %4788 = vmatprep.mubr.msk.f32.mxu1 %vm2573_vm8, %v2552_v9 }
 0x564   : > { %4757 = vmatmul.mubr.msk.f32.gmra.mrb[6].mxu0 %vm2336_vm9, %v2319_v14 }
 0x565   : > { %4789 = vmatmul.mubr.msk.f32.gmra.mrb[6].mxu1 %vm2573_vm8, %v2553_v31  ;;  %4759 = vmatprep.mubr.msk.f32.mxu0 %vm2336_vm9, %v2320_v15 }
 0x566   : > { %4791 = vmatprep.mubr.msk.f32.mxu1 %vm2573_vm8, %v2554_v5 }
 0x568   : > { %4760 = vmatmul.mubr.msk.f32.gmra.mrb[8].mxu0 %vm2336_vm9, %v2321_v16 }
 0x569   : > { %4792 = vmatmul.mubr.msk.f32.gmra.mrb[8].mxu1 %vm2573_vm8, %v2555_v33  ;;  %4762 = vmatprep.mubr.msk.f32.mxu0 %vm2336_vm9, %v2322_v17 }
 0x56a   : > { %4794 = vmatprep.mubr.msk.f32.mxu1 %vm2573_vm8, %v2556_v43 }
 0x56c   : > { %4763 = vmatmul.mubr.msk.f32.gmra.mrb[10].mxu0 %vm2336_vm9, %v2323_v50 }
 0x56d   : > { %4795 = vmatmul.mubr.msk.f32.gmra.mrb[10].mxu1 %vm2573_vm8, %v2557_v40  ;;  %4765 = vmatprep.mubr.msk.f32.mxu0 %vm2336_vm9, %v2324_v49  ;;  %v6373_v49 = vld [vmem:[#allocation6 + $0x8] sm:$0xff] }
 0x56e   : > { %4797 = vmatprep.mubr.msk.f32.mxu1 %vm2573_vm8, %v2558_v48 }
 0x570   : > { %4766 = vmatmul.mubr.msk.f32.gmra.mrb[12].mxu0 %vm2336_vm9, %v2325_v11 }
 0x571   : > { %4798 = vmatmul.mubr.msk.f32.gmra.mrb[12].mxu1 %vm2573_vm8, %v2559_v58  ;;  %4768 = vmatprep.mubr.msk.f32.mxu0 %vm2336_vm9, %v2326_v13 }
 0x572   : > { %4800 = vmatprep.mubr.msk.f32.mxu1 %vm2573_vm8, %v2560_v60 }
 0x574   : > { %4769 = vmatmul.mubr.msk.f32.gmra.mrb[14].mxu0 %vm2336_vm9, %v2327_v20 }
 0x575   : > { %4801 = vmatmul.mubr.msk.f32.gmra.mrb[14].mxu1 %vm2573_vm8, %v2561_v62 }
 0x62b   : > { %v4749_v56 = vpop.f32.mrb[0].mxu0 }
 0x62c   : > { %v4781_v30 = vpop.f32.mrb[0].mxu1  ;;  %v2457_v61 = vadd.f32 %v4749_v56, %v6363_v51  ;;  %v2451_v9 = vpop.f32.mrb[1].mxu0 }
 0x62d   : > { %v6312_v22 = vadd.f32 %v4781_v30, %v4340_v21  ;;  %v2688_v53 = vpop.f32.mrb[1].mxu1  ;;  %v2452_v31 = vadd.f32 %v6363_v51, %v2451_v9 }
 0x62e   : > { %v6315_v25 = vadd.f32 %v4340_v21, %v2688_v53  ;;  %v2531_v5 = vmax.f32 %v2457_v61, 0.0 }
 0x62f   : > { %2785 = vmax.xlane.f32.xlu0 %v6312_v22  ;;  %v2530_v33 = vmax.f32 %v2452_v31, 0.0  ;;  %v4752_v43 = vpop.f32.mrb[2].mxu0 }
 0x630   : > { %v4784_v54 = vpop.f32.mrb[2].mxu1  ;;  %v2467_v40 = vadd.f32 %v4752_v43, %v6363_v51  ;;  %v2461_v48 = vpop.f32.mrb[3].mxu0 }
 0x631   : > { %v6317_v52 = vadd.f32 %v4784_v54, %v4340_v21  ;;  %v2698_v55 = vpop.f32.mrb[3].mxu1  ;;  %v4951_v58 = vpack.c.bf16 %v2531_v5, %v2530_v33  ;;  %v2462_v60 = vadd.f32 %v6363_v51, %v2461_v48 }
 0x632   : > { %v6321_v27 = vadd.f32 %v4340_v21, %v2698_v55  ;;  %v2533_v62 = vmax.f32 %v2467_v40, 0.0 }
 0x633   : > { %2789 = vmax.xlane.f32.xlu1 %v6317_v52  ;;  %2783 = vmax.xlane.f32.xlu0 %v6315_v25  ;;  %v2532_v0 = vmax.f32 %v2462_v60, 0.0  ;;  %v4755_v63 = vpop.f32.mrb[4].mxu0 }
 0x634   : > { %v4787_v18 = vpop.f32.mrb[4].mxu1  ;;  %4952 = vmatprep.subr.bf16.mxu0 %v4951_v58  ;;  %5033 = vmatprep.subr.bf16.mxu1 %v4951_v58  ;;  %v2477_v2 = vadd.f32 %v4755_v63, %v6363_v51  ;;  %v2471_v4 = vpop.f32.mrb[5].mxu0 }
 0x635   : > { %v6323_v29 = vadd.f32 %v4787_v18, %v4340_v21  ;;  %v2708_v32 = vpop.f32.mrb[5].mxu1  ;;  %4954 = vmatpush3.bf16.msra.mxu0 %v4951_v58  ;;  %5041 = vmatpush3.bf16.msra.mxu1 %v4951_v58  ;;  %v4955_v6 = vpack.c.bf16 %v2533_v62, %v2532_v0  ;;  %v2472_v8 = vadd.f32 %v6363_v51, %v2471_v4  ;;  %v6411_v58 = vld [vmem:[#allocation6 + $0x20] sm:$0xff] }
 0x636   : > { %v6327_v19 = vadd.f32 %v4340_v21, %v2708_v32  ;;  %v2535_v10 = vmax.f32 %v2477_v2, 0.0  ;;  %v6380_v32 = vld [vmem:[#allocation6 + $0x18] sm:$0xff] }
 0x637   : > { %2787 = vmax.xlane.f32.xlu1 %v6321_v27  ;;  %2793 = vmax.xlane.f32.xlu0 %v6323_v29  ;;  %v2534_v12 = vmax.f32 %v2472_v8, 0.0  ;;  %v4758_v14 = vpop.f32.mrb[6].mxu0 }
 0x638   : > { %v4790_v7 = vpop.f32.mrb[6].mxu1  ;;  %4956 = vmatprep.subr.bf16.mxu0 %v4955_v6  ;;  %5034 = vmatprep.subr.bf16.mxu1 %v4955_v6  ;;  %v2487_v15 = vadd.f32 %v4758_v14, %v6363_v51  ;;  %v2481_v16 = vpop.f32.mrb[7].mxu0 }
 0x639   : > { %v2718_v34 = vpop.f32.mrb[7].mxu1  ;;  %v6330_v59 = vadd.f32 %v4790_v7, %v4340_v21  ;;  %4958 = vmatpush3.bf16.msra.mxu0 %v4955_v6  ;;  %5042 = vmatpush3.bf16.msra.mxu1 %v4955_v6  ;;  %v4959_v17 = vpack.c.bf16 %v2535_v10, %v2534_v12  ;;  %v2482_v50 = vadd.f32 %v6363_v51, %v2481_v16  ;;  %v6382_v7 = vld [vmem:[#allocation6] sm:$0xff] }
 0x63a   : > { %v6333_v37 = vadd.f32 %v4340_v21, %v2718_v34  ;;  %v2537_v11 = vmax.f32 %v2487_v15, 0.0  ;;  %v6423_v15 = vld [vmem:[#allocation6 + $0x38] sm:$0xff] }
 0x63b   : > { %2791 = vmax.xlane.f32.xlu0 %v6327_v19  ;;  %v2536_v13 = vmax.f32 %v2482_v50, 0.0  ;;  %v4761_v20 = vpop.f32.mrb[8].mxu0  ;;  %4960 = vmatprep.subr.bf16.mxu0 %v4959_v17 }
 0x63c   : > { %v4793_v57 = vpop.f32.mrb[8].mxu1  ;;  %5035 = vmatprep.subr.bf16.mxu1 %v4959_v17  ;;  %v2497_v30 = vadd.f32 %v4761_v20, %v6363_v51  ;;  %v2491_v53 = vpop.f32.mrb[9].mxu0 }
 0x63d   : > { %v2728_v35 = vpop.f32.mrb[9].mxu1  ;;  %v6347_v46 = vadd.f32 %v4793_v57, %v4340_v21  ;;  %4962 = vmatpush3.bf16.msra.mxu0 %v4959_v17  ;;  %5043 = vmatpush3.bf16.msra.mxu1 %v4959_v17  ;;  %v4963_v55 = vpack.c.bf16 %v2537_v11, %v2536_v13  ;;  %v2492_v18 = vadd.f32 %v6363_v51, %v2491_v53 }
 0x63e   : > { %v6339_v36 = vadd.f32 %v4340_v21, %v2728_v35  ;;  %v2539_v34 = vmax.f32 %v2497_v30, 0.0  ;;  %v6433_v30 = vld [vmem:[#allocation6 + $0x58] sm:$0xff] }
 0x63f   : > { %2797 = vmax.xlane.f32.xlu0 %v6330_v59  ;;  %v2538_v57 = vmax.f32 %v2492_v18, 0.0  ;;  %4964 = vmatprep.subr.bf16.mxu0 %v4963_v55 }
 0x640   : > { %v4796_v28 = vpop.f32.mrb[10].mxu1  ;;  %5036 = vmatprep.subr.bf16.mxu1 %v4963_v55 }
 0x641   : > { %v6335_v23 = vadd.f32 %v4796_v28, %v4340_v21  ;;  %v2738_v42 = vpop.f32.mrb[11].mxu1  ;;  %4966 = vmatpush3.bf16.msra.mxu0 %v4963_v55  ;;  %5044 = vmatpush3.bf16.msra.mxu1 %v4963_v55 }
 0x642   : > { %v6341_v41 = vadd.f32 %v4340_v21, %v2738_v42 }
 0x643   : > { %2805 = vmax.xlane.f32.xlu1 %v6335_v23  ;;  %2795 = vmax.xlane.f32.xlu0 %v6333_v37 }
 0x644   : > { %v4799_v38 = vpop.f32.mrb[12].mxu1 }
 0x645   : > { %v2748_v1 = vpop.f32.mrb[13].mxu1  ;;  %v6343_v3 = vadd.f32 %v4799_v38, %v4340_v21  ;;  %v4967_v38 = vpack.c.bf16 %v2539_v34, %v2538_v57 }
 0x646   : > { %v6351_v45 = vadd.f32 %v4340_v21, %v2748_v1  ;;  %v4764_v1 = vpop.f32.mrb[10].mxu0 }
 0x647   : > { %2803 = vmax.xlane.f32.xlu1 %v6341_v41  ;;  %2799 = vmax.xlane.f32.xlu0 %v6339_v36  ;;  %v2507_v56 = vadd.f32 %v4764_v1, %v6363_v51  ;;  %v2501_v61 = vpop.f32.mrb[11].mxu0 }
 0x648   : > { %v4802_v24 = vpop.f32.mrb[14].mxu1  ;;  %v2502_v9 = vadd.f32 %v6363_v51, %v2501_v61  ;;  %4968 = vmatprep.subr.bf16.mxu0 %v4967_v38  ;;  %5037 = vmatprep.subr.bf16.mxu1 %v4967_v38  ;;  %v4767_v48 = vpop.f32.mrb[12].mxu0 }
 0x649   : > { %v2758_v44 = vpop.f32.mrb[15].mxu1  ;;  %v6353_v47 = vadd.f32 %v4802_v24, %v4340_v21  ;;  %v6393_v24 = vld [vmem:[#allocation6 + $0x10] sm:$0xff]  ;;  %v2541_v33 = vmax.f32 %v2507_v56, 0.0  ;;  %4970 = vmatpush3.bf16.msra.mxu0 %v4967_v38  ;;  %5045 = vmatpush3.bf16.msra.mxu1 %v4967_v38  ;;  %v2517_v62 = vadd.f32 %v4767_v48, %v6363_v51  ;;  %v2511_v0 = vpop.f32.mrb[13].mxu0 }
 0x64a   : > { %v6357_v39 = vadd.f32 %v4340_v21, %v2758_v44  ;;  %v6395_v44 = vld [vmem:[#allocation6 + $0x28] sm:$0xff]  ;;  %v2540_v60 = vmax.f32 %v2502_v9, 0.0  ;;  %v2512_v63 = vadd.f32 %v6363_v51, %v2511_v0  ;;  %v4770_v8 = vpop.f32.mrb[14].mxu0  ;;  %v6473_v0 = vld [vmem:[#allocation6 + $0x60] sm:$0xff] }
 0x64b   : > { %2809 = vmax.xlane.f32.xlu1 %v6343_v3  ;;  %2801 = vmax.xlane.f32.xlu0 %v6347_v46  ;;  %v2543_v6 = vmax.f32 %v2517_v62, 0.0  ;;  %v2521_v14 = vpop.f32.mrb[15].mxu0  ;;  %v2527_v16 = vadd.f32 %v4770_v8, %v6363_v51  ;;  %v6459_v9 = vld [vmem:[#allocation6 + $0x68] sm:$0xff] }
 0x64c   : > { %v4971_v4 = vpack.c.bf16 %v2541_v33, %v2540_v60  ;;  %v2542_v12 = vmax.f32 %v2512_v63, 0.0  ;;  %v2522_v17 = vadd.f32 %v6363_v51, %v2521_v14  ;;  %v6435_v51 = vld [vmem:[#allocation6 + $0x30] sm:$0xff] }
 0x64d   : > { %v2545_v13 = vmax.f32 %v2527_v16, 0.0  ;;  %v6496_v14 = vld [vmem:[#allocation6 + $0x70] sm:$0xff] }
 0x64e   : > { %4972 = vmatprep.subr.bf16.mxu0 %v4971_v4  ;;  %5038 = vmatprep.subr.bf16.mxu1 %v4971_v4  ;;  %v4975_v50 = vpack.c.bf16 %v2543_v6, %v2542_v12  ;;  %v2544_v20 = vmax.f32 %v2522_v17, 0.0  ;;  %v6485_v6 = vld [vmem:[#allocation6 + $0x78] sm:$0xff] }
 0x64f   : > { %2807 = vmax.xlane.f32.xlu1 %v6351_v45  ;;  %4974 = vmatpush3.bf16.msra.mxu0 %v4971_v4 }
 0x650   : > { %5046 = vmatpush3.bf16.msra.mxu1 %v4971_v4  ;;  %4976 = vmatprep.subr.bf16.mxu0 %v4975_v50  ;;  %v4979_v53 = vpack.c.bf16 %v2545_v13, %v2544_v20 }
 0x651   : > { %5039 = vmatprep.subr.bf16.mxu1 %v4975_v50 }
 0x653   : > { %2813 = vmax.xlane.f32.xlu1 %v6353_v47  ;;  %4978 = vmatpush3.bf16.msra.mxu0 %v4975_v50 }
 0x654   : > { %4980 = vmatprep.subr.bf16.mxu0 %v4979_v53  ;;  %5047 = vmatpush3.bf16.msra.mxu1 %v4975_v50 }
 0x655   : > { %5040 = vmatprep.subr.bf16.mxu1 %v4979_v53 }
 0x657   : > { %2811 = vmax.xlane.f32.xlu1 %v6357_v39  ;;  %4982 = vmatpush3.bf16.msra.mxu0 %v4979_v53 }
 0x658   : > { %5048 = vmatpush3.bf16.msra.mxu1 %v4979_v53 }
 0x6bc   : > { %v2786_v21 = vpop.xlane.xlu0 %2785 }
 0x6bd   : > { %v6377_v54 = vmax.f32 %v6373_v49, %v2786_v21 }
 0x6bf   : > { %3394 = vst.msk [vmem:[#allocation6 + $0x8] sm:$0xff] %vm3087_vm10, %v6377_v54  ;;  %2886 = vperm.xlu1 %5243, %v6377_v54  }
 0x6c0   : > { %v2790_v35 = vpop.xlane.xlu1 %2789  ;;  %v2784_v26 = vpop.xlane.xlu0 %2783 }
 0x6c1   : > { %v6388_v28 = vmax.f32 %v6380_v32, %v2790_v35  ;;  %v6391_v42 = vmax.f32 %v6382_v7, %v2784_v26  ;;  %v6446_v35 = vld [vmem:[#allocation6 + $0x50] sm:$0xff]  ;;  %v6448_v26 = vld [vmem:[#allocation6 + $0x40] sm:$0xff] }
 0x6c3   : > { %3396 = vst.msk [vmem:[#allocation6 + $0x18] sm:$0xff] %vm3087_vm10, %v6388_v28  ;;  %3393 = vst.msk [vmem:[#allocation6] sm:$0xff] %vm3087_vm10, %v6391_v42  ;;  %2896 = vperm.xlu1 %5243, %v6388_v28   ;;  %2881 = vperm.xlu0 %5242, %v6391_v42   ;;  %v2831_v63 = vsub.f32 %v6382_v7, %v6391_v42  ;;  %v2834_v7 = vsub.f32 %v6380_v32, %v6388_v28 }
 0x6c4   : > { %v2788_v31 = vpop.xlane.xlu1 %2787  ;;  %v2794_v5 = vpop.xlane.xlu0 %2793 }
 0x6c5   : > { %v6406_v43 = vmax.f32 %v6393_v24, %v2788_v31  ;;  %v6409_v40 = vmax.f32 %v6395_v44, %v2794_v5  ;;  %v6461_v31 = vld [vmem:[#allocation6 + $0x48] sm:$0xff]  ;;  %v2832_v5 = vsub.f32 %v6373_v49, %v6377_v54  ;;  %v2847_v42 = vmul.f32 1.442695, %v2831_v63 }
 0x6c6   : > { %v2853_v16 = vmul.f32 1.442695, %v2834_v7 }
 0x6c7   : > { %3395 = vst.msk [vmem:[#allocation6 + $0x10] sm:$0xff] %vm3087_vm10, %v6406_v43  ;;  %3398 = vst.msk [vmem:[#allocation6 + $0x28] sm:$0xff] %vm3087_vm10, %v6409_v40  ;;  %2891 = vperm.xlu1 %5243, %v6406_v43   ;;  %v2849_v49 = vmul.f32 1.442695, %v2832_v5  ;;  %v2833_v54 = vsub.f32 %v6393_v24, %v6406_v43  ;;  %v2836_v32 = vsub.f32 %v6395_v44, %v6409_v40 }
 0x6c8   : > { %v2792_v2 = vpop.xlane.xlu0 %2791 }
 0x6c9   : > { %v6421_v10 = vmax.f32 %v6411_v58, %v2792_v2  ;;  %5244 = vpow2.f32 %v2849_v49  ;;  %v2851_v8 = vmul.f32 1.442695, %v2833_v54 }
 0x6ca   : > { %5246 = vpow2.f32 %v2847_v42 }
 0x6cb   : > { %3397 = vst.msk [vmem:[#allocation6 + $0x20] sm:$0xff] %vm3087_vm10, %v6421_v10  ;;  %2906 = vperm.xlu1 %5243, %v6409_v40   ;;  %v2835_v12 = vsub.f32 %v6411_v58, %v6421_v10  ;;  %5248 = vpow2.f32 %v2851_v8 }
 0x6cc   : > { %v2798_v11 = vpop.xlane.xlu0 %2797  ;;  %5250 = vpow2.f32 %v2853_v16 }
 0x6cd   : > { %v6431_v21 = vmax.f32 %v6423_v15, %v2798_v11  ;;  %v2855_v58 = vmul.f32 1.442695, %v2835_v12  ;;  %v2857_v11 = vmul.f32 1.442695, %v2836_v32 }
 0x6cf   : > { %3400 = vst.msk [vmem:[#allocation6 + $0x38] sm:$0xff] %vm3087_vm10, %v6431_v21  ;;  %2901 = vperm.xlu1 %5243, %v6421_v10   ;;  %v2838_v44 = vsub.f32 %v6423_v15, %v6431_v21  ;;  %5252 = vpow2.f32 %v2855_v58 }
 0x6d0   : > { %v2806_v55 = vpop.xlane.xlu1 %2805  ;;  %v2796_v18 = vpop.xlane.xlu0 %2795  ;;  %5254 = vpow2.f32 %v2857_v11 }
 0x6d1   : > { %v6441_v34 = vmax.f32 %v6433_v30, %v2806_v55  ;;  %v6444_v57 = vmax.f32 %v6435_v51, %v2796_v18  ;;  %v2861_v53 = vmul.f32 1.442695, %v2838_v44 }
 0x6d3   : > { %3404 = vst.msk [vmem:[#allocation6 + $0x58] sm:$0xff] %vm3087_vm10, %v6441_v34  ;;  %3399 = vst.msk [vmem:[#allocation6 + $0x30] sm:$0xff] %vm3087_vm10, %v6444_v57  ;;  %2911 = vperm.xlu1 %5243, %v6444_v57   ;;  %v2837_v10 = vsub.f32 %v6435_v51, %v6444_v57  ;;  %v6517_v51 = vpop.eup %5244 }
 0x6d4   : > { %v2804_v38 = vpop.xlane.xlu1 %2803  ;;  %v2800_v1 = vpop.xlane.xlu0 %2799 }
 0x6d5   : > { %v6456_v56 = vmax.f32 %v6446_v35, %v2804_v38  ;;  %v2823_v61 = vmax.f32 %v6448_v26, %v2800_v1  ;;  %v2859_v13 = vmul.f32 1.442695, %v2837_v10  ;;  %v6524_v18 = vpop.eup %5246 }
 0x6d6   : > { %v6526_v57 = vpop.eup %5248 }
 0x6d7   : > { %3403 = vst.msk [vmem:[#allocation6 + $0x50] sm:$0xff] %vm3087_vm10, %v6456_v56  ;;  %3401 = vst.msk [vmem:[#allocation6 + $0x40] sm:$0xff] %vm3087_vm10, %v2823_v61  ;;  %2936 = vperm.xlu1 %5243, %v6441_v34   ;;  %v2839_v20 = vsub.f32 %v6448_v26, %v2823_v61  ;;  %v2841_v15 = vsub.f32 %v6446_v35, %v6456_v56  ;;  %5256 = vpow2.f32 %v2859_v13 }
 0x6d8   : > { %v2810_v33 = vpop.xlane.xlu1 %2809  ;;  %v2802_v48 = vpop.xlane.xlu0 %2801  ;;  %5258 = vpow2.f32 %v2861_v53  ;;  %v2842_v26 = vsub.f32 %v6433_v30, %v6441_v34 }
 0x6d9   : > { %v6470_v60 = vmax.f32 %v6459_v9, %v2810_v33  ;;  %v2824_v62 = vmax.f32 %v6461_v31, %v2802_v48  ;;  %v2867_v38 = vmul.f32 1.442695, %v2841_v15 }
 0x6db   : > { %3406 = vst.msk [vmem:[#allocation6 + $0x68] sm:$0xff] %vm3087_vm10, %v6470_v60  ;;  %3402 = vst.msk [vmem:[#allocation6 + $0x48] sm:$0xff] %vm3087_vm10, %v2824_v62  ;;  %2946 = vperm.xlu0 %5242, %v6470_v60   ;;  %2931 = vperm.xlu1 %5243, %v6456_v56   ;;  %v2840_v55 = vsub.f32 %v6461_v31, %v2824_v62  ;;  %v6533_v56 = vpop.eup %5250  ;;  %v2869_v31 = vmul.f32 1.442695, %v2842_v26  ;;  %v2844_v30 = vsub.f32 %v6459_v9, %v6470_v60 }
 0x6dc   : > { %v2808_v2 = vpop.xlane.xlu1 %2807 }
 0x6dd   : > { %v2827_v4 = vmax.f32 %v6473_v0, %v2808_v2  ;;  %v2865_v35 = vmul.f32 1.442695, %v2840_v55  ;;  %v2873_v48 = vmul.f32 1.442695, %v2844_v30 }
 0x6df   : > { %3405 = vst.msk [vmem:[#allocation6 + $0x60] sm:$0xff] %vm3087_vm10, %v2827_v4  ;;  %2941 = vperm.xlu0 %5242, %v2827_v4   ;;  %2916 = vperm.xlu1 %5243, %v6431_v21   ;;  %v2863_v21 = vmul.f32 1.442695, %v2839_v20  ;;  %v2843_v1 = vsub.f32 %v6473_v0, %v2827_v4 }
 0x6e0   : > { %v2814_v24 = vpop.xlane.xlu1 %2813 }
 0x6e1   : > { %v6494_v43 = vmax.f32 %v6485_v6, %v2814_v24  ;;  %5260 = vpow2.f32 %v2863_v21  ;;  %v2871_v34 = vmul.f32 1.442695, %v2843_v1 }
 0x6e2   : > { %5262 = vpow2.f32 %v2867_v38 }
 0x6e3   : > { %v2846_v28 = vsub.f32 %v6485_v6, %v6494_v43  ;;  %3408 = vst.msk [vmem:[#allocation6 + $0x78] sm:$0xff] %vm3087_vm10, %v6494_v43  ;;  %2921 = vperm.xlu1 %5243, %v2823_v61   ;;  %v6535_v61 = vpop.eup %5252  ;;  %5264 = vpow2.f32 %v2865_v35 }
 0x6e4   : > { %v2812_v17 = vpop.xlane.xlu1 %2811  ;;  %v6541_v5 = vpop.eup %5254  ;;  %5266 = vpow2.f32 %v2869_v31 }
 0x6e5   : > { %v6507_v50 = vmax.f32 %v6496_v14, %v2812_v17  ;;  %v6543_v33 = vpop.eup %5256  ;;  %5268 = vpow2.f32 %v2871_v34 }
 0x6e6   : > { %5270 = vpow2.f32 %v2873_v48 }
 0x6e7   : > { %v2845_v40 = vsub.f32 %v6496_v14, %v6507_v50  ;;  %3407 = vst.msk [vmem:[#allocation6 + $0x70] sm:$0xff] %vm3087_vm10, %v6507_v50  ;;  %2951 = vperm.xlu0 %5242, %v6507_v50   ;;  %2926 = vperm.xlu1 %5243, %v2824_v62   ;;  %v6547_v62 = vpop.eup %5258 }
 0x6eb   : > { %2956 = vperm.xlu0 %5242, %v6494_v43   ;;  %3127 = vperm.xlu1 %5243, %v6517_v51   ;;  %v6549_v0 = vpop.eup %5260 }
 0x6ec   : > { %v6553_v9 = vpop.eup %5262 }
 0x6ed   : > { %v6555_v60 = vpop.eup %5264 }
 0x6ee   : > { %v6559_v63 = vpop.eup %5266 }
 0x6ef   : > { %3122 = vperm.xlu0 %5242, %v6524_v18   ;;  %3132 = vperm.xlu1 %5243, %v6526_v57   ;;  %v6561_v49 = vpop.eup %5268 }
 0x6f0   : > { %v6565_v54 = vpop.eup %5270 }
 0x6f3   : > { %3137 = vperm.xlu0 %5242, %v6533_v56   ;;  %3142 = vperm.xlu1 %5243, %v6535_v61  }
 0x6f7   : > { %3147 = vperm.xlu0 %5242, %v6541_v5   ;;  %3152 = vperm.xlu1 %5243, %v6543_v33  }
 0x6fb   : > { %3157 = vperm.xlu0 %5242, %v6547_v62   ;;  %3162 = vperm.xlu1 %5243, %v6549_v0  }
 0x6ff   : > { %3172 = vperm.xlu1 %5243, %v6553_v9   ;;  %3167 = vperm.xlu0 %5242, %v6555_v60  }
 0x703   : > { %3182 = vperm.xlu1 %5243, %v6561_v49   ;;  %3177 = vperm.xlu0 %5242, %v6559_v63  }
 0x707   : > { %3187 = vperm.xlu0 %5242, %v6565_v54  }
 0x73e   : > { %v2887_v2 = vpop.permute.xlu1 %2886 }
 0x73f   : > { %v2960_v4 = vsub.f32 %v6312_v22, %v2887_v2 }
 0x741   : > { %v2977_v7 = vmul.f32 1.442695, %v2960_v4 }
 0x742   : > { %v2897_v42 = vpop.permute.xlu1 %2896  ;;  %v2882_v8 = vpop.permute.xlu0 %2881 }
 0x743   : > { %5272 = vpow2.f32 %v2977_v7  ;;  %v2959_v12 = vsub.f32 %v6315_v25, %v2882_v8  ;;  %v2962_v24 = vsub.f32 %v6317_v52, %v2897_v42 }
 0x745   : > { %v2975_v16 = vmul.f32 1.442695, %v2959_v12  ;;  %v2981_v10 = vmul.f32 1.442695, %v2962_v24 }
 0x746   : > { %v2892_v32 = vpop.permute.xlu1 %2891 }
 0x747   : > { %v2961_v58 = vsub.f32 %v6321_v27, %v2892_v32  ;;  %5274 = vpow2.f32 %v2975_v16 }
 0x749   : > { %v2979_v17 = vmul.f32 1.442695, %v2961_v58 }
 0x74a   : > { %v2907_v11 = vpop.permute.xlu1 %2906 }
 0x74b   : > { %5276 = vpow2.f32 %v2979_v17  ;;  %v2964_v44 = vsub.f32 %v6323_v29, %v2907_v11 }
 0x74c   : > { %5278 = vpow2.f32 %v2981_v10 }
 0x74d   : > { %v5273_v22 = vpop.eup %5272  ;;  %v2985_v13 = vmul.f32 1.442695, %v2964_v44 }
 0x74e   : > { %v2902_v20 = vpop.permute.xlu1 %2901  ;;  %3041 = vadd.xlane.f32.xlu0 %v5273_v22 }
 0x74f   : > { %5280 = vpow2.f32 %v2985_v13  ;;  %v2963_v25 = vsub.f32 %v6327_v19, %v2902_v20 }
 0x751   : > { %v2983_v52 = vmul.f32 1.442695, %v2963_v25  ;;  %v5275_v53 = vpop.eup %5274 }
 0x752   : > { %v2912_v15 = vpop.permute.xlu1 %2911  ;;  %3039 = vadd.xlane.f32.xlu1 %v5275_v53  ;;  %4835 = vmatprep.mubr.f32.mxu0 %v5275_v53 }
 0x753   : > { %5282 = vpow2.f32 %v2983_v52  ;;  %v2965_v27 = vsub.f32 %v6333_v37, %v2912_v15  ;;  %4836 = vmatmul.mubr.f32.vlgmr.msra.gmra.mrb[16].mxu0 %v5273_v22  ;;  %v2875_v15 = vmul.f32 1.442695, %v2845_v40 }
 0x755   : > { %v5277_v21 = vpop.eup %5276  ;;  %v2987_v55 = vmul.f32 1.442695, %v2965_v27  ;;  %v2877_v27 = vmul.f32 1.442695, %v2846_v28 }
 0x756   : > { %v5279_v29 = vpop.eup %5278  ;;  %v2937_v26 = vpop.permute.xlu1 %2936  ;;  %3043 = vadd.xlane.f32.xlu0 %v5277_v21  ;;  %4838 = vmatprep.mubr.f32.mxu0 %v5277_v21 }
 0x757   : > { %5284 = vpow2.f32 %v2987_v55  ;;  %3045 = vadd.xlane.f32.xlu1 %v5279_v29  ;;  %v2970_v38 = vsub.f32 %v6335_v23, %v2937_v26  ;;  %4839 = vmatmul.mubr.f32.gmra.mrb[18].mxu0 %v5279_v29 }
 0x759   : > { %v5281_v19 = vpop.eup %5280  ;;  %v2997_v37 = vmul.f32 1.442695, %v2970_v38 }
 0x75a   : > { %v2932_v35 = vpop.permute.xlu1 %2931  ;;  %v2947_v1 = vpop.permute.xlu0 %2946 }
 0x75b   : > { %v2969_v31 = vsub.f32 %v6341_v41, %v2932_v35  ;;  %3049 = vadd.xlane.f32.xlu1 %v5281_v19  ;;  %v2972_v48 = vsub.f32 %v6343_v3, %v2947_v1 }
 0x75d   : > { %v5283_v30 = vpop.eup %5282  ;;  %v2995_v34 = vmul.f32 1.442695, %v2969_v31  ;;  %v3001_v8 = vmul.f32 1.442695, %v2972_v48 }
 0x75e   : > { %v2917_v2 = vpop.permute.xlu1 %2916  ;;  %3047 = vadd.xlane.f32.xlu0 %v5283_v30  ;;  %v2942_v4 = vpop.permute.xlu0 %2941  ;;  %4841 = vmatprep.mubr.f32.mxu0 %v5283_v30 }
 0x75f   : > { %5286 = vpow2.f32 %v2995_v34  ;;  %v2966_v7 = vsub.f32 %v6330_v59, %v2917_v2  ;;  %v2971_v23 = vsub.f32 %v6351_v45, %v2942_v4  ;;  %4842 = vmatmul.mubr.f32.gmra.mrb[20].mxu0 %v5281_v19  ;;  %v3007_v4 = vld [vmem:[#allocation7] sm:$0xff] }
 0x760   : > { %5288 = vpow2.f32 %v2997_v37  ;;  %v3008_v37 = vld [vmem:[#allocation7 + $0x8] sm:$0xff] }
 0x761   : > { %v5285_v42 = vpop.eup %5284  ;;  %v2989_v41 = vmul.f32 1.442695, %v2966_v7  ;;  %v2999_v12 = vmul.f32 1.442695, %v2971_v23  ;;  %v3024_v30 = vmul.f32 %v6517_v51, %v3008_v37  ;;  %v3023_v7 = vmul.f32 %v6524_v18, %v3007_v4  ;;  %v3009_v23 = vld [vmem:[#allocation7 + $0x10] sm:$0xff] }
 0x762   : > { %v2922_v24 = vpop.permute.xlu1 %2921  ;;  %3051 = vadd.xlane.f32.xlu0 %v5285_v42  ;;  %4844 = vmatprep.mubr.f32.mxu0 %v5285_v42 }
 0x763   : > { %5290 = vpow2.f32 %v2989_v41  ;;  %v2967_v3 = vsub.f32 %v6339_v36, %v2922_v24 }
 0x764   : > { %5292 = vpow2.f32 %v2999_v12  ;;  %v3025_v12 = vmul.f32 %v6526_v57, %v3009_v23 }
 0x765   : > { %5294 = vpow2.f32 %v3001_v8  ;;  %v2991_v16 = vmul.f32 1.442695, %v2967_v3  ;;  %v3010_v8 = vld [vmem:[#allocation7 + $0x18] sm:$0xff] }
 0x766   : > { %v2927_v32 = vpop.permute.xlu1 %2926  ;;  %v2952_v58 = vpop.permute.xlu0 %2951  ;;  %v3026_v24 = vmul.f32 %v6533_v56, %v3010_v8  ;;  %v3013_v56 = vld [vmem:[#allocation7 + $0x30] sm:$0xff] }
 0x767   : > { %5296 = vpow2.f32 %v2991_v16  ;;  %v2968_v59 = vsub.f32 %v6347_v46, %v2927_v32  ;;  %v2973_v45 = vsub.f32 %v6357_v39, %v2952_v58  ;;  %v3012_v32 = vld [vmem:[#allocation7 + $0x28] sm:$0xff] }
 0x768   : > { %v3028_v18 = vmul.f32 %v6541_v5, %v3012_v32 }
 0x769   : > { %v5287_v10 = vpop.eup %5286  ;;  %v2993_v17 = vmul.f32 1.442695, %v2968_v59  ;;  %v3003_v11 = vmul.f32 1.442695, %v2973_v45  ;;  %v3011_v59 = vld [vmem:[#allocation7 + $0x20] sm:$0xff] }
 0x76a   : > { %v5289_v44 = vpop.eup %5288  ;;  %4850 = vmatprep.mubr.f32.mxu1 %v5287_v10  ;;  %v2957_v22 = vpop.permute.xlu0 %2956  ;;  %v3027_v57 = vmul.f32 %v6535_v61, %v3011_v59  ;;  %v3104_v59 = vld [vmem:[#allocation5] sm:$0xff] }
 0x76b   : > { %5298 = vpow2.f32 %v2993_v17  ;;  %v2974_v13 = vsub.f32 %v6353_v47, %v2957_v22  ;;  %4851 = vmatmul.mubr.f32.vlgmr.msra.gmra.mrb[16].mxu1 %v5289_v44  ;;  %v6598_v26 = vpop.permute.xlu1 %3127 }
 0x76c   : > { %5300 = vpow2.f32 %v3003_v11 }
 0x76d   : > { %v5291_v36 = vpop.eup %5290  ;;  %v3005_v20 = vmul.f32 1.442695, %v2974_v13 }
 0x76e   : > { %v5293_v25 = vpop.eup %5292  ;;  %3053 = vadd.xlane.f32.xlu1 %v5291_v36  ;;  %4845 = vmatmul.mubr.f32.gmra.mrb[22].mxu0 %v5291_v36  ;;  %v6596_v29 = vpop.permute.xlu0 %3122  ;;  %v3014_v36 = vld [vmem:[#allocation7 + $0x38] sm:$0xff] }
 0x76f   : > { %v5295_v52 = vpop.eup %5294  ;;  %5302 = vpow2.f32 %v3005_v20  ;;  %4853 = vmatprep.mubr.f32.mxu1 %v5293_v25  ;;  %v6602_v50 = vpop.permute.xlu1 %3132  ;;  %v3030_v5 = vmul.f32 %v6547_v62, %v3014_v36  ;;  %v3018_v62 = vld [vmem:[#allocation7 + $0x58] sm:$0xff] }
 0x770   : > { %4854 = vmatmul.mubr.f32.gmra.mrb[18].mxu1 %v5295_v52  ;;  %5304 = vpow2.f32 %v2875_v15 }
 0x771   : > { %v5297_v46 = vpop.eup %5296  ;;  %5306 = vpow2.f32 %v2877_v27 }
 0x772   : > { %3055 = vadd.xlane.f32.xlu0 %v5297_v46  ;;  %4847 = vmatprep.mubr.f32.mxu0 %v5297_v46  ;;  %v6600_v14 = vpop.permute.xlu0 %3137 }
 0x773   : > { %v6606_v43 = vpop.permute.xlu1 %3142 }
 0x775   : > { %v5299_v39 = vpop.eup %5298 }
 0x776   : > { %v5301_v53 = vpop.eup %5300  ;;  %3059 = vadd.xlane.f32.xlu0 %v5287_v10  ;;  %3057 = vadd.xlane.f32.xlu1 %v5299_v39  ;;  %v6604_v6 = vpop.permute.xlu0 %3147 }
 0x777   : > { %4848 = vmatmul.mubr.f32.gmra.mrb[24].mxu0 %v5299_v39  ;;  %4856 = vmatprep.mubr.f32.mxu1 %v5301_v53  ;;  %v6610_v40 = vpop.permute.xlu1 %3152  ;;  %v3016_v39 = vld [vmem:[#allocation7 + $0x48] sm:$0xff] }
 0x779   : > { %v5303_v47 = vpop.eup %5302 }
 0x77a   : > { %3061 = vadd.xlane.f32.xlu1 %v5289_v44  ;;  %3063 = vadd.xlane.f32.xlu0 %v5293_v25  ;;  %v6590_v21 = vpop.eup %5304  ;;  %v6608_v28 = vpop.permute.xlu0 %3157  ;;  %v3029_v44 = vmul.f32 %v6543_v33, %v3013_v56  ;;  %v3015_v25 = vld [vmem:[#allocation7 + $0x40] sm:$0xff]  ;;  %v3032_v33 = vmul.f32 %v6555_v60, %v3016_v39  ;;  %v3021_v60 = vld [vmem:[#allocation7 + $0x70] sm:$0xff] }
 0x77b   : > { %4857 = vmatmul.mubr.f32.gmra.mrb[20].mxu1 %v5303_v47  ;;  %v6592_v55 = vpop.eup %5306  ;;  %v6614_v19 = vpop.permute.xlu1 %3162  ;;  %v3031_v61 = vmul.f32 %v6549_v0, %v3015_v25  ;;  %v3034_v0 = vmul.f32 %v6559_v63, %v3018_v62  ;;  %v3114_v39 = vld [vmem:[#allocation5 + $0x50] sm:$0xff] }
 0x77e   : > { %3065 = vadd.xlane.f32.xlu1 %v5295_v52  ;;  %3067 = vadd.xlane.f32.xlu0 %v5301_v53  ;;  %v6612_v38 = vpop.permute.xlu0 %3167  ;;  %v3017_v53 = vld [vmem:[#allocation7 + $0x50] sm:$0xff] }
 0x77f   : > { %v6618_v1 = vpop.permute.xlu1 %3172  ;;  %v3033_v15 = vmul.f32 %v6553_v9, %v3017_v53  ;;  %v3111_v53 = vld [vmem:[#allocation5 + $0x38] sm:$0xff] }
 0x780   : > { %v3207_v62 = vmul.f32 %v6608_v28, %v3111_v53 }
 0x782   : > { %3069 = vadd.xlane.f32.xlu1 %v5303_v47  ;;  %v6616_v35 = vpop.permute.xlu0 %3177 }
 0x783   : > { %v6623_v48 = vpop.permute.xlu1 %3182 }
 0x786   : > { %v6620_v31 = vpop.permute.xlu0 %3187 }
 0x793   : > { %3192 = vperm.xlu1 %5243, %v6590_v21  }
 0x794   : > { %3197 = vperm.xlu0 %5242, %v6592_v55  }
 0x7db   : > { %v3042_v34 = vpop.xlane.xlu0 %3041 }
 0x7dc   : > { %v3072_v2 = vadd.f32 %v3042_v34, %v3024_v30  ;;  %v3019_v30 = vld [vmem:[#allocation7 + $0x60] sm:$0xff] }
 0x7dd   : > { %v3035_v4 = vmul.f32 %v6561_v49, %v3019_v30  ;;  %v3116_v30 = vld [vmem:[#allocation5 + $0x60] sm:$0xff] }
 0x7de   : > { %3089 = vst.msk [vmem:[#allocation7 + $0x8] sm:$0xff] %vm3087_vm10, %v3072_v2 }
 0x7df   : > { %v3040_v42 = vpop.xlane.xlu1 %3039 }
 0x7e0   : > { %v3071_v41 = vadd.f32 %v3040_v42, %v3023_v7  ;;  %v3020_v42 = vld [vmem:[#allocation7 + $0x68] sm:$0xff] }
 0x7e2   : > { %3088 = vst.msk [vmem:[#allocation7] sm:$0xff] %vm3087_vm10, %v3071_v41  ;;  %v3036_v41 = vmul.f32 %v6565_v54, %v3020_v42 }
 0x7e3   : > { %v3044_v51 = vpop.xlane.xlu0 %3043 }
 0x7e4   : > { %v3046_v3 = vpop.xlane.xlu1 %3045  ;;  %v3073_v16 = vadd.f32 %v3044_v51, %v3025_v12  ;;  %v3037_v12 = vmul.f32 %v6590_v21, %v3021_v60  ;;  %v3200_v21 = vmul.f32 %v6596_v29, %v3104_v59  ;;  %v3108_v29 = vld [vmem:[#allocation5 + $0x20] sm:$0xff] }
 0x7e5   : > { %v3074_v58 = vadd.f32 %v3046_v3, %v3026_v24  ;;  %v3022_v3 = vld [vmem:[#allocation7 + $0x78] sm:$0xff] }
 0x7e6   : > { %3090 = vst.msk [vmem:[#allocation7 + $0x10] sm:$0xff] %vm3087_vm10, %v3073_v16  ;;  %v3038_v49 = vmul.f32 %v6592_v55, %v3022_v3 }
 0x7e7   : > { %3091 = vst.msk [vmem:[#allocation7 + $0x18] sm:$0xff] %vm3087_vm10, %v3074_v58 }
 0x7e8   : > { %v3050_v45 = vpop.xlane.xlu1 %3049 }
 0x7e9   : > { %v3076_v10 = vadd.f32 %v3050_v45, %v3028_v18  ;;  %v3105_v18 = vld [vmem:[#allocation5 + $0x8] sm:$0xff]  ;;  %v3107_v45 = vld [vmem:[#allocation5 + $0x18] sm:$0xff] }
 0x7ea   : > { %v3201_v54 = vmul.f32 %v6598_v26, %v3105_v18 }
 0x7eb   : > { %3093 = vst.msk [vmem:[#allocation7 + $0x28] sm:$0xff] %vm3087_vm10, %v3076_v10  ;;  %v3048_v17 = vpop.xlane.xlu0 %3047 }
 0x7ec   : > { %v3075_v11 = vadd.f32 %v3048_v17, %v3027_v57  ;;  %v3106_v57 = vld [vmem:[#allocation5 + $0x10] sm:$0xff] }
 0x7ed   : > { %v3202_v55 = vmul.f32 %v6602_v50, %v3106_v57  ;;  %v3430_v57 = vld [vmem:[#allocation7 + $0x8] sm:$0xff] (!%p4357_p2) }
 0x7ee   : > { %3092 = vst.msk [vmem:[#allocation7 + $0x20] sm:$0xff] %vm3087_vm10, %v3075_v11 }
 0x7ef   : > { %v3052_v22 = vpop.xlane.xlu0 %3051 }
 0x7f0   : > { %v3077_v13 = vadd.f32 %v3052_v22, %v3029_v44  ;;  %v3203_v44 = vmul.f32 %v6600_v14, %v3107_v45  ;;  %v3204_v14 = vmul.f32 %v6606_v43, %v3108_v29  ;;  %v3432_v45 = vld [vmem:[#allocation7 + $0x18] sm:$0xff] (!%p4357_p2) }
 0x7f2   : > { %3094 = vst.msk [vmem:[#allocation7 + $0x30] sm:$0xff] %vm3087_vm10, %v3077_v13 }
 0x7fb   : > { %v3054_v20 = vpop.xlane.xlu1 %3053 }
 0x7fc   : > { %v3078_v52 = vadd.f32 %v3054_v20, %v3030_v5  ;;  %v3109_v5 = vld [vmem:[#allocation5 + $0x28] sm:$0xff] }
 0x7fd   : > { %v3205_v20 = vmul.f32 %v6604_v6, %v3109_v5  ;;  %v3117_v6 = vld [vmem:[#allocation5 + $0x68] sm:$0xff]  ;;  %v3435_v5 = vld [vmem:[#allocation7 + $0x30] sm:$0xff] (!%p4357_p2) }
 0x7fe   : > { %3095 = vst.msk [vmem:[#allocation7 + $0x38] sm:$0xff] %vm3087_vm10, %v3078_v52 }
 0x7ff   : > { %v3056_v46 = vpop.xlane.xlu0 %3055 }
 0x800   : > { %v3079_v47 = vadd.f32 %v3056_v46, %v3031_v61  ;;  %v3115_v46 = vld [vmem:[#allocation5 + $0x58] sm:$0xff] }
 0x802   : > { %3096 = vst.msk [vmem:[#allocation7 + $0x40] sm:$0xff] %vm3087_vm10, %v3079_v47  ;;  %v3211_v47 = vmul.f32 %v6616_v35, %v3115_v46  ;;  %v3560_v46 = vld [vmem:[%s6914_s12 + $0x18] sm:$0xff] (!%p4357_p2) }
 0x803   : > { %v3058_v27 = vpop.xlane.xlu1 %3057  ;;  %v3060_v37 = vpop.xlane.xlu0 %3059 }
 0x804   : > { %v3080_v34 = vadd.f32 %v3058_v27, %v3032_v33  ;;  %v3081_v2 = vadd.f32 %v3060_v37, %v3033_v15  ;;  %v3110_v33 = vld [vmem:[#allocation5 + $0x30] sm:$0xff]  ;;  %v3210_v15 = vmul.f32 %v6618_v1, %v3114_v39  ;;  %v3212_v1 = vmul.f32 %v6623_v48, %v3116_v30  ;;  %v3119_v48 = vld [vmem:[#allocation5 + $0x78] sm:$0xff] }
 0x806   : > { %3097 = vst.msk [vmem:[#allocation7 + $0x48] sm:$0xff] %vm3087_vm10, %v3080_v34  ;;  %3098 = vst.msk [vmem:[#allocation7 + $0x50] sm:$0xff] %vm3087_vm10, %v3081_v2  ;;  %v3206_v2 = vmul.f32 %v6610_v40, %v3110_v33 }
 0x807   : > { %v3062_v7 = vpop.xlane.xlu1 %3061  ;;  %v3064_v23 = vpop.xlane.xlu0 %3063 }
 0x808   : > { %v3082_v8 = vadd.f32 %v3062_v7, %v3034_v0  ;;  %v3083_v9 = vadd.f32 %v3064_v23, %v3035_v4  ;;  %v3213_v4 = vmul.f32 %v6620_v31, %v3117_v6 }
 0x809   : > { %v3437_v53 = vld [vmem:[#allocation7 + $0x40] sm:$0xff] (!%p4357_p2) }
 0x80a   : > { %3099 = vst.msk [vmem:[#allocation7 + $0x58] sm:$0xff] %vm3087_vm10, %v3082_v8  ;;  %3100 = vst.msk [vmem:[#allocation7 + $0x60] sm:$0xff] %vm3087_vm10, %v3083_v9  ;;  %v3113_v8 = vld [vmem:[#allocation5 + $0x48] sm:$0xff]  ;;  %v3112_v9 = vld [vmem:[#allocation5 + $0x40] sm:$0xff] }
 0x80b   : > { %v3066_v24 = vpop.xlane.xlu1 %3065  ;;  %v3068_v51 = vpop.xlane.xlu0 %3067  ;;  %v3209_v31 = vmul.f32 %v6612_v38, %v3113_v8 }
 0x80c   : > { %v3084_v63 = vadd.f32 %v3066_v24, %v3036_v41  ;;  %v3085_v16 = vadd.f32 %v3068_v51, %v3037_v12  ;;  %v3208_v41 = vmul.f32 %v6614_v19, %v3112_v9  ;;  %v3118_v51 = vld [vmem:[#allocation5 + $0x70] sm:$0xff]  ;;  %v3568_v9 = vld [vmem:[#allocation3 + $0x38] sm:$0xff] (!%p4357_p2) }
 0x80d   : > { %v3431_v19 = vld [vmem:[#allocation7 + $0x10] sm:$0xff] (!%p4357_p2) }
 0x80e   : > { %3101 = vst.msk [vmem:[#allocation7 + $0x68] sm:$0xff] %vm3087_vm10, %v3084_v63  ;;  %3102 = vst.msk [vmem:[#allocation7 + $0x70] sm:$0xff] %vm3087_vm10, %v3085_v16  ;;  %5310 = vrcp.f32 (!%p4357_p2), %v3431_v19 }
 0x80f   : > { %v3070_v32 = vpop.xlane.xlu1 %3069 }
 0x810   : > { %v3086_v58 = vadd.f32 %v3070_v32, %v3038_v49 }
 0x812   : > { %3103 = vst.msk [vmem:[#allocation7 + $0x78] sm:$0xff] %vm3087_vm10, %v3086_v58 }
 0x813   : > { %v3198_v12 = vpop.permute.xlu0 %3197  ;;  %v3193_v3 = vpop.permute.xlu1 %3192 }
 0x814   : > { %v3215_v32 = vmul.f32 %v3198_v12, %v3119_v48  ;;  %v3214_v58 = vmul.f32 %v3193_v3, %v3118_v51  ;;  %v3570_v12 = vld [vmem:[#allocation3 + $0x48] sm:$0xff] (!%p4357_p2)  ;;  %v3571_v51 = vld [vmem:[#allocation3 + $0x50] sm:$0xff] (!%p4357_p2) }
 0x815   : > { %v3442_v30 = vld [vmem:[#allocation7 + $0x68] sm:$0xff] (!%p4357_p2) }
 0x818   : > { %v5311_v29 = vpop.eup (!%p4357_p2), %5310 }
 0x826   : > { %v4837_v10 = vpop.f32.mrb[16].mxu0 }
 0x827   : > { %v3362_v17 = vadd.f32 %v4837_v10, %v3201_v54  ;;  %v3282_v56 = vpop.f32.mrb[17].mxu0  ;;  %v5422_v10 = vmov (!%p4357_p2), 0  }
 0x828   : > { %v3361_v11 = vadd.f32 %v3282_v56, %v3200_v21  ;;  %v3429_v21 = vld [vmem:[#allocation7] sm:$0xff] (!%p4357_p2)  ;;  %5309 = vset.pattern.permute.xlu1 (!%p4357_p2), %v5422_v10  ;;  %5308 = vset.pattern.permute.xlu0 (!%p4357_p2), %v5422_v10 }
 0x829   : > { %3378 = vst.msk [vmem:[#allocation5 + $0x8] sm:$0xff] %vm2573_vm8, %v3362_v17  ;;  %5312 = vrcp.f32 (!%p4357_p2), %v3429_v21  ;;  %v3434_v17 = vld [vmem:[#allocation7 + $0x28] sm:$0xff] (!%p4357_p2)  ;;  %v3433_v56 = vld [vmem:[#allocation7 + $0x20] sm:$0xff] (!%p4357_p2)  ;;  %3473 = vperm.xlu1 (!%p4357_p2), %5309, %v5311_v29  }
 0x82a   : > { %3377 = vst.msk [vmem:[#allocation5] sm:$0xff] %vm2573_vm8, %v3361_v11  ;;  %v4840_v22 = vpop.f32.mrb[18].mxu0  ;;  %5314 = vrcp.f32 (!%p4357_p2), %v3432_v45  ;;  %v3577_v11 = vld [vmem:[%s6912_s18] sm:$0xff] (!%p4357_p2) }
 0x82b   : > { %v3364_v13 = vadd.f32 %v4840_v22, %v3203_v44  ;;  %v3292_v36 = vpop.f32.mrb[19].mxu0  ;;  %5316 = vrcp.f32 (!%p4357_p2), %v3430_v57  ;;  %v3578_v44 = vld [vmem:[%s6912_s18 + $0x8] sm:$0xff] (!%p4357_p2)  ;;  %v3557_v22 = vld [vmem:[%s6913_s1] sm:$0xff] (!%p4357_p2) }
 0x82c   : > { %v3363_v26 = vadd.f32 %v3292_v36, %v3202_v55  ;;  %v4983_v55 = vpack.c.bf16 (!%p4357_p2), %v3578_v44, %v3577_v11  ;;  %5318 = vrcp.f32 (!%p4357_p2), %v3434_v17 }
 0x82d   : > { %3380 = vst.msk [vmem:[#allocation5 + $0x18] sm:$0xff] %vm2573_vm8, %v3364_v13  ;;  %v3558_v13 = vld [vmem:[%s6914_s12 + $0x8] sm:$0xff] (!%p4357_p2)  ;;  %5320 = vrcp.f32 (!%p4357_p2), %v3433_v56 }
 0x82e   : > { %3379 = vst.msk [vmem:[#allocation5 + $0x10] sm:$0xff] %vm2573_vm8, %v3363_v26  ;;  %v4991_v36 = vpack.c.bf16 (!%p4357_p2), %v3558_v13, %v3557_v22  ;;  %v3436_v26 = vld [vmem:[#allocation7 + $0x38] sm:$0xff] (!%p4357_p2)  ;;  %4984 = vmatprep.subr.bf16.mxu1 (!%p4357_p2), %v4983_v55 }
 0x82f   : > { %4986 = vmatpush3.bf16.msra.mxu1 (!%p4357_p2), %v4983_v55  ;;  %5322 = vrcp.f32 (!%p4357_p2), %v3436_v26 }
 0x830   : > { %4992 = vmatprep.subr.bf16.mxu0 (!%p4357_p2), %v4991_v36  ;;  %5324 = vrcp.f32 (!%p4357_p2), %v3435_v5  ;;  %v3414_v45 = vld [vmem:[#allocation5 + $0x8] sm:$0xff] (!%p4357_p2) }
 0x831   : > { %4994 = vmatpush3.bf16.msra.mxu0 (!%p4357_p2), %v4991_v36 }
 0x832   : > { %v4843_v25 = vpop.f32.mrb[20].mxu0 }
 0x833   : > { %v3366_v52 = vadd.f32 %v4843_v25, %v3205_v20  ;;  %v3302_v61 = vpop.f32.mrb[21].mxu0  ;;  %v3579_v20 = vld [vmem:[%s6912_s18 + $0x10] sm:$0xff] (!%p4357_p2)  ;;  %v5313_v25 = vpop.eup (!%p4357_p2), %5312 }
 0x834   : > { %v3365_v50 = vadd.f32 %v3302_v61, %v3204_v14  ;;  %v3580_v14 = vld [vmem:[%s6912_s18 + $0x18] sm:$0xff] (!%p4357_p2)  ;;  %v5315_v39 = vpop.eup (!%p4357_p2), %5314  ;;  %3463 = vperm.xlu0 (!%p4357_p2), %5308, %v5313_v25  }
 0x835   : > { %3382 = vst.msk [vmem:[#allocation5 + $0x28] sm:$0xff] %vm2573_vm8, %v3366_v52  ;;  %v3438_v52 = vld [vmem:[#allocation7 + $0x48] sm:$0xff] (!%p4357_p2)  ;;  %v4987_v61 = vpack.c.bf16 (!%p4357_p2), %v3580_v14, %v3579_v20  ;;  %v5317_v33 = vpop.eup (!%p4357_p2), %5316  ;;  %3478 = vperm.xlu1 (!%p4357_p2), %5309, %v5315_v39   ;;  %v3415_v19 = vld [vmem:[#allocation5 + $0x10] sm:$0xff] (!%p4357_p2)  ;;  %v3416_v11 = vld [vmem:[#allocation5 + $0x18] sm:$0xff] (!%p4357_p2) }
 0x836   : > { %3381 = vst.msk [vmem:[#allocation5 + $0x20] sm:$0xff] %vm2573_vm8, %v3365_v50  ;;  %v3559_v50 = vld [vmem:[%s6914_s12 + $0x10] sm:$0xff] (!%p4357_p2)  ;;  %5326 = vrcp.f32 (!%p4357_p2), %v3438_v52  ;;  %v5319_v6 = vpop.eup (!%p4357_p2), %5318 }
 0x837   : > { %4988 = vmatprep.subr.bf16.mxu1 (!%p4357_p2), %v4987_v61  ;;  %5328 = vrcp.f32 (!%p4357_p2), %v3437_v53 }
 0x838   : > { %4990 = vmatpush3.bf16.msra.mxu1 (!%p4357_p2), %v4987_v61  ;;  %3468 = vperm.xlu0 (!%p4357_p2), %5308, %v5317_v33  }
 0x839   : > { %3488 = vperm.xlu1 (!%p4357_p2), %5309, %v5319_v6  }
 0x83c   : > { %v3418_v26 = vld [vmem:[#allocation5 + $0x28] sm:$0xff] (!%p4357_p2) }
 0x83d   : > { %v3417_v44 = vld [vmem:[#allocation5 + $0x20] sm:$0xff] (!%p4357_p2) }
 0x83e   : > { %v4852_v27 = vpop.f32.mrb[16].mxu1 }
 0x83f   : > { %v3372_v37 = vadd.f32 %v4852_v27, %v3211_v47  ;;  %v3332_v43 = vpop.f32.mrb[17].mxu1  ;;  %v4995_v47 = vpack.c.bf16 (!%p4357_p2), %v3560_v46, %v3559_v50  ;;  %v3561_v27 = vld [vmem:[#allocation3] sm:$0xff] (!%p4357_p2) }
 0x840   : > { %v3371_v34 = vadd.f32 %v3332_v43, %v3210_v15  ;;  %v3440_v15 = vld [vmem:[#allocation7 + $0x58] sm:$0xff] (!%p4357_p2)  ;;  %4867 = vmatprep.mubr.msk.f32.mxu1 (!%p4357_p2), %vm2573_vm8, %v3561_v27  ;;  %v3562_v43 = vld [vmem:[#allocation3 + $0x8] sm:$0xff] (!%p4357_p2) }
 0x841   : > { %3388 = vst.msk [vmem:[#allocation5 + $0x58] sm:$0xff] %vm2573_vm8, %v3372_v37  ;;  %v4846_v0 = vpop.f32.mrb[22].mxu0  ;;  %4996 = vmatprep.subr.bf16.mxu0 (!%p4357_p2), %v4995_v47  ;;  %v3439_v37 = vld [vmem:[#allocation7 + $0x50] sm:$0xff] (!%p4357_p2)  ;;  %4868 = vmatmul.mubr.msk.f32.vlgmr.msra.gmra.mrb[0].mxu1 (!%p4357_p2), %vm2573_vm8, %v3562_v43  ;;  %5330 = vrcp.f32 (!%p4357_p2), %v3440_v15 }
 0x842   : > { %3387 = vst.msk [vmem:[#allocation5 + $0x50] sm:$0xff] %vm2573_vm8, %v3371_v34  ;;  %v3368_v35 = vadd.f32 %v4846_v0, %v3207_v62  ;;  %v3312_v7 = vpop.f32.mrb[23].mxu0  ;;  %4998 = vmatpush3.bf16.msra.mxu0 (!%p4357_p2), %v4995_v47  ;;  %v5321_v62 = vpop.eup (!%p4357_p2), %5320  ;;  %5332 = vrcp.f32 (!%p4357_p2), %v3439_v37  ;;  %v3563_v34 = vld [vmem:[#allocation3 + $0x10] sm:$0xff] (!%p4357_p2)  ;;  %v3441_v0 = vld [vmem:[#allocation7 + $0x60] sm:$0xff] (!%p4357_p2) }
 0x843   : > { %v3367_v23 = vadd.f32 %v3312_v7, %v3206_v2  ;;  %v4855_v42 = vpop.f32.mrb[18].mxu1  ;;  %v5323_v2 = vpop.eup (!%p4357_p2), %5322  ;;  %3483 = vperm.xlu0 (!%p4357_p2), %5308, %v5321_v62   ;;  %4870 = vmatprep.mubr.msk.f32.mxu1 (!%p4357_p2), %vm2573_vm8, %v3563_v34  ;;  %5334 = vrcp.f32 (!%p4357_p2), %v3442_v30  ;;  %v3444_v7 = vld [vmem:[#allocation7 + $0x78] sm:$0xff] (!%p4357_p2) }
 0x844   : > { %3384 = vst.msk [vmem:[#allocation5 + $0x38] sm:$0xff] %vm2573_vm8, %v3368_v35  ;;  %v3374_v28 = vadd.f32 %v4855_v42, %v3213_v4  ;;  %v3342_v60 = vpop.f32.mrb[19].mxu1  ;;  %v3564_v4 = vld [vmem:[#allocation3 + $0x18] sm:$0xff] (!%p4357_p2)  ;;  %v5325_v35 = vpop.eup (!%p4357_p2), %5324  ;;  %3498 = vperm.xlu1 (!%p4357_p2), %5309, %v5323_v2   ;;  %5336 = vrcp.f32 (!%p4357_p2), %v3441_v0  ;;  %v3443_v42 = vld [vmem:[#allocation7 + $0x70] sm:$0xff] (!%p4357_p2) }
 0x845   : > { %3383 = vst.msk [vmem:[#allocation5 + $0x30] sm:$0xff] %vm2573_vm8, %v3367_v23  ;;  %v3373_v40 = vadd.f32 %v3342_v60, %v3212_v1  ;;  %4871 = vmatmul.mubr.msk.f32.gmra.mrb[2].mxu1 (!%p4357_p2), %vm2573_vm8, %v3564_v4  ;;  %v3565_v1 = vld [vmem:[#allocation3 + $0x20] sm:$0xff] (!%p4357_p2)  ;;  %v5327_v23 = vpop.eup (!%p4357_p2), %5326  ;;  %5338 = vrcp.f32 (!%p4357_p2), %v3444_v7 }
 0x846   : > { %3390 = vst.msk [vmem:[#allocation5 + $0x68] sm:$0xff] %vm2573_vm8, %v3374_v28  ;;  %4873 = vmatprep.mubr.msk.f32.mxu1 (!%p4357_p2), %vm2573_vm8, %v3565_v1  ;;  %v3566_v28 = vld [vmem:[#allocation3 + $0x28] sm:$0xff] (!%p4357_p2)  ;;  %v5329_v60 = vpop.eup (!%p4357_p2), %5328  ;;  %5340 = vrcp.f32 (!%p4357_p2), %v3443_v42 }
 0x847   : > { %3389 = vst.msk [vmem:[#allocation5 + $0x60] sm:$0xff] %vm2573_vm8, %v3373_v40  ;;  %3493 = vperm.xlu0 (!%p4357_p2), %5308, %v5325_v35   ;;  %v3567_v40 = vld [vmem:[#allocation3 + $0x30] sm:$0xff] (!%p4357_p2) }
 0x848   : > { %3508 = vperm.xlu1 (!%p4357_p2), %5309, %v5327_v23   ;;  %v3424_v43 = vld [vmem:[#allocation5 + $0x58] sm:$0xff] (!%p4357_p2) }
 0x849   : > { %4874 = vmatmul.mubr.msk.f32.gmra.mrb[4].mxu1 (!%p4357_p2), %vm2573_vm8, %v3566_v28  ;;  %v3423_v33 = vld [vmem:[#allocation5 + $0x50] sm:$0xff] (!%p4357_p2) }
 0x84a   : > { %v4849_v24 = vpop.f32.mrb[24].mxu0  ;;  %4876 = vmatprep.mubr.msk.f32.mxu1 (!%p4357_p2), %vm2573_vm8, %v3567_v40 }
 0x84b   : > { %v3370_v63 = vadd.f32 %v4849_v24, %v3209_v31  ;;  %v3322_v16 = vpop.f32.mrb[25].mxu0  ;;  %v5331_v8 = vpop.eup (!%p4357_p2), %5330  ;;  %3503 = vperm.xlu0 (!%p4357_p2), %5308, %v5329_v60   ;;  %v3420_v52 = vld [vmem:[#allocation5 + $0x38] sm:$0xff] (!%p4357_p2) }
 0x84c   : > { %v3369_v49 = vadd.f32 %v3322_v16, %v3208_v41  ;;  %3412 = sbr.rel (%p4357_p2) target bundleno = 2488 (0x9b8), region = 142  ;;  %v5333_v31 = vpop.eup (!%p4357_p2), %5332  ;;  %3518 = vperm.xlu1 (!%p4357_p2), %5309, %v5331_v8   ;;  %v3569_v41 = vld [vmem:[#allocation3 + $0x40] sm:$0xff] (!%p4357_p2)  ;;  %v3419_v5 = vld [vmem:[#allocation5 + $0x30] sm:$0xff] (!%p4357_p2) }
 0x84d   : > { %3386 = vst.msk [vmem:[#allocation5 + $0x48] sm:$0xff] %vm2573_vm8, %v3370_v63  ;;  %4877 = vmatmul.mubr.msk.f32.gmra.mrb[6].mxu1 (!%p4357_p2), %vm2573_vm8, %v3568_v9  ;;  %v5335_v48 = vpop.eup (!%p4357_p2), %5334  ;;  %v3572_v63 = vld [vmem:[#allocation3 + $0x58] sm:$0xff] (!%p4357_p2)  ;;  %v3426_v4 = vld [vmem:[#allocation5 + $0x68] sm:$0xff] (!%p4357_p2) }
 0x84e   : > { %3385 = vst.msk [vmem:[#allocation5 + $0x40] sm:$0xff] %vm2573_vm8, %v3369_v49  ;;  %v4858_v18 = vpop.f32.mrb[20].mxu1  ;;  %4879 = vmatprep.mubr.msk.f32.mxu1 (!%p4357_p2), %vm2573_vm8, %v3569_v41  ;;  %v5337_v24 = vpop.eup (!%p4357_p2), %5336  ;;  %v3573_v49 = vld [vmem:[#allocation3 + $0x60] sm:$0xff] (!%p4357_p2) }
 0x84f   : > { %v3376_v59 = vadd.f32 %v4858_v18, %v3215_v32  ;;  %v3352_v54 = vpop.f32.mrb[21].mxu1  ;;  %3513 = vperm.xlu0 (!%p4357_p2), %5308, %v5333_v31   ;;  %v5339_v3 = vpop.eup (!%p4357_p2), %5338  ;;  %v3574_v32 = vld [vmem:[#allocation3 + $0x68] sm:$0xff] (!%p4357_p2)  ;;  %v3576_v18 = vld [vmem:[#allocation3 + $0x78] sm:$0xff] (!%p4357_p2)  ;;  %v3425_v62 = vld [vmem:[#allocation5 + $0x60] sm:$0xff] (!%p4357_p2) }
 0x850   : > { %v3375_v38 = vadd.f32 %v3352_v54, %v3214_v58  ;;  %3528 = vperm.xlu1 (!%p4357_p2), %5309, %v5335_v48   ;;  %v5341_v16 = vpop.eup (!%p4357_p2), %5340  ;;  %v3575_v58 = vld [vmem:[#allocation3 + $0x70] sm:$0xff] (!%p4357_p2) }
 0x851   : > { %3392 = vst.msk [vmem:[#allocation5 + $0x78] sm:$0xff] %vm2573_vm8, %v3376_v59  ;;  %4880 = vmatmul.mubr.msk.f32.gmra.mrb[8].mxu1 (!%p4357_p2), %vm2573_vm8, %v3570_v12  ;;  %v3413_v59 = vld [vmem:[#allocation5] sm:$0xff] (!%p4357_p2) }
 0x852   : > { %3391 = vst.msk [vmem:[#allocation5 + $0x70] sm:$0xff] %vm2573_vm8, %v3375_v38  ;;  %4882 = vmatprep.mubr.msk.f32.mxu1 (!%p4357_p2), %vm2573_vm8, %v3571_v51 }
 0x853   : > { %3523 = vperm.xlu0 %5308, %v5337_v24  }
 0x854   : > { %3538 = vperm.xlu1 %5309, %v5339_v3   ;;  %v3422_v47 = vld [vmem:[#allocation5 + $0x48] sm:$0xff] }
 0x855   : > { %4883 = vmatmul.mubr.msk.f32.gmra.mrb[10].mxu1 %vm2573_vm8, %v3572_v63  ;;  %v3421_v61 = vld [vmem:[#allocation5 + $0x40] sm:$0xff] }
 0x856   : > { %4885 = vmatprep.mubr.msk.f32.mxu1 %vm2573_vm8, %v3573_v49 }
 0x857   : > { %3533 = vperm.xlu0 %5308, %v5341_v16  }
 0x858   : > { %v3428_v28 = vld [vmem:[#allocation5 + $0x78] sm:$0xff] }
 0x859   : > { %4886 = vmatmul.mubr.msk.f32.gmra.mrb[12].mxu1 %vm2573_vm8, %v3574_v32  ;;  %v3427_v35 = vld [vmem:[#allocation5 + $0x70] sm:$0xff] }
 0x85a   : > { %4888 = vmatprep.mubr.msk.f32.mxu1 %vm2573_vm8, %v3575_v58 }
 0x85d   : > { %4889 = vmatmul.mubr.msk.f32.gmra.mrb[14].mxu1 %vm2573_vm8, %v3576_v18 }
 0x8a8   : > { %v3474_v54 = vpop.permute.xlu1 %3473 }
 0x8a9   : > { %v3543_v57 = vmul.f32 %v3474_v54, %v3415_v19  ;;  %v6760_v54 = vld [vmem:[%s6915_s7] ss:$0 sm:$0xff] }
 0x8b3   : > { %v3464_v38 = vpop.permute.xlu0 %3463 }
 0x8b4   : > { %v3541_v21 = vmul.f32 %v3464_v38, %v3413_v59  ;;  %v3479_v10 = vpop.permute.xlu1 %3478 }
 0x8b5   : > { %v3544_v13 = vmul.f32 %v3479_v10, %v3416_v11  ;;  %v4007_v10 = vld [vmem:[#allocation4 + $0x8] sm:$0xff]  ;;  %v4006_v11 = vld [vmem:[#allocation4] sm:$0xff] }
 0x8b6   : > { %4899 = vmatprep.mubr.msk.f32.mxu0 %vm2573_vm8, %v3541_v21 }
 0x8b7   : > { %v3469_v17 = vpop.permute.xlu0 %3468 }
 0x8b8   : > { %v3542_v56 = vmul.f32 %v3469_v17, %v3414_v45  ;;  %v3489_v55 = vpop.permute.xlu1 %3488 }
 0x8b9   : > { %v3546_v14 = vmul.f32 %v3489_v55, %v3418_v26 }
 0x8ba   : > { %4900 = vmatmul.mubr.msk.f32.vlgmr.msra.gmra.mrb[0].mxu0 %vm2573_vm8, %v3542_v56 }
 0x8bb   : > { %4902 = vmatprep.mubr.msk.f32.mxu0 %vm2573_vm8, %v3543_v57 }
 0x8be   : > { %4903 = vmatmul.mubr.msk.f32.gmra.mrb[2].mxu0 %vm2573_vm8, %v3544_v13 }
 0x8c2   : > { %v3484_v22 = vpop.permute.xlu0 %3483 }
 0x8c3   : > { %v3545_v36 = vmul.f32 %v3484_v22, %v3417_v44  ;;  %v3499_v29 = vpop.permute.xlu1 %3498 }
 0x8c4   : > { %v3548_v39 = vmul.f32 %v3499_v29, %v3420_v52  ;;  %v4009_v29 = vld [vmem:[#allocation4 + $0x18] sm:$0xff]  ;;  %v4008_v52 = vld [vmem:[#allocation4 + $0x10] sm:$0xff] }
 0x8c5   : > { %4905 = vmatprep.mubr.msk.f32.mxu0 %vm2573_vm8, %v3545_v36 }
 0x8c6   : > { %v3494_v20 = vpop.permute.xlu0 %3493  ;;  %4906 = vmatmul.mubr.msk.f32.gmra.mrb[4].mxu0 %vm2573_vm8, %v3546_v14 }
 0x8c7   : > { %v3547_v25 = vmul.f32 %v3494_v20, %v3419_v5  ;;  %v3509_v50 = vpop.permute.xlu1 %3508 }
 0x8c8   : > { %v3550_v6 = vmul.f32 %v3509_v50, %v3422_v47 }
 0x8c9   : > { %4908 = vmatprep.mubr.msk.f32.mxu0 %vm2573_vm8, %v3547_v25 }
 0x8ca   : > { %v3504_v46 = vpop.permute.xlu0 %3503  ;;  %4909 = vmatmul.mubr.msk.f32.gmra.mrb[6].mxu0 %vm2573_vm8, %v3548_v39 }
 0x8cb   : > { %v3549_v53 = vmul.f32 %v3504_v46, %v3421_v61  ;;  %v3519_v15 = vpop.permute.xlu1 %3518 }
 0x8cc   : > { %v3552_v2 = vmul.f32 %v3519_v15, %v3424_v43  ;;  %v4011_v15 = vld [vmem:[#allocation4 + $0x28] sm:$0xff]  ;;  %v4010_v43 = vld [vmem:[#allocation4 + $0x20] sm:$0xff] }
 0x8cd   : > { %4911 = vmatprep.mubr.msk.f32.mxu0 %vm2573_vm8, %v3549_v53 }
 0x8ce   : > { %v3514_v27 = vpop.permute.xlu0 %3513  ;;  %4912 = vmatmul.mubr.msk.f32.gmra.mrb[8].mxu0 %vm2573_vm8, %v3550_v6 }
 0x8cf   : > { %v3551_v37 = vmul.f32 %v3514_v27, %v3423_v33  ;;  %v3529_v30 = vpop.permute.xlu1 %3528 }
 0x8d0   : > { %v3554_v1 = vmul.f32 %v3529_v30, %v3426_v4 }
 0x8d1   : > { %4914 = vmatprep.mubr.msk.f32.mxu0 %vm2573_vm8, %v3551_v37 }
 0x8d2   : > { %v3524_v34 = vpop.permute.xlu0 %3523  ;;  %4915 = vmatmul.mubr.msk.f32.gmra.mrb[10].mxu0 %vm2573_vm8, %v3552_v2 }
 0x8d3   : > { %v3553_v0 = vmul.f32 %v3524_v34, %v3425_v62  ;;  %v3539_v42 = vpop.permute.xlu1 %3538 }
 0x8d4   : > { %v3556_v60 = vmul.f32 %v3539_v42, %v3428_v28  ;;  %v4012_v28 = vld [vmem:[#allocation4 + $0x30] sm:$0xff] }
 0x8d5   : > { %4917 = vmatprep.mubr.msk.f32.mxu0 %vm2573_vm8, %v3553_v0 }
 0x8d6   : > { %v3534_v7 = vpop.permute.xlu0 %3533  ;;  %4918 = vmatmul.mubr.msk.f32.gmra.mrb[12].mxu0 %vm2573_vm8, %v3554_v1 }
 0x8d7   : > { %v3555_v23 = vmul.f32 %v3534_v7, %v3427_v35  ;;  %v4013_v7 = vld [vmem:[#allocation4 + $0x38] sm:$0xff] }
 0x8d9   : > { %4920 = vmatprep.mubr.msk.f32.mxu0 %vm2573_vm8, %v3555_v23 }
 0x8da   : > { %4921 = vmatmul.mubr.msk.f32.gmra.mrb[14].mxu0 %vm2573_vm8, %v3556_v60 }
 0x914   : > { %v4869_v40 = vpop.f32.mrb[0].mxu1 }
 0x915   : > { %v3695_v8 = vpop.f32.mrb[1].mxu1 }
 0x918   : > { %v4872_v9 = vpop.f32.mrb[2].mxu1 }
 0x919   : > { %v3705_v31 = vpop.f32.mrb[3].mxu1 }
 0x91c   : > { %v4875_v41 = vpop.f32.mrb[4].mxu1 }
 0x91d   : > { %v3715_v48 = vpop.f32.mrb[5].mxu1 }
 0x920   : > { %v4878_v12 = vpop.f32.mrb[6].mxu1 }
 0x921   : > { %v3725_v24 = vpop.f32.mrb[7].mxu1 }
 0x924   : > { %v4881_v51 = vpop.f32.mrb[8].mxu1 }
 0x925   : > { %v6743_v3 = vpop.f32.mrb[9].mxu1 }
 0x928   : > { %v6745_v63 = vpop.f32.mrb[10].mxu1 }
 0x929   : > { %v6747_v16 = vpop.f32.mrb[11].mxu1 }
 0x92c   : > { %v6749_v49 = vpop.f32.mrb[12].mxu1 }
 0x92d   : > { %v6751_v32 = vpop.f32.mrb[13].mxu1 }
 0x930   : > { %v6753_v58 = vpop.f32.mrb[14].mxu1 }
 0x931   : > { %v6755_v18 = vpop.f32.mrb[15].mxu1 }
 0x98d   : > { %v4901_v59 = vpop.f32.mrb[0].mxu0 }
 0x98e   : > { %v3894_v38 = vadd.f32 %v4901_v59, %v4869_v40  ;;  %v3888_v19 = vpop.f32.mrb[1].mxu0 }
 0x98f   : > { %v3889_v21 = vadd.f32 %v3888_v19, %v3695_v8 }
 0x990   : > { %v3975_v45 = vadd.f32 %v6760_v54, %v3894_v38 }
 0x991   : > { %v3974_v57 = vadd.f32 %v6760_v54, %v3889_v21  ;;  %v4904_v17 = vpop.f32.mrb[2].mxu0 }
 0x992   : > { %v3991_v56 = vmax.f32 %v3975_v45, 0.0  ;;  %v3904_v44 = vadd.f32 %v4904_v17, %v4872_v9  ;;  %v3898_v55 = vpop.f32.mrb[3].mxu0 }
 0x993   : > { %v3990_v22 = vmax.f32 %v3974_v57, 0.0  ;;  %v3899_v13 = vadd.f32 %v3898_v55, %v3705_v31 }
 0x994   : > { %v4023_v36 = vadd.f32 %v4007_v10, %v3991_v56  ;;  %v3977_v26 = vadd.f32 %v6760_v54, %v3904_v44  ;;  %v4017_v56 = vld [vmem:[#allocation4 + $0x58] sm:$0xff] }
 0x995   : > { %v4022_v5 = vadd.f32 %v4006_v11, %v3990_v22  ;;  %v3976_v20 = vadd.f32 %v6760_v54, %v3899_v13 }
 0x996   : > { %4039 = vst.msk [vmem:[%s5623_s11 + $0x8] sm:$0xff] %vm2573_vm8, %v4023_v36  ;;  %v3993_v25 = vmax.f32 %v3977_v26, 0.0 }
 0x997   : > { %4038 = vst.msk [vmem:[%s5623_s11] sm:$0xff] %vm2573_vm8, %v4022_v5  ;;  %v3992_v46 = vmax.f32 %v3976_v20, 0.0  ;;  %v4019_v20 = vld [vmem:[#allocation4 + $0x68] sm:$0xff] }
 0x998   : > { %v4025_v53 = vadd.f32 %v4009_v29, %v3993_v25 }
 0x999   : > { %v4907_v14 = vpop.f32.mrb[4].mxu0  ;;  %v4024_v33 = vadd.f32 %v4008_v52, %v3992_v46  ;;  %v4018_v52 = vld [vmem:[#allocation4 + $0x60] sm:$0xff] }
 0x99a   : > { %v3914_v61 = vadd.f32 %v4907_v14, %v4875_v41  ;;  %v3908_v50 = vpop.f32.mrb[5].mxu0  ;;  %4041 = vst.msk [vmem:[%s5623_s11 + $0x18] sm:$0xff] %vm2573_vm8, %v4025_v53 }
 0x99b   : > { %v3909_v39 = vadd.f32 %v3908_v50, %v3715_v48  ;;  %4040 = vst.msk [vmem:[%s5623_s11 + $0x10] sm:$0xff] %vm2573_vm8, %v4024_v33  ;;  %v4021_v33 = vld [vmem:[#allocation4 + $0x78] sm:$0xff] }
 0x99c   : > { %v3979_v47 = vadd.f32 %v6760_v54, %v3914_v61 }
 0x99d   : > { %v3978_v27 = vadd.f32 %v6760_v54, %v3909_v39  ;;  %v4910_v6 = vpop.f32.mrb[6].mxu0 }
 0x99e   : > { %v3995_v37 = vmax.f32 %v3979_v47, 0.0  ;;  %v3924_v62 = vadd.f32 %v4910_v6, %v4878_v12  ;;  %v3918_v30 = vpop.f32.mrb[7].mxu0  ;;  %v4015_v12 = vld [vmem:[#allocation4 + $0x48] sm:$0xff]  ;;  %v4020_v6 = vld [vmem:[#allocation4 + $0x70] sm:$0xff] }
 0x99f   : > { %v3994_v34 = vmax.f32 %v3978_v27, 0.0  ;;  %v3919_v2 = vadd.f32 %v3918_v30, %v3725_v24 }
 0x9a0   : > { %v4027_v0 = vadd.f32 %v4011_v15, %v3995_v37  ;;  %v3981_v4 = vadd.f32 %v6760_v54, %v3924_v62 }
 0x9a1   : > { %v4026_v35 = vadd.f32 %v4010_v43, %v3994_v34  ;;  %v3980_v1 = vadd.f32 %v6760_v54, %v3919_v2  ;;  %v4913_v23 = vpop.f32.mrb[8].mxu0 }
 0x9a2   : > { %4043 = vst.msk [vmem:[%s5623_s11 + $0x28] sm:$0xff] %vm2573_vm8, %v4027_v0  ;;  %v3997_v42 = vmax.f32 %v3981_v4, 0.0  ;;  %v3934_v60 = vadd.f32 %v4913_v23, %v4881_v51  ;;  %v3928_v40 = vpop.f32.mrb[9].mxu0  ;;  %v4014_v51 = vld [vmem:[#allocation4 + $0x40] sm:$0xff] }
 0x9a3   : > { %4042 = vst.msk [vmem:[%s5623_s11 + $0x20] sm:$0xff] %vm2573_vm8, %v4026_v35  ;;  %v3996_v8 = vmax.f32 %v3980_v1, 0.0  ;;  %v3929_v9 = vadd.f32 %v3928_v40, %v6743_v3 }
 0x9a4   : > { %v4029_v31 = vadd.f32 %v4013_v7, %v3997_v42  ;;  %v3983_v41 = vadd.f32 %v6760_v54, %v3934_v60 }
 0x9a5   : > { %v4028_v48 = vadd.f32 %v4012_v28, %v3996_v8  ;;  %v3982_v24 = vadd.f32 %v6760_v54, %v3929_v9  ;;  %v4916_v59 = vpop.f32.mrb[10].mxu0 }
 0x9a6   : > { %4045 = vst.msk [vmem:[%s5623_s11 + $0x38] sm:$0xff] %vm2573_vm8, %v4029_v31  ;;  %v3999_v38 = vmax.f32 %v3983_v41, 0.0  ;;  %v3944_v19 = vadd.f32 %v4916_v59, %v6745_v63  ;;  %v3938_v21 = vpop.f32.mrb[11].mxu0  ;;  %v4016_v63 = vld [vmem:[#allocation4 + $0x50] sm:$0xff] }
 0x9a7   : > { %4044 = vst.msk [vmem:[%s5623_s11 + $0x30] sm:$0xff] %vm2573_vm8, %v4028_v48  ;;  %v3998_v3 = vmax.f32 %v3982_v24, 0.0  ;;  %v3939_v45 = vadd.f32 %v3938_v21, %v6747_v16 }
 0x9a8   : > { %v4031_v10 = vadd.f32 %v4015_v12, %v3999_v38  ;;  %v3985_v57 = vadd.f32 %v6760_v54, %v3944_v19 }
 0x9a9   : > { %v4030_v17 = vadd.f32 %v4014_v51, %v3998_v3  ;;  %v3984_v11 = vadd.f32 %v6760_v54, %v3939_v45  ;;  %v4919_v44 = vpop.f32.mrb[12].mxu0 }
 0x9aa   : > { %4047 = vst.msk [vmem:[%s5623_s11 + $0x48] sm:$0xff] %vm2573_vm8, %v4031_v10  ;;  %v4001_v55 = vmax.f32 %v3985_v57, 0.0  ;;  %v3954_v22 = vadd.f32 %v4919_v44, %v6749_v49  ;;  %v3948_v13 = vpop.f32.mrb[13].mxu0 }
 0x9ab   : > { %4046 = vst.msk [vmem:[%s5623_s11 + $0x40] sm:$0xff] %vm2573_vm8, %v4030_v17  ;;  %v4000_v16 = vmax.f32 %v3984_v11, 0.0  ;;  %v3949_v36 = vadd.f32 %v3948_v13, %v6751_v32 }
 0x9ac   : > { %v4033_v26 = vadd.f32 %v4017_v56, %v4001_v55  ;;  %v3987_v5 = vadd.f32 %v6760_v54, %v3954_v22 }
 0x9ad   : > { %v4032_v29 = vadd.f32 %v4016_v63, %v4000_v16  ;;  %v3986_v14 = vadd.f32 %v6760_v54, %v3949_v36  ;;  %v4922_v25 = vpop.f32.mrb[14].mxu0 }
 0x9ae   : > { %4049 = vst.msk [vmem:[%s5623_s11 + $0x58] sm:$0xff] %vm2573_vm8, %v4033_v26  ;;  %v4003_v49 = vmax.f32 %v3987_v5, 0.0  ;;  %v3964_v61 = vadd.f32 %v4922_v25, %v6753_v58  ;;  %v3958_v50 = vpop.f32.mrb[15].mxu0 }
 0x9af   : > { %4048 = vst.msk [vmem:[%s5623_s11 + $0x50] sm:$0xff] %vm2573_vm8, %v4032_v29  ;;  %v4002_v32 = vmax.f32 %v3986_v14, 0.0  ;;  %v3959_v46 = vadd.f32 %v3958_v50, %v6755_v18 }
 0x9b0   : > { %v4035_v39 = vadd.f32 %v4019_v20, %v4003_v49  ;;  %v3989_v53 = vadd.f32 %v6760_v54, %v3964_v61 }
 0x9b1   : > { %v4034_v47 = vadd.f32 %v4018_v52, %v4002_v32  ;;  %v3988_v15 = vadd.f32 %v6760_v54, %v3959_v46 }
 0x9b2   : > { %4051 = vst.msk [vmem:[%s5623_s11 + $0x68] sm:$0xff] %vm2573_vm8, %v4035_v39  ;;  %v4005_v27 = vmax.f32 %v3989_v53, 0.0 }
 0x9b3   : > { %4050 = vst.msk [vmem:[%s5623_s11 + $0x60] sm:$0xff] %vm2573_vm8, %v4034_v47  ;;  %v4004_v58 = vmax.f32 %v3988_v15, 0.0 }
 0x9b4   : > { %v4037_v37 = vadd.f32 %v4021_v33, %v4005_v27 }
 0x9b5   : > { %v4036_v43 = vadd.f32 %v4020_v6, %v4004_v58 }
 0x9b6   : > { %4053 = vst.msk [vmem:[%s5623_s11 + $0x78] sm:$0xff] %vm2573_vm8, %v4037_v37 }
 0x9b7   : > { %4052 = vst.msk [vmem:[%s5623_s11 + $0x70] sm:$0xff] %vm2573_vm8, %v4036_v43 }
 0x9b8 PF: > { %s6916_s16 = sld [smem:[#allocation13_spill]]  ;;  %s6917_s0 = sld [smem:[#allocation9_spill]] }
 0x9b9   : > { %s6918_s30 = sld [smem:[#allocation16_spill]]  ;;  %s6919_s20 = sld [smem:[#allocation10_spill]] }
 0x9ba   : > { %s6920_s21 = sld [smem:[#allocation11_spill]]  ;;  %s6921_s1 = sld [smem:[#allocation12_spill]] }
 0x9bb   : > { %s6922_s22 = sld [smem:[#allocation14_spill]]  ;;  %s6923_s2 = sld [smem:[#allocation15_spill]] }
 0x9bc   : > { %s6924_s23 = sld [smem:[#allocation17_spill]] }
 0x9be   : > { %s29_s24 = sadd.s32 1, %s6916_s16  }
 0x9bf   : > { %p26_p3 = scmp.ge.s32.totalorder %s29_s24, 10  }
 0x9c1   :  { %28 = sbr.rel (!%p26_p3) target bundleno = 20 (0x14), region = 192 }

</bundles_post_ra>
